<compile_context>
chip_gen: v7x
topology: tpu7x:2x2x1
jax: 0.10.0
libtpu: 0.0.40
codegen_flags: <defaults>
</compile_context>

<pallas_src>
import functools

import jax
import jax.numpy as jnp
from jax.experimental import pallas as pl
from jax.experimental.pallas import tpu as pltpu

EPS = 1e-5


def _round_up(x, m):
    return -(-x // m) * m


def _bn_add_relu_kernel(x_ref, skip_ref, gamma_ref, beta_ref, o_ref, *, inv_count):
    # x_ref / skip_ref / o_ref : (N, Cb, HW)
    # gamma_ref / beta_ref     : (1, Cb, 1), float32
    x = x_ref[...].astype(jnp.float32)

    # Two-pass, numerically stable per-channel batch statistics.  x is already
    # resident in VMEM, so the second elementwise pass is VALU-only work that
    # hides under the HBM DMA of the next/previous tile.
    mean = jnp.sum(x, axis=(0, 2), keepdims=True) * inv_count           # (1, Cb, 1)
    centered = x - mean
    var = jnp.sum(centered * centered, axis=(0, 2), keepdims=True) * inv_count
    inv_std = jax.lax.rsqrt(var + EPS)

    # y = gamma * (x - mean) * inv_std + beta  ==  centered * scale + beta
    scale = gamma_ref[...] * inv_std                                    # (1, Cb, 1)

    skip = skip_ref[...].astype(jnp.float32)
    # Note: when Cb does not divide C, the last block's padded channels may
    # compute on uninitialized VMEM; those outputs are masked on writeback, so
    # valid results are unaffected.
    o_ref[...] = jnp.maximum(centered * scale + gamma_ref[...] * 0.0 + beta_ref[...]
                             + skip, 0.0).astype(o_ref.dtype)


def _device_info():
    """Returns (tensorcores per chip, VMEM working-set budget in bytes)."""
    kind = ""
    try:
        kind = jax.devices()[0].device_kind.lower()
    except Exception:
        pass
    if "v7" in kind:
        # v7x: 2 TensorCores/chip, only 64 MiB VMEM per TC -> stay well inside.
        return 2, 24 << 20
    # v5e / v6e: 1 TensorCore, 128 MiB VMEM -> allow large tiles.
    return 1, 48 << 20


def _pick_channel_tile(N, C, HW, itemsize, *, num_tc=1, budget_bytes=48 << 20,
                       min_steps=3):
    """Largest sublane-aligned channel tile that
       (a) fits the VMEM budget (x, skip, out slabs x 2 pipeline buffers),
       (b) keeps >= min_steps grid steps so DMA of tile c+1 hides compute of c,
       (c) makes the step count a multiple of num_tc (balanced split across
           TensorCores on v7x)."""
    # Sublane packing multiple: 8 for 4-byte, 16 for 2-byte, 32 for 1-byte dtypes.
    mult = max(8, 32 // itemsize)
    c_pad = _round_up(C, mult)

    per_channel_bytes = 3 * 2 * N * HW * itemsize       # 3 slabs, double-buffered
    cb_cap = (budget_bytes // max(per_channel_bytes, 1)) // mult * mult
    cb_cap = max(mult, min(cb_cap, c_pad))

    steps = max(min_steps, pl.cdiv(c_pad, cb_cap))
    if num_tc > 1:
        steps = _round_up(steps, num_tc)                # even work per TensorCore

    cb = _round_up(pl.cdiv(C, steps), mult)
    return max(mult, min(cb, cb_cap))


def bn_add_relu(x52, x39, gamma, beta, *, cb=None):
    """x52, x39: (N, C, H, W). Returns relu(batchnorm(x52) + x39), NCHW."""
    N, C, H, W = x52.shape
    HW = H * W
    itemsize = jnp.dtype(x52.dtype).itemsize

    # Free reshapes only (no transpose => no extra HBM traffic).
    x3 = x52.reshape(N, C, HW)
    s3 = x39.reshape(N, C, HW)
    g = gamma.reshape(1, C, 1).astype(jnp.float32)
    b = beta.reshape(1, C, 1).astype(jnp.float32)

    num_tc, budget = _device_info()
    if cb is None:
        cb = _pick_channel_tile(N, C, HW, itemsize, num_tc=num_tc,
                                budget_bytes=budget)
    grid = (pl.cdiv(C, cb),)

    kernel = functools.partial(_bn_add_relu_kernel, inv_count=1.0 / float(N * HW))

    vmem_limit = (32 << 20) if num_tc > 1 else (64 << 20)
    cost = pl.CostEstimate(
        flops=8 * N * C * HW,                 # sums, center, square, scale, add, relu
        transcendentals=C,                    # rsqrt per channel
        bytes_accessed=3 * N * C * HW * itemsize + 2 * C * 4,
    )

    out3 = pl.pallas_call(
        kernel,
        out_shape=jax.ShapeDtypeStruct((N, C, HW), x52.dtype),
        grid_spec=pltpu.PrefetchScalarGridSpec(
            num_scalar_prefetch=0,
            grid=grid,
            in_specs=[
                pl.BlockSpec((N, cb, HW), lambda c: (0, c, 0)),
                pl.BlockSpec((N, cb, HW), lambda c: (0, c, 0)),
                pl.BlockSpec((1, cb, 1), lambda c: (0, c, 0)),
                pl.BlockSpec((1, cb, 1), lambda c: (0, c, 0)),
            ],
            out_specs=pl.BlockSpec((N, cb, HW), lambda c: (0, c, 0)),
        ),
        compiler_params=pltpu.CompilerParams(
            dimension_semantics=("parallel",),   # channel tiles shard across TCs
            vmem_limit_bytes=vmem_limit,
        ),
        cost_estimate=cost,
    )(x3, s3, g, b)

    return out3.reshape(N, C, H, W)


def _reference(x52, x39, gamma, beta):
    # Plain-JAX training-mode BatchNorm2d + add + relu (f32 math).
    x = x52.astype(jnp.float32)
    s = x39.astype(jnp.float32)
    mean = jnp.mean(x, axis=(0, 2, 3), keepdims=True)
    var = jnp.mean((x - mean) ** 2, axis=(0, 2, 3), keepdims=True)
    y = gamma.reshape(1, -1, 1, 1) * (x - mean) * jax.lax.rsqrt(var + EPS) \
        + beta.reshape(1, -1, 1, 1)
    return jnp.maximum(y + s, 0.0)


if __name__ == "__main__":
    # Exact module shapes: (1, 696, 28, 28) — ~2.2 MB per tensor, exercises the
    # multi-tile channel grid (696 channels -> 3 steps on v5e/v6e, 4 on v7x).
    N, C, H, W = 1, 696, 28, 28

    key = jax.random.PRNGKey(0)
    k1, k2, k3, k4 = jax.random.split(key, 4)
    x52 = jax.random.normal(k1, (N, C, H, W), dtype=jnp.float32)
    x39 = jax.random.normal(k2, (N, C, H, W), dtype=jnp.float32)
    gamma = 1.0 + 0.1 * jax.random.normal(k3, (C,), dtype=jnp.float32)
    beta = 0.1 * jax.random.normal(k4, (C,), dtype=jnp.float32)

    # float32 path (matches the PyTorch module)
    out = bn_add_relu(x52, x39, gamma, beta)
    jax.block_until_ready(out)
    ref = _reference(x52, x39, gamma, beta)
    assert out.shape == (N, C, H, W)
    assert jnp.allclose(out, ref, atol=1e-4, rtol=1e-4)

    # bf16 I/O path (stats still f32 in-kernel) — ~2x HBM bandwidth win.
    x52_bf = x52.astype(jnp.bfloat16)
    x39_bf = x39.astype(jnp.bfloat16)
    out_bf = bn_add_relu(x52_bf, x39_bf, gamma, beta)
    jax.block_until_ready(out_bf)
    ref_bf = _reference(x52_bf, x39_bf, gamma, beta)
    assert out_bf.dtype == jnp.bfloat16
    assert jnp.allclose(out_bf.astype(jnp.float32), ref_bf, atol=1e-1, rtol=1e-1)

    print("KERNEL_OK")
</pallas_src>

<mosaic_0001>
module attributes {stable_mosaic.version = 11 : i64} {
  func.func @_bn_add_relu_kernel(%arg0: i32, %arg1: memref<1x232x784xf32, #tpu.memory_space<vmem>>, %arg2: memref<1x232x784xf32, #tpu.memory_space<vmem>>, %arg3: memref<1x232x1xf32, #tpu.memory_space<vmem>>, %arg4: memref<1x232x1xf32, #tpu.memory_space<vmem>>, %arg5: memref<1x232x784xf32, #tpu.memory_space<vmem>>) attributes {dimension_semantics = [#tpu.dimension_semantics<parallel>], iteration_bounds = array<i64: 3>, scalar_prefetch = 0 : i64, scratch_operands = 0 : i64, tpu.core_type = #tpu.core_type<tc>, window_params = [{transform_indices = @transform_0, window_bounds = array<i64: 1, 232, 784>}, {transform_indices = @transform_1, window_bounds = array<i64: 1, 232, 784>}, {transform_indices = @transform_2, window_bounds = array<i64: 1, 232, 1>}, {transform_indices = @transform_3, window_bounds = array<i64: 1, 232, 1>}, {transform_indices = @transform_4, window_bounds = array<i64: 1, 232, 784>}]} {
    %c0 = arith.constant 0 : index
    %c0_0 = arith.constant 0 : index
    %c0_1 = arith.constant 0 : index
    %0 = vector.load %arg1[%c0, %c0_0, %c0_1] : memref<1x232x784xf32, #tpu.memory_space<vmem>>, vector<1x232x784xf32>
    %cst = arith.constant dense<0.000000e+00> : vector<232xf32>
    %1 = vector.multi_reduction <add>, %0, %cst [0, 2] : vector<1x232x784xf32> to vector<232xf32>
    %2 = vector.shape_cast %1 : vector<232xf32> to vector<1x232x1xf32>
    %cst_2 = arith.constant 0.00127551018 : f32
    %3 = vector.broadcast %cst_2 : f32 to vector<1x232x1xf32>
    %4 = arith.mulf %2, %3 : vector<1x232x1xf32>
    %5 = vector.broadcast %4 : vector<1x232x1xf32> to vector<1x232x784xf32>
    %6 = arith.subf %0, %5 : vector<1x232x784xf32>
    %7 = arith.mulf %6, %6 : vector<1x232x784xf32>
    %cst_3 = arith.constant dense<0.000000e+00> : vector<232xf32>
    %8 = vector.multi_reduction <add>, %7, %cst_3 [0, 2] : vector<1x232x784xf32> to vector<232xf32>
    %9 = vector.shape_cast %8 : vector<232xf32> to vector<1x232x1xf32>
    %cst_4 = arith.constant 0.00127551018 : f32
    %10 = vector.broadcast %cst_4 : f32 to vector<1x232x1xf32>
    %11 = arith.mulf %9, %10 : vector<1x232x1xf32>
    %cst_5 = arith.constant 9.99999974E-6 : f32
    %12 = vector.broadcast %cst_5 : f32 to vector<1x232x1xf32>
    %13 = arith.addf %11, %12 : vector<1x232x1xf32>
    %14 = math.rsqrt %13 : vector<1x232x1xf32>
    %c0_6 = arith.constant 0 : index
    %c0_7 = arith.constant 0 : index
    %c0_8 = arith.constant 0 : index
    %15 = vector.load %arg3[%c0_6, %c0_7, %c0_8] : memref<1x232x1xf32, #tpu.memory_space<vmem>>, vector<1x232x1xf32>
    %16 = arith.mulf %15, %14 : vector<1x232x1xf32>
    %c0_9 = arith.constant 0 : index
    %c0_10 = arith.constant 0 : index
    %c0_11 = arith.constant 0 : index
    %17 = vector.load %arg2[%c0_9, %c0_10, %c0_11] : memref<1x232x784xf32, #tpu.memory_space<vmem>>, vector<1x232x784xf32>
    %18 = vector.broadcast %16 : vector<1x232x1xf32> to vector<1x232x784xf32>
    %19 = arith.mulf %6, %18 : vector<1x232x784xf32>
    %c0_12 = arith.constant 0 : index
    %c0_13 = arith.constant 0 : index
    %c0_14 = arith.constant 0 : index
    %20 = vector.load %arg3[%c0_12, %c0_13, %c0_14] : memref<1x232x1xf32, #tpu.memory_space<vmem>>, vector<1x232x1xf32>
    %cst_15 = arith.constant 0.000000e+00 : f32
    %21 = vector.broadcast %cst_15 : f32 to vector<1x232x1xf32>
    %22 = arith.mulf %20, %21 : vector<1x232x1xf32>
    %23 = vector.broadcast %22 : vector<1x232x1xf32> to vector<1x232x784xf32>
    %24 = arith.addf %19, %23 : vector<1x232x784xf32>
    %c0_16 = arith.constant 0 : index
    %c0_17 = arith.constant 0 : index
    %c0_18 = arith.constant 0 : index
    %25 = vector.load %arg4[%c0_16, %c0_17, %c0_18] : memref<1x232x1xf32, #tpu.memory_space<vmem>>, vector<1x232x1xf32>
    %26 = vector.broadcast %25 : vector<1x232x1xf32> to vector<1x232x784xf32>
    %27 = arith.addf %24, %26 : vector<1x232x784xf32>
    %28 = arith.addf %27, %17 : vector<1x232x784xf32>
    %cst_19 = arith.constant 0.000000e+00 : f32
    %29 = vector.broadcast %cst_19 : f32 to vector<1x232x784xf32>
    %30 = arith.maximumf %28, %29 : vector<1x232x784xf32>
    %c0_20 = arith.constant 0 : index
    %c0_21 = arith.constant 0 : index
    %c0_22 = arith.constant 0 : index
    %31 = vector.load %arg5[%c0_20, %c0_21, %c0_22] : memref<1x232x784xf32, #tpu.memory_space<vmem>>, vector<1x232x784xf32>
    tpu.vector_store %arg5[%c0_20, %c0_21, %c0_22], %30 {strides = array<i32>} : memref<1x232x784xf32, #tpu.memory_space<vmem>>, vector<1x232x784xf32>,
    return
  }
  func.func @transform_0(%arg0: i32) -> (i32, i32, i32) {
    %c0_i32 = arith.constant 0 : i32
    %c0_i32_0 = arith.constant 0 : i32
    %c0_i32_1 = arith.constant 0 : i32
    return %c0_i32, %arg0, %c0_i32_0 : i32, i32, i32
  }
  func.func @transform_1(%arg0: i32) -> (i32, i32, i32) {
    %c0_i32 = arith.constant 0 : i32
    %c0_i32_0 = arith.constant 0 : i32
    %c0_i32_1 = arith.constant 0 : i32
    return %c0_i32, %arg0, %c0_i32_0 : i32, i32, i32
  }
  func.func @transform_2(%arg0: i32) -> (i32, i32, i32) {
    %c0_i32 = arith.constant 0 : i32
    %c0_i32_0 = arith.constant 0 : i32
    %c0_i32_1 = arith.constant 0 : i32
    return %c0_i32, %arg0, %c0_i32_0 : i32, i32, i32
  }
  func.func @transform_3(%arg0: i32) -> (i32, i32, i32) {
    %c0_i32 = arith.constant 0 : i32
    %c0_i32_0 = arith.constant 0 : i32
    %c0_i32_1 = arith.constant 0 : i32
    return %c0_i32, %arg0, %c0_i32_0 : i32, i32, i32
  }
  func.func @transform_4(%arg0: i32) -> (i32, i32, i32) {
    %c0_i32 = arith.constant 0 : i32
    %c0_i32_0 = arith.constant 0 : i32
    %c0_i32_1 = arith.constant 0 : i32
    return %c0_i32, %arg0, %c0_i32_0 : i32, i32, i32
  }
}

</mosaic_0001>

<bundles_post_ra>
// kernel: tpu_custom_call.1
= control target key start
LH: loop header
LB: loop body
LE: loop exit
PB: predicated region body
PF: predicated region fallthrough
CT: control target
= control target key end

     0   :  { %s7413_s0 = inlined_call_operand.hbm [shape: f32[1,696,784], index: 0, kind: input, shape index: {}]   ;;  %s7414_s1 = inlined_call_operand.hbm [shape: f32[1,696,784], index: 1, kind: input, shape index: {}]   ;;  %s7415_s2 = inlined_call_operand.hbm [shape: f32[1,696,1], index: 2, kind: input, shape index: {}]   ;;  %s7416_s3 = inlined_call_operand.hbm [shape: f32[1,696,1], index: 3, kind: input, shape index: {}]   ;;  %s7417_s4 = inlined_call_operand.hbm [shape: f32[1,696,784], index: 4, kind: output, shape index: {}]  }
   0x1   :  { %7640 = sst [smem:[#allocation234_spill]] %s7414_s1 }
   0x2   :  { %9 = vsyncpa [#allocation3], 0 }
   0x3   :  { %11 = vsyncpa [#allocation3 + $0x1], 0 }
   0x4   :  { %12 = vsyncpa [#allocation6], 0 }
   0x5   :  { %14 = vsyncpa [#allocation6 + $0x1], 0 }
   0x6   :  { %15 = vsyncpa [#allocation9], 0 }
   0x7   :  { %17 = vsyncpa [#allocation9 + $0x1], 0 }
   0x8   :  { %18 = vsyncpa [#allocation4], 0 }
   0x9   :  { %20 = vsyncpa [#allocation4 + $0x1], 0  ;;  %s4332_s15 = smov 0   ;;  %s4334_s16 = smov 0  }
   0xa   :  { %s4336_s17 = smov 0   ;;  %s4338_s18 = smov 0  }
   0xb LB: > { %s4353_s19 = sadd.s32 4294967295, %s4293_s18   ;;  %s3714_s20 = sadd.s32 4294967294, %s4293_s18   ;;  %s4293_s18 = sphi %s4338_s18, %s8097_s18   ;;  %s4289_s17 = sphi %s4336_s17, %s8096_s17   ;;  %s4285_s16 = sphi %s4334_s16, %s8095_s16   ;;  %s4281_s15 = sphi %s4332_s15, %s8094_s15  }
   0xc   : > { %s4357_s21 = sadd.s32 1, %s4293_s18   ;;  %s33_s22 = sadd.s32 1, %s4289_s17 }
   0xd   : > { %s30_s23 = ssub.s32 %s4293_s18, %s4357_s21  ;;  %p40_p0 = scmp.ne.s32.totalorder %s4289_s17, %s4285_s16 }
   0xe   : > { %p31_p1 = scmp.eq.s32.totalorder %s30_s23, 0  ;;  %p41_p2 = scmp.eq.s32.totalorder %s4293_s18, 0 }
   0xf   : > { %p46_p3 = scmp.ne.s32.totalorder %s4285_s16, %s4281_s15  ;;  %p47_p4 = scmp.eq.s32.totalorder %s4353_s19, 0 }
  0x10   : > { %s4369_s24 = scalar_select %p31_p1, %s4289_s17, %s33_s22  }
  0x11   : > { %p42_p5 = por %p41_p2, %p40_p0  ;;  %p4371_p6 = por %p47_p4, %p46_p3 }
  0x12   : > { %7641 = sst [smem:[#allocation15_spill]] %s4369_s24  ;;  %p148_p7 = scmp.eq.s32.totalorder %s4353_s19, 2 }
  0x13   : > { %s7642_s25 = scalar_select %p4371_p6, 1, 0 }
  0x14   : > { %p154_p8 = scmp.eq.s32.totalorder %s3714_s20, 2  ;;  %p3763_p9 = scmp.lt.s32.totalorder %s4293_s18, 3 }
  0x15   : > { %p4377_p10 = por %p148_p7, %p40_p0  ;;  %s4386_s28 = sand.u32 1, %s4289_s17  }
  0x16   : > { %p4381_p11 = por %p154_p8, %p46_p3  ;;  %s3727_s29 = smul.u32 1624, %s4386_s28 }
  0x17   : > { %s7643_s26 = scalar_select %p4377_p10, 1, 0 }
  0x18   : > { %s7644_s27 = scalar_select %p4381_p11, 1, 0 }
  0x19   : > { %p4389_p12 = pnand %p3763_p9, %p42_p5  ;;  %s3764_s5 = smul.u32 25984, %s4293_s18 }
  0x1a   : > { %s196_s6 = sand.u32 1, %s4293_s18   ;;  %s7646_s1 = sld [smem:[#allocation234_spill]] }
  0x1b   : > { %s200_s10 = scalar_lea.vmem [#allocation5], %s3727_s29  ;;  %s4408_s12 = scalar_lea.sflag [#allocation6], %s196_s6 }
  0x1c   : > { %s208_s11 = sshll.u32 %s200_s10, 4  ;;  %p4414_p2 = pneg %p4389_p12  ;;  %s4405_s11 = int_to_ptr.vmem [resolvable:$true] %s208_s11 }
  0x20   : > { %s4400_s9 = scalar_lea.hbm %s7646_s1, %s3764_s5  ;;  %s4104_s23 = scalar_lea.hbm %s7646_s1, 77952 }
  0x21   : > { %s4099_s13 = scalar_lea.hbm %s4400_s9, 25984  ;;  %p4105_p5 = scmp.lt.u32.totalorder %s4400_s9, %s7646_s1 }
  0x22   : > { %p4100_p1 = scmp.ne.s32.totalorder %s4400_s9, %s4099_s13  ;;  %p4106_p7 = scmp.lt.u32.totalorder %s4104_s23, %s4099_s13 }
  0x23   : > { %p4108_p9 = scmp.lt.u32.totalorder %s4099_s13, %s4400_s9 }
  0x24   : > { %p4102_p3 = pnand %p4414_p2, %p4100_p1  ;;  %p4107_p8 = por %p4106_p7, %p4105_p5 }
  0x26   : > { %p4103_p4 = pneg %p4102_p3  ;;  %p4109_p13 = por %p4108_p9, %p4107_p8 }
  0x28   : > { %p4110_p0 = pnand %p4109_p13, %p4103_p4 }
  0x2a   : > { %4113 = shalt.err (!%p4110_p0)
}
  0x2b   : > { %s4114_s6 = scalar_lea.vmem %s4405_s11, 25984  ;;  %s4295_s10 = smov [#allocation5]  }
  0x2c   : > { %p4115_p1 = scmp.ne.s32.totalorder %s4405_s11, %s4114_s6  ;;  %s4119_s20 = sshll.u32 %s4295_s10, 4  ;;  %s4120_s20 = int_to_ptr.vmem [resolvable:$false] %s4119_s20 }
  0x2d   : > { %s4121_s22 = scalar_lea.vmem %s4120_s20, 51968  ;;  %p4122_p10 = scmp.lt.s32.totalorder %s4405_s11, %s4120_s20 }
  0x2e   : > { %p4117_p3 = pnand %p4115_p1, %p4414_p2  ;;  %p4123_p6 = scmp.lt.s32.totalorder %s4121_s22, %s4114_s6 }
  0x30   : > { %p4118_p11 = pneg %p4117_p3  ;;  %p4124_p5 = por %p4123_p6, %p4122_p10 }
  0x32   : > { %p4125_p7 = pnand %p4124_p5, %p4118_p11 }
  0x34   : > { %4128 = shalt.err (!%p4125_p7)
}
  0x35   : > { %s7420_s13 = smov 896   ;;  %s7421_s23 = smov 56  }
  0x36   : > { %3752 = dma.hbm_to_vmem [thread:$0]  (!%p4389_p12), %s4400_s9, 25984, %s4405_s11, %s4408_s12, %s7420_s13, %s7420_s13, %s7421_s23  }
  0x37   : > { %p7648_p6 = scmp.lt.s32.totalorder %s4293_s18, 4  ;;  %p7649_p10 = scmp.ge.s32.totalorder %s4293_s18, 1 }
  0x38   : > { %s4454_s10 = scalar_lea.hbm %s7413_s0, %s3764_s5  ;;  %s178_s20 = scalar_lea.vmem [#allocation2], %s3727_s29 }
  0x39   : > { %p4445_p11 = pnand %p7649_p10, %p7648_p6  ;;  %s186_s22 = sshll.u32 %s178_s20, 4  ;;  %s4459_s22 = int_to_ptr.vmem [resolvable:$true] %s186_s22 }
  0x3a   : > { %s3731_s9 = smul.u32 232, %s4386_s28  ;;  %s175_s13 = scalar_lea.sflag [#allocation3], %s4386_s28 }
  0x3b   : > { %s7650_s7 = scalar_select %p4445_p11, 1, 0 }
  0x3c   : > { %s3725_s11 = smul.u32 3712, %s4293_s18  ;;  %s4129_s23 = scalar_lea.hbm %s4454_s10, 25984 }
  0x3d   : > { %p4130_p13 = scmp.ne.s32.totalorder %s4454_s10, %s4129_s23  ;;  %s4134_s6 = scalar_lea.hbm %s7413_s0, 77952 }
  0x3e   : > { %p4135_p8 = scmp.lt.u32.totalorder %s4454_s10, %s7413_s0  ;;  %p4136_p9 = scmp.lt.u32.totalorder %s4134_s6, %s4129_s23 }
  0x3f   : > { %p4132_p0 = pnand %p4130_p13, %p4414_p2  ;;  %p4138_p3 = scmp.lt.u32.totalorder %s4129_s23, %s4454_s10 }
  0x40   : > { %p4137_p1 = por %p4136_p9, %p4135_p8 }
  0x41   : > { %p4133_p4 = pneg %p4132_p0 }
  0x42   : > { %p4139_p5 = por %p4138_p3, %p4137_p1 }
  0x44   : > { %p4140_p7 = pnand %p4139_p5, %p4133_p4 }
  0x46   : > { %4143 = shalt.err (!%p4140_p7)
}
  0x47   : > { %s4144_s29 = scalar_lea.vmem %s4459_s22, 25984  ;;  %s4298_s20 = smov [#allocation2]  }
  0x48   : > { %p4145_p6 = scmp.ne.s32.totalorder %s4459_s22, %s4144_s29  ;;  %s4149_s8 = sshll.u32 %s4298_s20, 4  ;;  %s4150_s8 = int_to_ptr.vmem [resolvable:$false] %s4149_s8 }
  0x49   : > { %s4151_s1 = scalar_lea.vmem %s4150_s8, 51968  ;;  %p4152_p0 = scmp.lt.s32.totalorder %s4459_s22, %s4150_s8 }
  0x4a   : > { %p4147_p10 = pnand %p4145_p6, %p4414_p2  ;;  %p4153_p11 = scmp.lt.s32.totalorder %s4151_s1, %s4144_s29 }
  0x4c   : > { %p4148_p13 = pneg %p4147_p10  ;;  %p4154_p8 = por %p4153_p11, %p4152_p0 }
  0x4e   : > { %p4155_p9 = pnand %p4154_p8, %p4148_p13 }
  0x50   : > { %4158 = shalt.err (!%p4155_p9)
}
  0x51   : > { %s7651_s24 = smov 56   ;;  %s7652_s23 = smov 896  }
  0x52   : > { %3749 = dma.hbm_to_vmem [thread:$0]  (!%p4389_p12), %s4454_s10, 25984, %s4459_s22, %s175_s13, %s7652_s23, %s7652_s23, %s7651_s24  }
  0x53   : > { %s4494_s29 = scalar_lea.hbm %s7415_s2, %s3725_s11  ;;  %s222_s20 = scalar_lea.vmem [#allocation7], %s3731_s9 }
  0x54   : > { %s229_s8 = sshll.u32 %s222_s20, 4  ;;  %s4159_s1 = scalar_lea.hbm %s4494_s29, 3712  ;;  %s4498_s8 = int_to_ptr.vmem [resolvable:$true] %s229_s8 }
  0x55   : > { %p4160_p11 = scmp.ne.s32.totalorder %s4494_s29, %s4159_s1  ;;  %s4164_s22 = scalar_lea.hbm %s7415_s2, 11136 }
  0x56   : > { %p4165_p3 = scmp.lt.u32.totalorder %s4494_s29, %s7415_s2  ;;  %p4166_p5 = scmp.lt.u32.totalorder %s4164_s22, %s4159_s1 }
  0x57   : > { %p4162_p4 = pnand %p4160_p11, %p4414_p2  ;;  %p4168_p6 = scmp.lt.u32.totalorder %s4159_s1, %s4494_s29 }
  0x58   : > { %p4167_p7 = por %p4166_p5, %p4165_p3 }
  0x59   : > { %p4163_p1 = pneg %p4162_p4 }
  0x5a   : > { %p4169_p10 = por %p4168_p6, %p4167_p7 }
  0x5c   : > { %p4170_p13 = pnand %p4169_p10, %p4163_p1 }
  0x5e   : > { %4173 = shalt.err (!%p4170_p13)
}
  0x5f   : > { %s4174_s5 = scalar_lea.vmem %s4498_s8, 3712  ;;  %s4299_s6 = smov [#allocation7]  }
  0x60   : > { %p4175_p0 = scmp.ne.s32.totalorder %s4498_s8, %s4174_s5  ;;  %s4179_s20 = sshll.u32 %s4299_s6, 4  ;;  %s4180_s20 = int_to_ptr.vmem [resolvable:$false] %s4179_s20 }
  0x61   : > { %s4181_s13 = scalar_lea.vmem %s4180_s20, 7424  ;;  %p4182_p11 = scmp.lt.s32.totalorder %s4498_s8, %s4180_s20 }
  0x62   : > { %p4177_p8 = pnand %p4175_p0, %p4414_p2  ;;  %p4183_p4 = scmp.lt.s32.totalorder %s4181_s13, %s4174_s5 }
  0x64   : > { %p4178_p9 = pneg %p4177_p8  ;;  %p4184_p3 = por %p4183_p4, %p4182_p11 }
  0x66   : > { %p4185_p5 = pnand %p4184_p3, %p4178_p9 }
  0x68   : > { %4188 = shalt.err (!%p4185_p5)
}
  0x69   : > { %s4300_s1 = smov 128   ;;  %s4301_s10 = smov 8  }
  0x6a   : > { %3755 = dma.hbm_to_vmem [thread:$0]  (!%p4389_p12), %s4494_s29, 3712, %s4498_s8, %s4408_s12, %s4300_s1, %s4300_s1, %s4301_s10  }
  0x6b   : > { %s4530_s23 = scalar_lea.hbm %s7416_s3, %s3725_s11  ;;  %s243_s5 = scalar_lea.vmem [#allocation8], %s3731_s9 }
  0x6c   : > { %s250_s6 = sshll.u32 %s243_s5, 4  ;;  %s240_s20 = scalar_lea.sflag [#allocation9], %s4386_s28  ;;  %s4534_s6 = int_to_ptr.vmem [resolvable:$true] %s250_s6 }
  0x6d   : > { %s4189_s13 = scalar_lea.hbm %s4530_s23, 3712  ;;  %s4194_s11 = scalar_lea.hbm %s7416_s3, 11136 }
  0x6e   : > { %p4190_p1 = scmp.ne.s32.totalorder %s4530_s23, %s4189_s13  ;;  %p4195_p10 = scmp.lt.u32.totalorder %s4530_s23, %s7416_s3 }
  0x6f   : > { %p4196_p13 = scmp.lt.u32.totalorder %s4194_s11, %s4189_s13  ;;  %p4198_p8 = scmp.lt.u32.totalorder %s4189_s13, %s4530_s23 }
  0x70   : > { %p4192_p7 = pnand %p4190_p1, %p4414_p2 }
  0x71   : > { %p4197_p0 = por %p4196_p13, %p4195_p10 }
  0x72   : > { %p4193_p6 = pneg %p4192_p7 }
  0x73   : > { %p4199_p9 = por %p4198_p8, %p4197_p0 }
  0x75   : > { %p4200_p11 = pnand %p4199_p9, %p4193_p6 }
  0x77   : > { %4203 = shalt.err (!%p4200_p11)
}
  0x78   : > { %s4204_s9 = scalar_lea.vmem %s4534_s6, 3712  ;;  %s4302_s24 = smov [#allocation8]  }
  0x79   : > { %p4205_p4 = scmp.ne.s32.totalorder %s4534_s6, %s4204_s9  ;;  %s4209_s5 = sshll.u32 %s4302_s24, 4  ;;  %s4210_s5 = int_to_ptr.vmem [resolvable:$false] %s4209_s5 }
  0x7a   : > { %s4211_s12 = scalar_lea.vmem %s4210_s5, 7424  ;;  %p4212_p1 = scmp.lt.s32.totalorder %s4534_s6, %s4210_s5 }
  0x7b   : > { %p4207_p3 = pnand %p4205_p4, %p4414_p2  ;;  %p4213_p7 = scmp.lt.s32.totalorder %s4211_s12, %s4204_s9 }
  0x7d   : > { %p4208_p5 = pneg %p4207_p3  ;;  %p4214_p10 = por %p4213_p7, %p4212_p1 }
  0x7f   : > { %p4215_p13 = pnand %p4214_p10, %p4208_p5 }
  0x81   : > { %4218 = shalt.err (!%p4215_p13)
}
  0x82   : > { %3758 = dma.hbm_to_vmem [thread:$0]  (!%p4389_p12), %s4530_s23, 3712, %s4534_s6, %s240_s20, %s4300_s1, %s4300_s1, %s4301_s10  }
  0x83   : > { %p7653_p2 = scmp.ne.s32.totalorder %s7650_s7, 0 }
  0x85   : > { %262 = sbr.rel (%p7653_p2) target bundleno = 965 (0x3c5), region = 36 }
  0x8c   : > { %s4566_s14 = sand.u32 1, %s4285_s16   ;;  %p7654_p6 = scmp.ne.s32.totalorder %s7642_s25, 0 }
  0x8d   : > { %s4569_s13 = smul.u32 1624, %s4566_s14  ;;  %s265_s30 = scalar_lea.sflag [#allocation3], %s4566_s14 }
  0x8f   : > { %s4573_s29 = scalar_lea.vmem [#allocation2], %s4569_s13 }
  0x90   : > { %4264 = dma.done.wait (%p7654_p6), %s265_s30, 25984  }
  0x91   : > { %4266 = vsyncadd (%p7654_p6), %s265_s30, 4294941312  ;;  %s273_s28 = sand.u32 1, %s4353_s19   ;;  %s4581_s1 = scalar_lea.vmem [#allocation5], %s4569_s13 }
  0x92   : > { %s274_s7 = scalar_lea.sflag [#allocation6], %s273_s28 }
  0x93   : > { %4268 = dma.done.wait (%p7654_p6), %s274_s7, 29696  }
  0x94   : > { %4270 = vsyncadd (%p7654_p6), %s274_s7, 4294937600  ;;  %s3734_s10 = smul.u32 232, %s4566_s14  ;;  %s292_s6 = scalar_lea.sflag [#allocation9], %s4566_s14 }
  0x96   : > { %s4588_s23 = scalar_lea.vmem [#allocation7], %s3734_s10  ;;  %s4591_s20 = scalar_lea.vmem [#allocation8], %s3734_s10 }
  0x97   : > { %4272 = dma.done.wait (%p7654_p6), %s292_s6, 3712  }
  0x98   : > { %4274 = vsyncadd (%p7654_p6), %s292_s6, 4294963584  ;;  %v4303_v0 = vmov 0   ;;  %v354_v1 = vld [vmem:[%s4573_s29 + $0x70] sm:$0xff]  ;;  %v355_v2 = vld [vmem:[%s4573_s29 + $0x78] sm:$0xff]  ;;  %vm548_vm0 = vcmask 130048   ;;  %s6361_s25 = scalar_lea.vmem [#allocation10], %s4569_s13 }
  0x99   : > { %3808 = vset.pattern.permute.xlu1 %v4303_v0  ;;  %3807 = vset.pattern.permute.xlu0 %v4303_v0  ;;  %v356_v3 = vld [vmem:[%s4573_s29 + $0x80] sm:$0xff]  ;;  %v562_v4 = vadd.f32 %v355_v2, %v354_v1  ;;  %v357_v5 = vld [vmem:[%s4573_s29 + $0x88] sm:$0xff]  ;;  %v358_v8 = vld [vmem:[%s4573_s29 + $0x90] sm:$0xff]  ;;  %s3766_s11 = smul.u32 25984, %s4353_s19  ;;  %s3575_s8 = sshll.u32 %s6361_s25, 4  ;;  %s7362_s8 = int_to_ptr.vmem [resolvable:$true] %s3575_s8 }
  0x9a   : > { %v340_v6 = vld [vmem:[%s4573_s29] sm:$0xff]  ;;  %v341_v7 = vld [vmem:[%s4573_s29 + $0x8] sm:$0xff]  ;;  %v342_v10 = vld [vmem:[%s4573_s29 + $0x10] sm:$0xff]  ;;  %s3561_s24 = scalar_lea.sflag [#allocation4], %s4566_s14  ;;  %s4219_s5 = scalar_lea.vmem %s7362_s8, 25984 }
  0x9b   : > { %v563_v9 = vadd.f32 %v562_v4, %v356_v3  ;;  %v543_v11 = vadd.f32 %v341_v7, %v340_v6  ;;  %v359_v12 = vld [vmem:[%s4573_s29 + $0x98] sm:$0xff]  ;;  %v361_v14 = vld [vmem:[%s4573_s29 + $0xa8] sm:$0xff]  ;;  %v360_v15 = vld [vmem:[%s4573_s29 + $0xa0] sm:$0xff]  ;;  %s7360_s9 = scalar_lea.hbm %s7417_s4, %s3766_s11  ;;  %p4220_p12 = scmp.ne.s32.totalorder %s7362_s8, %s4219_s5 }
  0x9c   : > { %v343_v13 = vld [vmem:[%s4573_s29 + $0x18] sm:$0xff]  ;;  %v362_v18 = vld [vmem:[%s4573_s29 + $0xb0] sm:$0xff]  ;;  %v344_v20 = vld [vmem:[%s4573_s29 + $0x20] sm:$0xff]  ;;  %v567_v29 = vsel %vm548_vm0, %v360_v15, 0.0  ;;  %p8091_p0 = scmp.ne.s32.totalorder %s7643_s26, 0  ;;  %s4304_s12 = smov [#allocation10]  }
  0x9d   : > { %v564_v16 = vadd.f32 %v563_v9, %v357_v5  ;;  %v544_v17 = vadd.f32 %v543_v11, %v342_v10  ;;  %v363_v19 = vld [vmem:[%s4573_s29 + $0xb8] sm:$0xff]  ;;  %v346_v21 = vld [vmem:[%s4573_s29 + $0x30] sm:$0xff]  ;;  %v364_v22 = vld [vmem:[%s4573_s29 + $0xc0] sm:$0xff]  ;;  %v571_v23 = vadd.f32 %v362_v18, %v361_v14  ;;  %s4223_s13 = sshll.u32 %s4304_s12, 4  ;;  %s4224_s13 = int_to_ptr.vmem [resolvable:$false] %s4223_s13 }
  0x9e   : > { %v347_v26 = vld [vmem:[%s4573_s29 + $0x38] sm:$0xff]  ;;  %v348_v27 = vld [vmem:[%s4573_s29 + $0x40] sm:$0xff]  ;;  %v349_v28 = vld [vmem:[%s4573_s29 + $0x48] sm:$0xff]  ;;  %v549_v40 = vsel %vm548_vm0, %v346_v21, 0.0  ;;  %p4221_p8 = pnand %p4220_p12, %p8091_p0  ;;  %s4225_s30 = scalar_lea.vmem %s4224_s13, 51968 }
  0x9f   : > { %v565_v24 = vadd.f32 %v564_v16, %v358_v8  ;;  %v545_v25 = vadd.f32 %v544_v17, %v343_v13  ;;  %v345_v30 = vld [vmem:[%s4573_s29 + $0x28] sm:$0xff]  ;;  %v572_v32 = vadd.f32 %v571_v23, %v363_v19  ;;  %v553_v33 = vadd.f32 %v348_v27, %v347_v26  ;;  %v366_v36 = vld [vmem:[%s4573_s29 + $0xd0] sm:$0xff]  ;;  %v375_v38 = vld [vmem:[%s4573_s29 + $0x118] sm:$0xff]  ;;  %p4226_p11 = scmp.lt.s32.totalorder %s7362_s8, %s4224_s13  ;;  %p4227_p4 = scmp.lt.s32.totalorder %s4225_s30, %s4219_s5 }
  0xa0   : > { %v365_v31 = vld [vmem:[%s4573_s29 + $0xc8] sm:$0xff]  ;;  %v350_v37 = vld [vmem:[%s4573_s29 + $0x50] sm:$0xff]  ;;  %v376_v39 = vld [vmem:[%s4573_s29 + $0x120] sm:$0xff]  ;;  %p4222_p9 = pneg %p4221_p8 }
  0xa1   : > { %v566_v34 = vadd.f32 %v565_v24, %v359_v12  ;;  %v546_v35 = vadd.f32 %v545_v25, %v344_v20  ;;  %v367_v41 = vld [vmem:[%s4573_s29 + $0xd8] sm:$0xff]  ;;  %v573_v42 = vadd.f32 %v572_v32, %v364_v22  ;;  %v554_v44 = vadd.f32 %v553_v33, %v349_v28  ;;  %v377_v45 = vld [vmem:[%s4573_s29 + $0x128] sm:$0xff]  ;;  %v352_v49 = vld [vmem:[%s4573_s29 + $0x60] sm:$0xff]  ;;  %p4228_p3 = por %p4227_p4, %p4226_p11 }
  0xa2   : > { %v351_v43 = vld [vmem:[%s4573_s29 + $0x58] sm:$0xff]  ;;  %v589_v46 = vadd.f32 %v376_v39, %v375_v38  ;;  %v378_v50 = vld [vmem:[%s4573_s29 + $0x130] sm:$0xff]  ;;  %v368_v51 = vld [vmem:[%s4573_s29 + $0xe0] sm:$0xff]  ;;  %v576_v59 = vsel %vm548_vm0, %v367_v41, 0.0 }
  0xa3   : > { %v568_v47 = vadd.f32 %v567_v29, %v566_v34  ;;  %v547_v48 = vadd.f32 %v546_v35, %v345_v30  ;;  %v574_v52 = vadd.f32 %v573_v42, %v365_v31  ;;  %v353_v53 = vld [vmem:[%s4573_s29 + $0x68] sm:$0xff]  ;;  %v555_v54 = vadd.f32 %v554_v44, %v350_v37  ;;  %v370_v57 = vld [vmem:[%s4573_s29 + $0xf0] sm:$0xff]  ;;  %v379_v60 = vld [vmem:[%s4573_s29 + $0x138] sm:$0xff]  ;;  %p4229_p5 = pnand %p4228_p3, %p4222_p9 }
  0xa4   : > { %v590_v55 = vadd.f32 %v589_v46, %v377_v45  ;;  %v369_v56 = vld [vmem:[%s4573_s29 + $0xe8] sm:$0xff]  ;;  %v371_v62 = vld [vmem:[%s4573_s29 + $0xf8] sm:$0xff]  ;;  %v390_v4 = vld [vmem:[%s4573_s29 + $0x190] sm:$0xff]  ;;  %v558_v6 = vsel %vm548_vm0, %v353_v53, 0.0 }
  0xa5   : > { %569 = vadd.xlane.f32.xlu1 %v568_v47  ;;  %v550_v58 = vadd.f32 %v549_v40, %v547_v48  ;;  %v381_v61 = vld [vmem:[%s4573_s29 + $0x148] sm:$0xff]  ;;  %v580_v63 = vadd.f32 %v369_v56, %v368_v51  ;;  %v575_v0 = vadd.f32 %v574_v52, %v366_v36  ;;  %v556_v1 = vadd.f32 %v555_v54, %v351_v43  ;;  %v391_v5 = vld [vmem:[%s4573_s29 + $0x198] sm:$0xff]  ;;  %v380_v7 = vld [vmem:[%s4573_s29 + $0x140] sm:$0xff] }
  0xa6   : > { %v591_v2 = vadd.f32 %v590_v55, %v378_v50  ;;  %v389_v3 = vld [vmem:[%s4573_s29 + $0x188] sm:$0xff]  ;;  %v372_v8 = vld [vmem:[%s4573_s29 + $0x100] sm:$0xff]  ;;  %v382_v16 = vld [vmem:[%s4573_s29 + $0x150] sm:$0xff]  ;;  %v594_v18 = vsel %vm548_vm0, %v381_v61, 0.0 }
  0xa7   : > { %551 = vadd.xlane.f32.xlu0 %v550_v58  ;;  %v581_v9 = vadd.f32 %v580_v63, %v370_v57  ;;  %v607_v10 = vadd.f32 %v390_v4, %v389_v3  ;;  %v577_v11 = vadd.f32 %v576_v59, %v575_v0  ;;  %v557_v12 = vadd.f32 %v556_v1, %v352_v49  ;;  %v373_v14 = vld [vmem:[%s4573_s29 + $0x108] sm:$0xff]  ;;  %v392_v15 = vld [vmem:[%s4573_s29 + $0x1a0] sm:$0xff]  ;;  %v383_v17 = vld [vmem:[%s4573_s29 + $0x158] sm:$0xff] }
  0xa8   : > { %v592_v13 = vadd.f32 %v591_v2, %v379_v60  ;;  %v374_v19 = vld [vmem:[%s4573_s29 + $0x110] sm:$0xff]  ;;  %v393_v21 = vld [vmem:[%s4573_s29 + $0x1a8] sm:$0xff]  ;;  %v384_v23 = vld [vmem:[%s4573_s29 + $0x160] sm:$0xff]  ;;  %v598_v24 = vadd.f32 %v383_v17, %v382_v16 }
  0xa9   : > { %v582_v20 = vadd.f32 %v581_v9, %v371_v62  ;;  %v608_v22 = vadd.f32 %v607_v10, %v391_v5  ;;  %578 = vadd.xlane.f32.xlu1 %v577_v11  ;;  %v559_v25 = vadd.f32 %v558_v6, %v557_v12  ;;  %v394_v27 = vld [vmem:[%s4573_s29 + $0x1b0] sm:$0xff]  ;;  %v385_v28 = vld [vmem:[%s4573_s29 + $0x168] sm:$0xff]  ;;  %v403_v29 = vld [vmem:[%s4573_s29 + $0x1f8] sm:$0xff]  ;;  %v585_v37 = vsel %vm548_vm0, %v374_v19, 0.0 }
  0xaa   : > { %v593_v26 = vadd.f32 %v592_v13, %v380_v7  ;;  %v395_v31 = vld [vmem:[%s4573_s29 + $0x1b8] sm:$0xff]  ;;  %v599_v33 = vadd.f32 %v598_v24, %v384_v23  ;;  %v404_v34 = vld [vmem:[%s4573_s29 + $0x200] sm:$0xff]  ;;  %v405_v35 = vld [vmem:[%s4573_s29 + $0x208] sm:$0xff] }
  0xab   : > { %v583_v30 = vadd.f32 %v582_v20, %v372_v8  ;;  %v609_v32 = vadd.f32 %v608_v22, %v392_v15  ;;  %560 = vadd.xlane.f32.xlu0 %v559_v25  ;;  %v386_v38 = vld [vmem:[%s4573_s29 + $0x170] sm:$0xff]  ;;  %v388_v39 = vld [vmem:[%s4573_s29 + $0x180] sm:$0xff]  ;;  %v625_v41 = vadd.f32 %v404_v34, %v403_v29  ;;  %v397_v46 = vld [vmem:[%s4573_s29 + $0x1c8] sm:$0xff]  ;;  %v612_v48 = vsel %vm548_vm0, %v395_v31, 0.0 }
  0xac   : > { %v595_v36 = vadd.f32 %v594_v18, %v593_v26  ;;  %v406_v40 = vld [vmem:[%s4573_s29 + $0x210] sm:$0xff]  ;;  %v600_v44 = vadd.f32 %v599_v33, %v385_v28  ;;  %v396_v45 = vld [vmem:[%s4573_s29 + $0x1c0] sm:$0xff]  ;;  %v387_v49 = vld [vmem:[%s4573_s29 + $0x178] sm:$0xff]  ;;  %v603_v60 = vsel %vm548_vm0, %v388_v39, 0.0 }
  0xad   : > { %v584_v42 = vadd.f32 %v583_v30, %v373_v14  ;;  %v610_v43 = vadd.f32 %v609_v32, %v393_v21  ;;  %v398_v47 = vld [vmem:[%s4573_s29 + $0x1d0] sm:$0xff]  ;;  %v407_v50 = vld [vmem:[%s4573_s29 + $0x218] sm:$0xff]  ;;  %v626_v51 = vadd.f32 %v625_v41, %v405_v35  ;;  %v616_v52 = vadd.f32 %v397_v46, %v396_v45  ;;  %v408_v56 = vld [vmem:[%s4573_s29 + $0x220] sm:$0xff] }
  0xae   : > { %596 = vadd.xlane.f32.xlu1 %v595_v36  ;;  %v601_v55 = vadd.f32 %v600_v44, %v386_v38  ;;  %v399_v57 = vld [vmem:[%s4573_s29 + $0x1d8] sm:$0xff]  ;;  %v417_v58 = vld [vmem:[%s4573_s29 + $0x268] sm:$0xff]  ;;  %v418_v59 = vld [vmem:[%s4573_s29 + $0x270] sm:$0xff] }
  0xaf   : > { %v586_v53 = vadd.f32 %v585_v37, %v584_v42  ;;  %v611_v54 = vadd.f32 %v610_v43, %v394_v27  ;;  %v409_v61 = vld [vmem:[%s4573_s29 + $0x228] sm:$0xff]  ;;  %v627_v62 = vadd.f32 %v626_v51, %v406_v40  ;;  %v400_v63 = vld [vmem:[%s4573_s29 + $0x1e0] sm:$0xff]  ;;  %v617_v0 = vadd.f32 %v616_v52, %v398_v47  ;;  %v419_v1 = vld [vmem:[%s4573_s29 + $0x278] sm:$0xff] }
  0xb0   : > { %v643_v2 = vadd.f32 %v418_v59, %v417_v58  ;;  %v602_v4 = vadd.f32 %v601_v55, %v387_v49  ;;  %v401_v5 = vld [vmem:[%s4573_s29 + $0x1e8] sm:$0xff]  ;;  %v420_v6 = vld [vmem:[%s4573_s29 + $0x280] sm:$0xff]  ;;  %v410_v7 = vld [vmem:[%s4573_s29 + $0x230] sm:$0xff]  ;;  %v630_v15 = vsel %vm548_vm0, %v409_v61, 0.0 }
  0xb1   : > { %587 = vadd.xlane.f32.xlu0 %v586_v53  ;;  %v613_v3 = vadd.f32 %v612_v48, %v611_v54  ;;  %v628_v8 = vadd.f32 %v627_v62, %v407_v50  ;;  %v402_v9 = vld [vmem:[%s4573_s29 + $0x1f0] sm:$0xff]  ;;  %v618_v10 = vadd.f32 %v617_v0, %v399_v57  ;;  %v411_v12 = vld [vmem:[%s4573_s29 + $0x238] sm:$0xff]  ;;  %v412_v13 = vld [vmem:[%s4573_s29 + $0x240] sm:$0xff] }
  0xb2   : > { %v644_v11 = vadd.f32 %v643_v2, %v419_v1  ;;  %v604_v14 = vadd.f32 %v603_v60, %v602_v4  ;;  %v421_v16 = vld [vmem:[%s4573_s29 + $0x288] sm:$0xff]  ;;  %v423_v17 = vld [vmem:[%s4573_s29 + $0x298] sm:$0xff]  ;;  %v634_v19 = vadd.f32 %v411_v12, %v410_v7  ;;  %v432_v24 = vld [vmem:[%s4573_s29 + $0x2e0] sm:$0xff]  ;;  %v621_v26 = vsel %vm548_vm0, %v402_v9, 0.0 }
  0xb3   : > { %614 = vadd.xlane.f32.xlu1 %v613_v3  ;;  %v413_v18 = vld [vmem:[%s4573_s29 + $0x248] sm:$0xff]  ;;  %v629_v20 = vadd.f32 %v628_v8, %v408_v56  ;;  %v619_v21 = vadd.f32 %v618_v10, %v400_v63  ;;  %v431_v23 = vld [vmem:[%s4573_s29 + $0x2d8] sm:$0xff]  ;;  %v422_v27 = vld [vmem:[%s4573_s29 + $0x290] sm:$0xff]  ;;  %v648_v38 = vsel %vm548_vm0, %v423_v17, 0.0 }
  0xb4   : > { %v645_v22 = vadd.f32 %v644_v11, %v420_v6  ;;  %v433_v25 = vld [vmem:[%s4573_s29 + $0x2e8] sm:$0xff]  ;;  %v414_v28 = vld [vmem:[%s4573_s29 + $0x250] sm:$0xff]  ;;  %v635_v29 = vadd.f32 %v634_v19, %v412_v13  ;;  %v661_v30 = vadd.f32 %v432_v24, %v431_v23  ;;  %v415_v34 = vld [vmem:[%s4573_s29 + $0x258] sm:$0xff] }
  0xb5   : > { %605 = vadd.xlane.f32.xlu0 %v604_v14  ;;  %v631_v31 = vadd.f32 %v630_v15, %v629_v20  ;;  %v620_v32 = vadd.f32 %v619_v21, %v401_v5  ;;  %v434_v35 = vld [vmem:[%s4573_s29 + $0x2f0] sm:$0xff]  ;;  %v424_v36 = vld [vmem:[%s4573_s29 + $0x2a0] sm:$0xff]  ;;  %v425_v37 = vld [vmem:[%s4573_s29 + $0x2a8] sm:$0xff] }
  0xb6   : > { %v646_v33 = vadd.f32 %v645_v22, %v421_v16  ;;  %v416_v39 = vld [vmem:[%s4573_s29 + $0x260] sm:$0xff]  ;;  %v636_v40 = vadd.f32 %v635_v29, %v413_v18  ;;  %v435_v41 = vld [vmem:[%s4573_s29 + $0x2f8] sm:$0xff]  ;;  %v662_v42 = vadd.f32 %v661_v30, %v433_v25  ;;  %v426_v43 = vld [vmem:[%s4573_s29 + $0x2b0] sm:$0xff]  ;;  %v652_v44 = vadd.f32 %v425_v37, %v424_v36 }
  0xb7   : > { %632 = vadd.xlane.f32.xlu1 %v631_v31  ;;  %v622_v45 = vadd.f32 %v621_v26, %v620_v32  ;;  %v436_v47 = vld [vmem:[%s4573_s29 + $0x300] sm:$0xff]  ;;  %v427_v48 = vld [vmem:[%s4573_s29 + $0x2b8] sm:$0xff]  ;;  %v445_v49 = vld [vmem:[%s4573_s29 + $0x348] sm:$0xff]  ;;  %v639_v57 = vsel %vm548_vm0, %v416_v39, 0.0 }
  0xb8   : > { %v647_v46 = vadd.f32 %v646_v33, %v422_v27  ;;  %v637_v50 = vadd.f32 %v636_v40, %v414_v28  ;;  %v437_v51 = vld [vmem:[%s4573_s29 + $0x308] sm:$0xff]  ;;  %v663_v52 = vadd.f32 %v662_v42, %v434_v35  ;;  %v653_v53 = vadd.f32 %v652_v44, %v426_v43  ;;  %v446_v54 = vld [vmem:[%s4573_s29 + $0x350] sm:$0xff]  ;;  %v447_v55 = vld [vmem:[%s4573_s29 + $0x358] sm:$0xff] }
  0xb9   : > { %623 = vadd.xlane.f32.xlu0 %v622_v45  ;;  %v428_v58 = vld [vmem:[%s4573_s29 + $0x2c0] sm:$0xff]  ;;  %v430_v59 = vld [vmem:[%s4573_s29 + $0x2d0] sm:$0xff]  ;;  %v679_v61 = vadd.f32 %v446_v54, %v445_v49  ;;  %v439_v2 = vld [vmem:[%s4573_s29 + $0x318] sm:$0xff]  ;;  %v666_v4 = vsel %vm548_vm0, %v437_v51, 0.0 }
  0xba   : > { %v649_v56 = vadd.f32 %v648_v38, %v647_v46  ;;  %v448_v60 = vld [vmem:[%s4573_s29 + $0x360] sm:$0xff]  ;;  %v638_v62 = vadd.f32 %v637_v50, %v415_v34  ;;  %v664_v63 = vadd.f32 %v663_v52, %v435_v41  ;;  %v654_v0 = vadd.f32 %v653_v53, %v427_v48  ;;  %v438_v1 = vld [vmem:[%s4573_s29 + $0x310] sm:$0xff]  ;;  %v429_v5 = vld [vmem:[%s4573_s29 + $0x2c8] sm:$0xff] }
  0xbb   : > { %v440_v3 = vld [vmem:[%s4573_s29 + $0x320] sm:$0xff]  ;;  %v449_v6 = vld [vmem:[%s4573_s29 + $0x368] sm:$0xff]  ;;  %v680_v7 = vadd.f32 %v679_v61, %v447_v55  ;;  %v670_v8 = vadd.f32 %v439_v2, %v438_v1  ;;  %v450_v12 = vld [vmem:[%s4573_s29 + $0x370] sm:$0xff]  ;;  %v657_v16 = vsel %vm548_vm0, %v430_v59, 0.0 }
  0xbc   : > { %650 = vadd.xlane.f32.xlu1 %v649_v56  ;;  %v640_v9 = vadd.f32 %v639_v57, %v638_v62  ;;  %v665_v10 = vadd.f32 %v664_v63, %v436_v47  ;;  %v655_v11 = vadd.f32 %v654_v0, %v428_v58  ;;  %v441_v13 = vld [vmem:[%s4573_s29 + $0x328] sm:$0xff]  ;;  %v459_v14 = vld [vmem:[%s4573_s29 + $0x3b8] sm:$0xff]  ;;  %v460_v15 = vld [vmem:[%s4573_s29 + $0x3c0] sm:$0xff] }
  0xbd   : > { %v451_v17 = vld [vmem:[%s4573_s29 + $0x378] sm:$0xff]  ;;  %v681_v18 = vadd.f32 %v680_v7, %v448_v60  ;;  %v442_v19 = vld [vmem:[%s4573_s29 + $0x330] sm:$0xff]  ;;  %v671_v20 = vadd.f32 %v670_v8, %v440_v3  ;;  %v461_v21 = vld [vmem:[%s4573_s29 + $0x3c8] sm:$0xff]  ;;  %v697_v22 = vadd.f32 %v460_v15, %v459_v14 }
  0xbe   : > { %641 = vadd.xlane.f32.xlu0 %v640_v9  ;;  %v667_v23 = vadd.f32 %v666_v4, %v665_v10  ;;  %v656_v24 = vadd.f32 %v655_v11, %v429_v5  ;;  %v443_v25 = vld [vmem:[%s4573_s29 + $0x338] sm:$0xff]  ;;  %v462_v26 = vld [vmem:[%s4573_s29 + $0x3d0] sm:$0xff]  ;;  %v452_v27 = vld [vmem:[%s4573_s29 + $0x380] sm:$0xff]  ;;  %v684_v35 = vsel %vm548_vm0, %v451_v17, 0.0 }
  0xbf   : > { %v682_v28 = vadd.f32 %v681_v18, %v449_v6  ;;  %v444_v29 = vld [vmem:[%s4573_s29 + $0x340] sm:$0xff]  ;;  %v672_v30 = vadd.f32 %v671_v20, %v441_v13  ;;  %v698_v31 = vadd.f32 %v697_v22, %v461_v21  ;;  %v453_v32 = vld [vmem:[%s4573_s29 + $0x388] sm:$0xff]  ;;  %v454_v33 = vld [vmem:[%s4573_s29 + $0x390] sm:$0xff] }
  0xc0   : > { %668 = vadd.xlane.f32.xlu1 %v667_v23  ;;  %v658_v34 = vadd.f32 %v657_v16, %v656_v24  ;;  %v463_v36 = vld [vmem:[%s4573_s29 + $0x3d8] sm:$0xff]  ;;  %v465_v37 = vld [vmem:[%s4573_s29 + $0x3e8] sm:$0xff]  ;;  %v688_v39 = vadd.f32 %v453_v32, %v452_v27  ;;  %v474_v44 = vld [vmem:[%s4573_s29 + $0x430] sm:$0xff]  ;;  %v675_v46 = vsel %vm548_vm0, %v444_v29, 0.0 }
  0xc1   : > { %v455_v38 = vld [vmem:[%s4573_s29 + $0x398] sm:$0xff]  ;;  %v683_v40 = vadd.f32 %v682_v28, %v450_v12  ;;  %v673_v41 = vadd.f32 %v672_v30, %v442_v19  ;;  %v699_v42 = vadd.f32 %v698_v31, %v462_v26  ;;  %v473_v43 = vld [vmem:[%s4573_s29 + $0x428] sm:$0xff]  ;;  %v464_v47 = vld [vmem:[%s4573_s29 + $0x3e0] sm:$0xff]  ;;  %v702_v58 = vsel %vm548_vm0, %v465_v37, 0.0 }
  0xc2   : > { %v475_v45 = vld [vmem:[%s4573_s29 + $0x438] sm:$0xff]  ;;  %659 = vadd.xlane.f32.xlu0 %v658_v34  ;;  %v456_v48 = vld [vmem:[%s4573_s29 + $0x3a0] sm:$0xff]  ;;  %v689_v49 = vadd.f32 %v688_v39, %v454_v33  ;;  %v715_v50 = vadd.f32 %v474_v44, %v473_v43  ;;  %v457_v54 = vld [vmem:[%s4573_s29 + $0x3a8] sm:$0xff] }
  0xc3   : > { %v685_v51 = vadd.f32 %v684_v35, %v683_v40  ;;  %v674_v52 = vadd.f32 %v673_v41, %v443_v25  ;;  %v700_v53 = vadd.f32 %v699_v42, %v463_v36  ;;  %v476_v55 = vld [vmem:[%s4573_s29 + $0x440] sm:$0xff]  ;;  %v466_v56 = vld [vmem:[%s4573_s29 + $0x3f0] sm:$0xff]  ;;  %v467_v57 = vld [vmem:[%s4573_s29 + $0x3f8] sm:$0xff] }
  0xc4   : > { %v458_v59 = vld [vmem:[%s4573_s29 + $0x3b0] sm:$0xff]  ;;  %v690_v60 = vadd.f32 %v689_v49, %v455_v38  ;;  %v477_v61 = vld [vmem:[%s4573_s29 + $0x448] sm:$0xff]  ;;  %v716_v62 = vadd.f32 %v715_v50, %v475_v45  ;;  %v468_v63 = vld [vmem:[%s4573_s29 + $0x400] sm:$0xff]  ;;  %v706_v0 = vadd.f32 %v467_v57, %v466_v56 }
  0xc5   : > { %686 = vadd.xlane.f32.xlu1 %v685_v51  ;;  %v676_v1 = vadd.f32 %v675_v46, %v674_v52  ;;  %v701_v2 = vadd.f32 %v700_v53, %v464_v47  ;;  %v478_v3 = vld [vmem:[%s4573_s29 + $0x450] sm:$0xff]  ;;  %v469_v4 = vld [vmem:[%s4573_s29 + $0x408] sm:$0xff]  ;;  %v487_v5 = vld [vmem:[%s4573_s29 + $0x498] sm:$0xff]  ;;  %v693_v13 = vsel %vm548_vm0, %v458_v59, 0.0 }
  0xc6   : > { %v691_v6 = vadd.f32 %v690_v60, %v456_v48  ;;  %v479_v7 = vld [vmem:[%s4573_s29 + $0x458] sm:$0xff]  ;;  %v717_v8 = vadd.f32 %v716_v62, %v476_v55  ;;  %v707_v9 = vadd.f32 %v706_v0, %v468_v63  ;;  %v488_v10 = vld [vmem:[%s4573_s29 + $0x4a0] sm:$0xff]  ;;  %v489_v11 = vld [vmem:[%s4573_s29 + $0x4a8] sm:$0xff] }
  0xc7   : > { %677 = vadd.xlane.f32.xlu0 %v676_v1  ;;  %v703_v12 = vadd.f32 %v702_v58, %v701_v2  ;;  %v470_v14 = vld [vmem:[%s4573_s29 + $0x410] sm:$0xff]  ;;  %v472_v15 = vld [vmem:[%s4573_s29 + $0x420] sm:$0xff]  ;;  %v733_v17 = vadd.f32 %v488_v10, %v487_v5  ;;  %v481_v22 = vld [vmem:[%s4573_s29 + $0x468] sm:$0xff]  ;;  %v720_v24 = vsel %vm548_vm0, %v479_v7, 0.0 }
  0xc8   : > { %v490_v16 = vld [vmem:[%s4573_s29 + $0x4b0] sm:$0xff]  ;;  %v692_v18 = vadd.f32 %v691_v6, %v457_v54  ;;  %v718_v19 = vadd.f32 %v717_v8, %v477_v61  ;;  %v708_v20 = vadd.f32 %v707_v9, %v469_v4  ;;  %v480_v21 = vld [vmem:[%s4573_s29 + $0x460] sm:$0xff]  ;;  %v471_v25 = vld [vmem:[%s4573_s29 + $0x418] sm:$0xff]  ;;  %v711_v36 = vsel %vm548_vm0, %v472_v15, 0.0 }
  0xc9   : > { %v482_v23 = vld [vmem:[%s4573_s29 + $0x470] sm:$0xff]  ;;  %704 = vadd.xlane.f32.xlu1 %v703_v12  ;;  %v491_v26 = vld [vmem:[%s4573_s29 + $0x4b8] sm:$0xff]  ;;  %v734_v27 = vadd.f32 %v733_v17, %v489_v11  ;;  %v724_v28 = vadd.f32 %v481_v22, %v480_v21  ;;  %v492_v32 = vld [vmem:[%s4573_s29 + $0x4c0] sm:$0xff] }
  0xca   : > { %v694_v29 = vadd.f32 %v693_v13, %v692_v18  ;;  %v719_v30 = vadd.f32 %v718_v19, %v478_v3  ;;  %v709_v31 = vadd.f32 %v708_v20, %v470_v14  ;;  %v483_v33 = vld [vmem:[%s4573_s29 + $0x478] sm:$0xff]  ;;  %v501_v34 = vld [vmem:[%s4573_s29 + $0x508] sm:$0xff]  ;;  %v502_v35 = vld [vmem:[%s4573_s29 + $0x510] sm:$0xff] }
  0xcb   : > { %v493_v37 = vld [vmem:[%s4573_s29 + $0x4c8] sm:$0xff]  ;;  %v735_v38 = vadd.f32 %v734_v27, %v490_v16  ;;  %v484_v39 = vld [vmem:[%s4573_s29 + $0x480] sm:$0xff]  ;;  %v725_v40 = vadd.f32 %v724_v28, %v482_v23  ;;  %v503_v41 = vld [vmem:[%s4573_s29 + $0x518] sm:$0xff]  ;;  %v751_v42 = vadd.f32 %v502_v35, %v501_v34 }
  0xcc   : > { %695 = vadd.xlane.f32.xlu0 %v694_v29  ;;  %v721_v43 = vadd.f32 %v720_v24, %v719_v30  ;;  %v710_v44 = vadd.f32 %v709_v31, %v471_v25  ;;  %v485_v45 = vld [vmem:[%s4573_s29 + $0x488] sm:$0xff]  ;;  %v504_v46 = vld [vmem:[%s4573_s29 + $0x520] sm:$0xff]  ;;  %v494_v47 = vld [vmem:[%s4573_s29 + $0x4d0] sm:$0xff]  ;;  %v738_v55 = vsel %vm548_vm0, %v493_v37, 0.0 }
  0xcd   : > { %v736_v48 = vadd.f32 %v735_v38, %v491_v26  ;;  %v486_v49 = vld [vmem:[%s4573_s29 + $0x490] sm:$0xff]  ;;  %v726_v50 = vadd.f32 %v725_v40, %v483_v33  ;;  %v752_v51 = vadd.f32 %v751_v42, %v503_v41  ;;  %v495_v52 = vld [vmem:[%s4573_s29 + $0x4d8] sm:$0xff]  ;;  %v496_v53 = vld [vmem:[%s4573_s29 + $0x4e0] sm:$0xff] }
  0xce   : > { %722 = vadd.xlane.f32.xlu1 %v721_v43  ;;  %v712_v54 = vadd.f32 %v711_v36, %v710_v44  ;;  %v505_v56 = vld [vmem:[%s4573_s29 + $0x528] sm:$0xff]  ;;  %v507_v57 = vld [vmem:[%s4573_s29 + $0x538] sm:$0xff]  ;;  %v742_v59 = vadd.f32 %v495_v52, %v494_v47  ;;  %v516_v0 = vld [vmem:[%s4573_s29 + $0x580] sm:$0xff]  ;;  %v729_v2 = vsel %vm548_vm0, %v486_v49, 0.0 }
  0xcf   : > { %v497_v58 = vld [vmem:[%s4573_s29 + $0x4e8] sm:$0xff]  ;;  %v737_v60 = vadd.f32 %v736_v48, %v492_v32  ;;  %v727_v61 = vadd.f32 %v726_v50, %v484_v39  ;;  %v753_v62 = vadd.f32 %v752_v51, %v504_v46  ;;  %v515_v63 = vld [vmem:[%s4573_s29 + $0x578] sm:$0xff]  ;;  %v506_v3 = vld [vmem:[%s4573_s29 + $0x530] sm:$0xff]  ;;  %v756_v14 = vsel %vm548_vm0, %v507_v57, 0.0 }
  0xd0   : > { %v517_v1 = vld [vmem:[%s4573_s29 + $0x588] sm:$0xff]  ;;  %713 = vadd.xlane.f32.xlu0 %v712_v54  ;;  %v498_v4 = vld [vmem:[%s4573_s29 + $0x4f0] sm:$0xff]  ;;  %v743_v5 = vadd.f32 %v742_v59, %v496_v53  ;;  %v769_v6 = vadd.f32 %v516_v0, %v515_v63  ;;  %v499_v10 = vld [vmem:[%s4573_s29 + $0x4f8] sm:$0xff] }
  0xd1   : > { %v739_v7 = vadd.f32 %v738_v55, %v737_v60  ;;  %v728_v8 = vadd.f32 %v727_v61, %v485_v45  ;;  %v754_v9 = vadd.f32 %v753_v62, %v505_v56  ;;  %v518_v11 = vld [vmem:[%s4573_s29 + $0x590] sm:$0xff]  ;;  %v508_v12 = vld [vmem:[%s4573_s29 + $0x540] sm:$0xff]  ;;  %v509_v13 = vld [vmem:[%s4573_s29 + $0x548] sm:$0xff] }
  0xd2   : > { %v500_v15 = vld [vmem:[%s4573_s29 + $0x500] sm:$0xff]  ;;  %v744_v16 = vadd.f32 %v743_v5, %v497_v58  ;;  %v519_v17 = vld [vmem:[%s4573_s29 + $0x598] sm:$0xff]  ;;  %v770_v18 = vadd.f32 %v769_v6, %v517_v1  ;;  %v510_v19 = vld [vmem:[%s4573_s29 + $0x550] sm:$0xff]  ;;  %v760_v20 = vadd.f32 %v509_v13, %v508_v12 }
  0xd3   : > { %740 = vadd.xlane.f32.xlu1 %v739_v7  ;;  %v730_v21 = vadd.f32 %v729_v2, %v728_v8  ;;  %v755_v22 = vadd.f32 %v754_v9, %v506_v3  ;;  %v520_v23 = vld [vmem:[%s4573_s29 + $0x5a0] sm:$0xff]  ;;  %v511_v24 = vld [vmem:[%s4573_s29 + $0x558] sm:$0xff]  ;;  %v529_v25 = vld [vmem:[%s4573_s29 + $0x5e8] sm:$0xff]  ;;  %v747_v33 = vsel %vm548_vm0, %v500_v15, 0.0 }
  0xd4   : > { %v745_v26 = vadd.f32 %v744_v16, %v498_v4  ;;  %v521_v27 = vld [vmem:[%s4573_s29 + $0x5a8] sm:$0xff]  ;;  %v771_v28 = vadd.f32 %v770_v18, %v518_v11  ;;  %v761_v29 = vadd.f32 %v760_v20, %v510_v19  ;;  %v530_v30 = vld [vmem:[%s4573_s29 + $0x5f0] sm:$0xff]  ;;  %v531_v31 = vld [vmem:[%s4573_s29 + $0x5f8] sm:$0xff] }
  0xd5   : > { %731 = vadd.xlane.f32.xlu0 %v730_v21  ;;  %v757_v32 = vadd.f32 %v756_v14, %v755_v22  ;;  %v512_v34 = vld [vmem:[%s4573_s29 + $0x560] sm:$0xff]  ;;  %v514_v35 = vld [vmem:[%s4573_s29 + $0x570] sm:$0xff]  ;;  %v787_v37 = vadd.f32 %v530_v30, %v529_v25  ;;  %v523_v42 = vld [vmem:[%s4573_s29 + $0x5b8] sm:$0xff]  ;;  %v774_v44 = vsel %vm548_vm0, %v521_v27, 0.0 }
  0xd6   : > { %v532_v36 = vld [vmem:[%s4573_s29 + $0x600] sm:$0xff]  ;;  %v746_v38 = vadd.f32 %v745_v26, %v499_v10  ;;  %v772_v39 = vadd.f32 %v771_v28, %v519_v17  ;;  %v762_v40 = vadd.f32 %v761_v29, %v511_v24  ;;  %v522_v41 = vld [vmem:[%s4573_s29 + $0x5b0] sm:$0xff]  ;;  %v513_v45 = vld [vmem:[%s4573_s29 + $0x568] sm:$0xff]  ;;  %v765_v55 = vsel %vm548_vm0, %v514_v35, 0.0 }
  0xd7   : > { %v524_v43 = vld [vmem:[%s4573_s29 + $0x5c0] sm:$0xff]  ;;  %758 = vadd.xlane.f32.xlu1 %v757_v32  ;;  %v533_v46 = vld [vmem:[%s4573_s29 + $0x608] sm:$0xff]  ;;  %v788_v47 = vadd.f32 %v787_v37, %v531_v31  ;;  %v778_v48 = vadd.f32 %v523_v42, %v522_v41  ;;  %v535_v56 = vld [vmem:[%s4573_s29 + $0x618] sm:$0xff] }
  0xd8   : > { %v748_v49 = vadd.f32 %v747_v33, %v746_v38  ;;  %v773_v50 = vadd.f32 %v772_v39, %v520_v23  ;;  %v763_v51 = vadd.f32 %v762_v40, %v512_v34  ;;  %v525_v52 = vld [vmem:[%s4573_s29 + $0x5c8] sm:$0xff]  ;;  %v536_v53 = vld [vmem:[%s4573_s29 + $0x620] sm:$0xff]  ;;  %v538_v59 = vld [vmem:[%s4573_s29 + $0x630] sm:$0xff]  ;;  %v792_v7 = vsel %vm548_vm0, %v535_v56, 0.0 }
  0xd9   : > { %v537_v54 = vld [vmem:[%s4573_s29 + $0x628] sm:$0xff]  ;;  %v789_v57 = vadd.f32 %v788_v47, %v532_v36  ;;  %v779_v58 = vadd.f32 %v778_v48, %v524_v43  ;;  %v534_v63 = vld [vmem:[%s4573_s29 + $0x610] sm:$0xff]  ;;  %v539_v1 = vld [vmem:[%s4573_s29 + $0x638] sm:$0xff] }
  0xda   : > { %v796_v60 = vadd.f32 %v537_v54, %v536_v53  ;;  %749 = vadd.xlane.f32.xlu0 %v748_v49  ;;  %v775_v61 = vadd.f32 %v774_v44, %v773_v50  ;;  %v764_v62 = vadd.f32 %v763_v51, %v513_v45  ;;  %v526_v0 = vld [vmem:[%s4573_s29 + $0x5d0] sm:$0xff]  ;;  %v528_v3 = vld [vmem:[%s4573_s29 + $0x5e0] sm:$0xff]  ;;  %v527_v8 = vld [vmem:[%s4573_s29 + $0x5d8] sm:$0xff] }
  0xdb   : > { %v790_v2 = vadd.f32 %v789_v57, %v533_v46  ;;  %v780_v4 = vadd.f32 %v779_v58, %v525_v52  ;;  %v540_v9 = vld [vmem:[%s4573_s29 + $0x640] sm:$0xff]  ;;  %v542_v12 = vld [vmem:[%s4573_s29 + $0x650] sm:$0xff]  ;;  %v783_v14 = vsel %vm548_vm0, %v528_v3, 0.0  ;;  %v541_v15 = vld [vmem:[%s4573_s29 + $0x648] sm:$0xff] }
  0xdc   : > { %v797_v5 = vadd.f32 %v796_v60, %v538_v59  ;;  %776 = vadd.xlane.f32.xlu1 %v775_v61  ;;  %v766_v6 = vadd.f32 %v765_v55, %v764_v62  ;;  %v801_v19 = vsel %vm548_vm0, %v542_v12, 0.0  ;;  %v1589_v23 = vld [vmem:[%s4588_s23 + $0x8] sm:$0xff]  ;;  %v1591_v25 = vld [vmem:[%s4588_s23 + $0x18] sm:$0xff]  ;;  %v1588_v29 = vld [vmem:[%s4588_s23] sm:$0xff] }
  0xdd   : > { %v791_v10 = vadd.f32 %v790_v2, %v534_v63  ;;  %v781_v11 = vadd.f32 %v780_v4, %v526_v0  ;;  %v2198_v24 = vmul.f32 0.0, %v1589_v23  ;;  %v2200_v26 = vmul.f32 0.0, %v1591_v25  ;;  %v1593_v27 = vld [vmem:[%s4588_s23 + $0x28] sm:$0xff]  ;;  %v1595_v30 = vld [vmem:[%s4588_s23 + $0x38] sm:$0xff]  ;;  %v1590_v33 = vld [vmem:[%s4588_s23 + $0x10] sm:$0xff] }
  0xde   : > { %v798_v13 = vadd.f32 %v797_v5, %v539_v1  ;;  %767 = vadd.xlane.f32.xlu0 %v766_v6  ;;  %v2202_v28 = vmul.f32 0.0, %v1593_v27  ;;  %v2197_v31 = vmul.f32 0.0, %v1588_v29  ;;  %v2204_v32 = vmul.f32 0.0, %v1595_v30  ;;  %v1597_v34 = vld [vmem:[%s4588_s23 + $0x48] sm:$0xff]  ;;  %v1592_v37 = vld [vmem:[%s4588_s23 + $0x20] sm:$0xff]  ;;  %v1599_v38 = vld [vmem:[%s4588_s23 + $0x58] sm:$0xff] }
  0xdf   : > { %v793_v16 = vadd.f32 %v792_v7, %v791_v10  ;;  %v782_v17 = vadd.f32 %v781_v11, %v527_v8  ;;  %v2199_v35 = vmul.f32 0.0, %v1590_v33  ;;  %v2206_v36 = vmul.f32 0.0, %v1597_v34  ;;  %v1594_v41 = vld [vmem:[%s4588_s23 + $0x30] sm:$0xff]  ;;  %v1601_v42 = vld [vmem:[%s4588_s23 + $0x68] sm:$0xff]  ;;  %v1596_v45 = vld [vmem:[%s4588_s23 + $0x40] sm:$0xff] }
  0xe0   : > { %v799_v18 = vadd.f32 %v798_v13, %v540_v9  ;;  %v2201_v39 = vmul.f32 0.0, %v1592_v37  ;;  %v2208_v40 = vmul.f32 0.0, %v1599_v38  ;;  %v2203_v43 = vmul.f32 0.0, %v1594_v41  ;;  %v1603_v46 = vld [vmem:[%s4588_s23 + $0x78] sm:$0xff]  ;;  %v1598_v49 = vld [vmem:[%s4588_s23 + $0x50] sm:$0xff]  ;;  %v1605_v50 = vld [vmem:[%s4588_s23 + $0x88] sm:$0xff] }
  0xe1   : > { %794 = vadd.xlane.f32.xlu1 %v793_v16  ;;  %v784_v20 = vadd.f32 %v783_v14, %v782_v17  ;;  %v2210_v44 = vmul.f32 0.0, %v1601_v42  ;;  %v2205_v47 = vmul.f32 0.0, %v1596_v45  ;;  %v2212_v48 = vmul.f32 0.0, %v1603_v46  ;;  %v1600_v53 = vld [vmem:[%s4588_s23 + $0x60] sm:$0xff]  ;;  %v1607_v54 = vld [vmem:[%s4588_s23 + $0x98] sm:$0xff]  ;;  %v1602_v57 = vld [vmem:[%s4588_s23 + $0x70] sm:$0xff] }
  0xe2   : > { %v800_v21 = vadd.f32 %v799_v18, %v541_v15  ;;  %v2207_v51 = vmul.f32 0.0, %v1598_v49  ;;  %v2214_v52 = vmul.f32 0.0, %v1605_v50  ;;  %v2209_v55 = vmul.f32 0.0, %v1600_v53  ;;  %v1609_v58 = vld [vmem:[%s4588_s23 + $0xa8] sm:$0xff]  ;;  %v1604_v61 = vld [vmem:[%s4588_s23 + $0x80] sm:$0xff]  ;;  %v1611_v62 = vld [vmem:[%s4588_s23 + $0xb8] sm:$0xff] }
  0xe3   : > { %785 = vadd.xlane.f32.xlu0 %v784_v20  ;;  %v2216_v56 = vmul.f32 0.0, %v1607_v54  ;;  %v2211_v59 = vmul.f32 0.0, %v1602_v57  ;;  %v2218_v60 = vmul.f32 0.0, %v1609_v58  ;;  %v2213_v63 = vmul.f32 0.0, %v1604_v61  ;;  %v1606_v1 = vld [vmem:[%s4588_s23 + $0x90] sm:$0xff]  ;;  %v1613_v2 = vld [vmem:[%s4588_s23 + $0xc8] sm:$0xff] }
  0xe4   : > { %v802_v22 = vadd.f32 %v801_v19, %v800_v21  ;;  %v2220_v0 = vmul.f32 0.0, %v1611_v62  ;;  %v2215_v3 = vmul.f32 0.0, %v1606_v1  ;;  %v2222_v4 = vmul.f32 0.0, %v1613_v2  ;;  %v1608_v5 = vld [vmem:[%s4588_s23 + $0xa0] sm:$0xff]  ;;  %v1615_v6 = vld [vmem:[%s4588_s23 + $0xd8] sm:$0xff]  ;;  %v1610_v9 = vld [vmem:[%s4588_s23 + $0xb0] sm:$0xff] }
  0xe5   : > { %v2217_v7 = vmul.f32 0.0, %v1608_v5  ;;  %v2224_v8 = vmul.f32 0.0, %v1615_v6  ;;  %v2219_v10 = vmul.f32 0.0, %v1610_v9  ;;  %v1612_v11 = vld [vmem:[%s4588_s23 + $0xc0] sm:$0xff]  ;;  %v2574_v12 = vld [vmem:[%s4591_s20] sm:$0xff]  ;;  %v3873_v38 = vld [vmem:[%s4573_s29 + $0x18] sm:$0xff] }
  0xe6   : > { %v2221_v13 = vmul.f32 0.0, %v1612_v11  ;;  %v1614_v14 = vld [vmem:[%s4588_s23 + $0xd0] sm:$0xff]  ;;  %v2576_v15 = vld [vmem:[%s4591_s20 + $0x10] sm:$0xff]  ;;  %v3875_v42 = vld [vmem:[%s4573_s29 + $0x88] sm:$0xff] }
  0xe7   : > { %803 = vadd.xlane.f32.xlu0 %v802_v22  ;;  %v2223_v16 = vmul.f32 0.0, %v1614_v14  ;;  %v1616_v17 = vld [vmem:[%s4588_s23 + $0xe0] sm:$0xff]  ;;  %v2578_v18 = vld [vmem:[%s4591_s20 + $0x20] sm:$0xff]  ;;  %v2577_v57 = vld [vmem:[%s4591_s20 + $0x18] sm:$0xff] }
  0xe8   : > { %v2225_v19 = vmul.f32 0.0, %v1616_v17  ;;  %v3869_v30 = vld [vmem:[%s4573_s29] sm:$0xff]  ;;  %v3871_v34 = vld [vmem:[%s4573_s29 + $0x10] sm:$0xff]  ;;  %v3880_v2 = vld [vmem:[%s4573_s29 + $0x98] sm:$0xff] }
  0xe9   : > { %v3876_v45 = vld [vmem:[%s4573_s29 + $0x20] sm:$0xff]  ;;  %v3877_v49 = vld [vmem:[%s4573_s29 + $0x90] sm:$0xff]  ;;  %v3881_v11 = vld [vmem:[%s4573_s29 + $0x38] sm:$0xff] }
  0xf2   : > { %2233 = vperm.xlu1 %3808, %v2198_v24   ;;  %v3867_v24 = vld [vmem:[%s4573_s29 + $0x70] sm:$0xff] }
  0xf6   : > { %2243 = vperm.xlu1 %3808, %v2200_v26   ;;  %v3868_v26 = vld [vmem:[%s4573_s29 + $0x78] sm:$0xff] }
  0xfa   : > { %2253 = vperm.xlu1 %3808, %v2202_v28   ;;  %v2575_v28 = vld [vmem:[%s4591_s20 + $0x8] sm:$0xff] }
  0xfd   : > { %2228 = vperm.xlu0 %3807, %v2197_v31  }
  0xfe   : > { %2263 = vperm.xlu1 %3808, %v2204_v32   ;;  %v3870_v32 = vld [vmem:[%s4573_s29 + $0x8] sm:$0xff] }
 0x101   : > { %2238 = vperm.xlu0 %3807, %v2199_v35  }
 0x102   : > { %2273 = vperm.xlu1 %3808, %v2206_v36   ;;  %v3872_v36 = vld [vmem:[%s4573_s29 + $0x80] sm:$0xff] }
 0x105   : > { %2248 = vperm.xlu0 %3807, %v2201_v39  }
 0x106   : > { %2283 = vperm.xlu1 %3808, %v2208_v40   ;;  %v3874_v40 = vld [vmem:[%s4573_s29 + $0x30] sm:$0xff] }
 0x109   : > { %2258 = vperm.xlu0 %3807, %v2203_v43  }
 0x10a   : > { %2293 = vperm.xlu1 %3808, %v2210_v44  }
 0x10d   : > { %2268 = vperm.xlu0 %3807, %v2205_v47  }
 0x10e   : > { %2303 = vperm.xlu1 %3808, %v2212_v48  }
 0x111   : > { %2278 = vperm.xlu0 %3807, %v2207_v51  }
 0x112   : > { %2313 = vperm.xlu1 %3808, %v2214_v52   ;;  %v3878_v52 = vld [vmem:[%s4573_s29 + $0x28] sm:$0xff] }
 0x115   : > { %2288 = vperm.xlu0 %3807, %v2209_v55   ;;  %v3879_v55 = vld [vmem:[%s4573_s29 + $0xa0] sm:$0xff] }
 0x116   : > { %2323 = vperm.xlu1 %3808, %v2216_v56  }
 0x119   : > { %2298 = vperm.xlu0 %3807, %v2211_v59  }
 0x11a   : > { %2333 = vperm.xlu1 %3808, %v2218_v60  }
 0x11d   : > { %2308 = vperm.xlu0 %3807, %v2213_v63  }
 0x11e   : > { %2343 = vperm.xlu1 %3808, %v2220_v0  }
 0x121   : > { %2318 = vperm.xlu0 %3807, %v2215_v3  }
 0x122   : > { %2353 = vperm.xlu1 %3808, %v2222_v4  }
 0x125   : > { %2328 = vperm.xlu0 %3807, %v2217_v7  }
 0x126   : > { %2363 = vperm.xlu1 %3808, %v2224_v8  }
 0x129   : > { %2338 = vperm.xlu0 %3807, %v2219_v10  }
 0x12a   : > { %2605 = vperm.xlu1 %3808, %v2574_v12  }
 0x12d   : > { %2348 = vperm.xlu0 %3807, %v2221_v13   ;;  %v3882_v13 = vld [vmem:[%s4573_s29 + $0x40] sm:$0xff] }
 0x12e   : > { %2615 = vperm.xlu1 %3808, %v2576_v15  }
 0x131   : > { %2358 = vperm.xlu0 %3807, %v2223_v16  }
 0x132   : > { %v570_v20 = vpop.xlane.xlu1 %569  ;;  %2625 = vperm.xlu1 %3808, %v2578_v18   ;;  %v3883_v18 = vld [vmem:[%s4573_s29 + $0x48] sm:$0xff] }
 0x133   : > { %v807_v21 = vmul.f32 0.0012755102, %v570_v20 }
 0x134   : > { %v552_v22 = vpop.xlane.xlu0 %551 }
 0x135   : > { %v805_v23 = vmul.f32 0.0012755102, %v552_v22  ;;  %2368 = vperm.xlu0 %3807, %v2225_v19   ;;  %v4862_v25 = vsub.f32 %v3867_v24, %v807_v21  ;;  %v4865_v27 = vsub.f32 %v3868_v26, %v807_v21  ;;  %v4878_v37 = vsub.f32 %v3872_v36, %v807_v21 }
 0x136   : > { %v579_v29 = vpop.xlane.xlu1 %578  ;;  %v4887_v43 = vsub.f32 %v3875_v42, %v807_v21  ;;  %v4897_v50 = vsub.f32 %v3877_v49, %v807_v21  ;;  %v4905_v56 = vsub.f32 %v3879_v55, %v807_v21  ;;  %v4921_v3 = vsub.f32 %v3880_v2, %v807_v21  ;;  %v3886_v42 = vld [vmem:[%s4573_s29 + $0x58] sm:$0xff] }
 0x137   : > { %v4869_v31 = vsub.f32 %v3869_v30, %v805_v23  ;;  %v4872_v33 = vsub.f32 %v3870_v32, %v805_v23  ;;  %v4875_v35 = vsub.f32 %v3871_v34, %v805_v23  ;;  %v4881_v39 = vsub.f32 %v3873_v38, %v805_v23  ;;  %v3885_v30 = vld [vmem:[%s4573_s29 + $0x68] sm:$0xff] }
 0x138   : > { %v4884_v41 = vsub.f32 %v3874_v40, %v805_v23  ;;  %v561_v44 = vpop.xlane.xlu0 %560  ;;  %v4890_v46 = vsub.f32 %v3876_v45, %v805_v23  ;;  %v4900_v53 = vsub.f32 %v3878_v52, %v805_v23  ;;  %v1051_v60 = vmul.f32 %v4862_v25, %v4862_v25  ;;  %v3884_v23 = vld [vmem:[%s4573_s29 + $0x50] sm:$0xff]  ;;  %v3887_v45 = vld [vmem:[%s4573_s29 + $0x60] sm:$0xff] }
 0x139   : > { %v1037_v47 = vmul.f32 %v4869_v31, %v4869_v31  ;;  %v1038_v48 = vmul.f32 %v4872_v33, %v4872_v33  ;;  %2610 = vperm.xlu0 %3807, %v2575_v28   ;;  %v806_v51 = vmul.f32 0.0012755102, %v561_v44  ;;  %v1039_v54 = vmul.f32 %v4875_v35, %v4875_v35 }
 0x13a   : > { %v1052_v61 = vmul.f32 %v4865_v27, %v4865_v27  ;;  %v1053_v62 = vmul.f32 %v4878_v37, %v4878_v37  ;;  %v4914_v63 = vmul.f32 0.0012755102, %v579_v29  ;;  %v1040_v0 = vmul.f32 %v4881_v39, %v4881_v39 }
 0x13b   : > { %v597_v58 = vpop.xlane.xlu1 %596  ;;  %v1240_v59 = vadd.f32 %v1038_v48, %v1037_v47  ;;  %v1043_v1 = vmul.f32 %v4884_v41, %v4884_v41  ;;  %v1041_v4 = vmul.f32 %v4890_v46, %v4890_v46  ;;  %v1054_v6 = vmul.f32 %v4887_v43, %v4887_v43 }
 0x13c   : > { %v1258_v7 = vadd.f32 %v1052_v61, %v1051_v60  ;;  %v4927_v8 = vmul.f32 0.0012755102, %v597_v58  ;;  %v1042_v10 = vmul.f32 %v4900_v53, %v4900_v53  ;;  %v4932_v12 = vsub.f32 %v3881_v11, %v806_v51 }
 0x13d   : > { %v1241_v5 = vadd.f32 %v1240_v59, %v1039_v54  ;;  %2620 = vperm.xlu0 %3807, %v2577_v57   ;;  %v4935_v14 = vsub.f32 %v3882_v13, %v806_v51  ;;  %v1057_v16 = vmul.f32 %v4905_v56, %v4905_v56  ;;  %v4940_v19 = vsub.f32 %v3883_v18, %v806_v51  ;;  %v3888_v57 = vld [vmem:[%s4573_s29 + $0xa8] sm:$0xff]  ;;  %v3889_v59 = vld [vmem:[%s4573_s29 + $0xb0] sm:$0xff] }
 0x13e   : > { %v588_v9 = vpop.xlane.xlu0 %587  ;;  %v1259_v17 = vadd.f32 %v1258_v7, %v1053_v62  ;;  %v1245_v21 = vsel %vm548_vm0, %v1043_v1, 0.0  ;;  %v1055_v22 = vmul.f32 %v4897_v50, %v4897_v50  ;;  %v4946_v24 = vsub.f32 %v3884_v23, %v806_v51  ;;  %v3893_v23 = vld [vmem:[%s4573_s29 + $0xc8] sm:$0xff] }
 0x13f   : > { %v1242_v15 = vadd.f32 %v1241_v5, %v1040_v0  ;;  %v1044_v26 = vmul.f32 %v4932_v12, %v4932_v12  ;;  %v4951_v32 = vsub.f32 %v3885_v30, %v806_v51  ;;  %v1045_v34 = vmul.f32 %v4935_v14, %v4935_v14 }
 0x140   : > { %v615_v20 = vpop.xlane.xlu1 %614  ;;  %v1260_v29 = vadd.f32 %v1259_v17, %v1054_v6  ;;  %v4955_v36 = vmul.f32 0.0012755102, %v588_v9  ;;  %v1056_v40 = vmul.f32 %v4921_v3, %v4921_v3  ;;  %v4960_v44 = vsub.f32 %v3886_v42, %v806_v51 }
 0x141   : > { %v1243_v28 = vadd.f32 %v1242_v15, %v1041_v4  ;;  %v4963_v47 = vsub.f32 %v3887_v45, %v806_v51  ;;  %v1263_v52 = vsel %vm548_vm0, %v1057_v16, 0.0  ;;  %v1046_v54 = vmul.f32 %v4940_v19, %v4940_v19  ;;  %v3890_v51 = vld [vmem:[%s4573_s29 + $0xb8] sm:$0xff]  ;;  %v3891_v4 = vld [vmem:[%s4573_s29 + $0xc0] sm:$0xff] }
 0x142   : > { %v606_v38 = vpop.xlane.xlu0 %605  ;;  %v1261_v49 = vadd.f32 %v1260_v29, %v1055_v22  ;;  %v1249_v55 = vadd.f32 %v1045_v34, %v1044_v26  ;;  %v4970_v58 = vsub.f32 %v3888_v57, %v4914_v63  ;;  %v4974_v60 = vsub.f32 %v3889_v59, %v4914_v63  ;;  %v3892_v15 = vld [vmem:[%s4573_s29 + $0xd8] sm:$0xff]  ;;  %v3894_v34 = vld [vmem:[%s4573_s29 + $0xd0] sm:$0xff] }
 0x143   : > { %v1244_v48 = vadd.f32 %v1243_v28, %v1042_v10  ;;  %v4978_v61 = vsub.f32 %v3890_v51, %v4914_v63  ;;  %v4980_v62 = vmul.f32 0.0012755102, %v615_v20  ;;  %v1047_v1 = vmul.f32 %v4946_v24, %v4946_v24  ;;  %v3897_v51 = vld [vmem:[%s4573_s29 + $0xf0] sm:$0xff] }
 0x144   : > { %v633_v0 = vpop.xlane.xlu1 %632  ;;  %v1050_v2 = vmul.f32 %v4951_v32, %v4951_v32  ;;  %v4988_v5 = vsub.f32 %v3891_v4, %v4914_v63  ;;  %v4990_v6 = vmul.f32 0.0012755102, %v606_v38  ;;  %v1048_v7 = vmul.f32 %v4960_v44, %v4960_v44 }
 0x145   : > { %v1049_v9 = vmul.f32 %v4963_v47, %v4963_v47  ;;  %v1250_v10 = vadd.f32 %v1249_v55, %v1046_v54  ;;  %v1262_v13 = vadd.f32 %v1261_v49, %v1056_v40  ;;  %v4998_v16 = vsub.f32 %v3892_v15, %v4914_v63  ;;  %v3896_v54 = vld [vmem:[%s4573_s29 + $0xe8] sm:$0xff]  ;;  %v3898_v15 = vld [vmem:[%s4573_s29 + $0xf8] sm:$0xff] }
 0x146   : > { %v624_v11 = vpop.xlane.xlu0 %623  ;;  %v1058_v17 = vmul.f32 %v4970_v58, %v4970_v58  ;;  %v1059_v18 = vmul.f32 %v4974_v60, %v4974_v60  ;;  %v5004_v20 = vadd.f32 %v1245_v21, %v1244_v48  ;;  %v5008_v26 = vsub.f32 %v3893_v23, %v4914_v63  ;;  %v3895_v48 = vld [vmem:[%s4573_s29 + $0xe0] sm:$0xff] }
 0x147   : > { %7655 = vst [vmem:[#allocation16_spill] sm:$0xff] %v4998_v16  ;;  %v1251_v22 = vadd.f32 %v1250_v10, %v1047_v1  ;;  %v1060_v28 = vmul.f32 %v4978_v61, %v4978_v61  ;;  %v1254_v30 = vsel %vm548_vm0, %v1050_v2, 0.0  ;;  %v5015_v38 = vsub.f32 %v3894_v34, %v4914_v63  ;;  %v3900_v34 = vld [vmem:[%s4573_s29 + $0x110] sm:$0xff] }
 0x148   : > { %v1061_v21 = vmul.f32 %v4988_v5, %v4988_v5  ;;  %v1267_v40 = vadd.f32 %v1059_v18, %v1058_v17  ;;  %v1064_v45 = vmul.f32 %v4998_v16, %v4998_v16  ;;  %v5023_v49 = vsub.f32 %v3895_v48, %v4955_v36  ;;  %v3901_v48 = vld [vmem:[%s4573_s29 + $0x108] sm:$0xff]  ;;  %v3917_v16 = vld [vmem:[%s4573_s29 + $0x190] sm:$0xff] }
 0x149   : > { %v651_v29 = vpop.xlane.xlu1 %650  ;;  %7656 = vst [vmem:[#allocation17_spill] sm:$0xff] %v5015_v38  ;;  %v1252_v42 = vadd.f32 %v1251_v22, %v1048_v7  ;;  %v5027_v55 = vsub.f32 %v3896_v54, %v4955_v36  ;;  %v5029_v63 = vmul.f32 0.0012755102, %v633_v0  ;;  %v5031_v57 = vadd.f32 %v1263_v52, %v1262_v13  ;;  %v3899_v13 = vld [vmem:[%s4573_s29 + $0x100] sm:$0xff] }
 0x14a   : > { %7657 = vst [vmem:[#allocation18_spill] sm:$0xff] %v5023_v49  ;;  %v1268_v59 = vadd.f32 %v1267_v40, %v1060_v28  ;;  %v5035_v1 = vsub.f32 %v3897_v51, %v4955_v36  ;;  %v5037_v2 = vmul.f32 0.0012755102, %v624_v11  ;;  %v1062_v10 = vmul.f32 %v5008_v26, %v5008_v26 }
 0x14b   : > { %7658 = vst [vmem:[#allocation19_spill] sm:$0xff] %v5027_v55  ;;  %v642_v4 = vpop.xlane.xlu0 %641  ;;  %v1253_v7 = vadd.f32 %v1252_v42, %v1049_v9  ;;  %v5043_v0 = vsub.f32 %v3898_v15, %v4955_v36  ;;  %v5047_v17 = vsub.f32 %v3899_v13, %v4955_v36  ;;  %v1065_v11 = vmul.f32 %v5023_v49, %v5023_v49  ;;  %v3902_v15 = vld [vmem:[%s4573_s29 + $0x118] sm:$0xff]  ;;  %v3903_v13 = vld [vmem:[%s4573_s29 + $0x120] sm:$0xff]  ;;  %v3909_v49 = vld [vmem:[%s4573_s29 + $0x150] sm:$0xff] }
 0x14c   : > { %7659 = vst [vmem:[#allocation20_spill] sm:$0xff] %v5035_v1  ;;  %v1269_v52 = vadd.f32 %v1268_v59, %v1061_v21  ;;  %v1066_v9 = vmul.f32 %v5027_v55, %v5027_v55  ;;  %v5053_v18 = vmul.f32 0.0012755102, %v651_v29  ;;  %v1063_v23 = vmul.f32 %v5015_v38, %v5015_v38  ;;  %v3908_v55 = vld [vmem:[%s4573_s29 + $0x140] sm:$0xff] }
 0x14d   : > { %7660 = vst [vmem:[#allocation21_spill] sm:$0xff] %v5043_v0  ;;  %7661 = vst [vmem:[#allocation22_spill] sm:$0xff] %v5047_v17  ;;  %v669_v22 = vpop.xlane.xlu1 %668  ;;  %v1272_v28 = vsel %vm548_vm0, %v1064_v45, 0.0  ;;  %v5060_v21 = vsub.f32 %v3900_v34, %v4955_v36  ;;  %v5062_v40 = vmul.f32 0.0012755102, %v642_v4  ;;  %v5066_v54 = vsub.f32 %v3901_v48, %v4955_v36  ;;  %v3904_v34 = vld [vmem:[%s4573_s29 + $0x128] sm:$0xff] }
 0x14e   : > { %v1270_v42 = vadd.f32 %v1269_v52, %v1062_v10  ;;  %v1067_v29 = vmul.f32 %v5035_v1, %v5035_v1  ;;  %v1276_v51 = vadd.f32 %v1066_v9, %v1065_v11  ;;  %v5072_v45 = vsub.f32 %v3902_v15, %v4927_v8  ;;  %v3905_v9 = vld [vmem:[%s4573_s29 + $0x130] sm:$0xff] }
 0x14f   : > { %7662 = vst [vmem:[#allocation23_spill] sm:$0xff] %v5060_v21  ;;  %7663 = vst [vmem:[#allocation24_spill] sm:$0xff] %v5066_v54  ;;  %v660_v59 = vpop.xlane.xlu0 %659  ;;  %v5076_v4 = vsub.f32 %v3903_v13, %v4927_v8  ;;  %v5080_v10 = vsub.f32 %v3904_v34, %v4927_v8  ;;  %v5082_v36 = vadd.f32 %v1254_v30, %v1253_v7  ;;  %v5092_v15 = vmul.f32 0.0012755102, %v669_v22  ;;  %v3906_v30 = vld [vmem:[%s4573_s29 + $0x148] sm:$0xff] }
 0x150   : > { %7664 = vst [vmem:[#allocation25_spill] sm:$0xff] %v5072_v45  ;;  %v1068_v52 = vmul.f32 %v5043_v0, %v5043_v0  ;;  %v1069_v11 = vmul.f32 %v5047_v17, %v5047_v17  ;;  %v5090_v48 = vsub.f32 %v3905_v9, %v4927_v8  ;;  %v1071_v13 = vmul.f32 %v5060_v21, %v5060_v21  ;;  %v3907_v21 = vld [vmem:[%s4573_s29 + $0x138] sm:$0xff] }
 0x151   : > { %7665 = vst [vmem:[#allocation26_spill] sm:$0xff] %v5076_v4  ;;  %7666 = vst [vmem:[#allocation27_spill] sm:$0xff] %v5080_v10  ;;  %v1277_v34 = vadd.f32 %v1276_v51, %v1067_v29  ;;  %v5098_v7 = vsub.f32 %v3906_v30, %v4927_v8  ;;  %v1271_v1 = vadd.f32 %v1270_v42, %v1063_v23  ;;  %v5116_v42 = vmul.f32 0.0012755102, %v660_v59 }
 0x152   : > { %7667 = vst [vmem:[#allocation28_spill] sm:$0xff] %v5090_v48  ;;  %v687_v0 = vpop.xlane.xlu1 %686  ;;  %v1072_v17 = vmul.f32 %v5072_v45, %v5072_v45  ;;  %v1073_v9 = vmul.f32 %v5076_v4, %v5076_v4  ;;  %v1074_v22 = vmul.f32 %v5080_v10, %v5080_v10  ;;  %v1070_v29 = vmul.f32 %v5066_v54, %v5066_v54 }
 0x153   : > { %7668 = vst [vmem:[#allocation29_spill] sm:$0xff] %v5098_v7  ;;  %v1278_v51 = vadd.f32 %v1277_v34, %v1068_v52  ;;  %v5110_v30 = vsub.f32 %v3907_v21, %v4927_v8  ;;  %v5114_v23 = vsub.f32 %v3908_v55, %v4927_v8  ;;  %v1075_v10 = vmul.f32 %v5090_v48, %v5090_v48  ;;  %v3910_v55 = vld [vmem:[%s4573_s29 + $0x158] sm:$0xff]  ;;  %v3911_v48 = vld [vmem:[%s4573_s29 + $0x160] sm:$0xff] }
 0x154   : > { %v678_v4 = vpop.xlane.xlu0 %677  ;;  %v1285_v45 = vadd.f32 %v1073_v9, %v1072_v17  ;;  %v5122_v54 = vsub.f32 %v3909_v49, %v4990_v6  ;;  %v1281_v21 = vsel %vm548_vm0, %v1071_v13, 0.0  ;;  %v1078_v8 = vmul.f32 %v5098_v7, %v5098_v7 }
 0x155   : > { %7669 = vst [vmem:[#allocation30_spill] sm:$0xff] %v5110_v30  ;;  %7670 = vst [vmem:[#allocation31_spill] sm:$0xff] %v5114_v23  ;;  %v1279_v52 = vadd.f32 %v1278_v51, %v1069_v11  ;;  %v5129_v59 = vsub.f32 %v3910_v55, %v4990_v6  ;;  %v5131_v34 = vmul.f32 0.0012755102, %v687_v0  ;;  %v1273_v9 = vadd.f32 %v1272_v28, %v1271_v1  ;;  %v3912_v0 = vld [vmem:[%s4573_s29 + $0x168] sm:$0xff]  ;;  %v3913_v1 = vld [vmem:[%s4573_s29 + $0x170] sm:$0xff] }
 0x156   : > { %7671 = vst [vmem:[#allocation32_spill] sm:$0xff] %v5122_v54  ;;  %1247 = vadd.xlane.f32.xlu1 %v5004_v20  ;;  %v705_v17 = vpop.xlane.xlu1 %704  ;;  %v1286_v49 = vadd.f32 %v1285_v45, %v1074_v22  ;;  %v5136_v11 = vsub.f32 %v3911_v48, %v4990_v6  ;;  %v1076_v51 = vmul.f32 %v5110_v30, %v5110_v30  ;;  %v5154_v22 = vmul.f32 0.0012755102, %v678_v4 }
 0x157   : > { %7672 = vst [vmem:[#allocation33_spill] sm:$0xff] %v5129_v59  ;;  %v1280_v13 = vadd.f32 %v1279_v52, %v1070_v29  ;;  %v1077_v55 = vmul.f32 %v5114_v23, %v5114_v23  ;;  %v5144_v7 = vsub.f32 %v3912_v0, %v4990_v6  ;;  %v5148_v28 = vsub.f32 %v3913_v1, %v4990_v6  ;;  %v3914_v0 = vld [vmem:[%s4573_s29 + $0x178] sm:$0xff] }
 0x158   : > { %7673 = vst [vmem:[#allocation34_spill] sm:$0xff] %v5136_v11  ;;  %v1287_v20 = vadd.f32 %v1286_v49, %v1075_v10  ;;  %v1079_v45 = vmul.f32 %v5122_v54, %v5122_v54  ;;  %v1080_v48 = vmul.f32 %v5129_v59, %v5129_v59  ;;  %v1290_v52 = vsel %vm548_vm0, %v1078_v8, 0.0  ;;  %v3915_v49 = vld [vmem:[%s4573_s29 + $0x180] sm:$0xff]  ;;  %v3916_v8 = vld [vmem:[%s4573_s29 + $0x188] sm:$0xff] }
 0x159   : > { %7674 = vst [vmem:[#allocation35_spill] sm:$0xff] %v5144_v7  ;;  %7675 = vst [vmem:[#allocation36_spill] sm:$0xff] %v5148_v28  ;;  %v696_v29 = vpop.xlane.xlu0 %695  ;;  %v5159_v10 = vsub.f32 %v3914_v0, %v4990_v6  ;;  %v5163_v1 = vsub.f32 %v3915_v49, %v4990_v6  ;;  %v5165_v23 = vmul.f32 0.0012755102, %v705_v17  ;;  %v1081_v4 = vmul.f32 %v5136_v11, %v5136_v11  ;;  %v3918_v17 = vld [vmem:[%s4573_s29 + $0x198] sm:$0xff] }
 0x15a   : > { %1265 = vadd.xlane.f32.xlu1 %v5031_v57  ;;  %v1288_v59 = vadd.f32 %v1287_v20, %v1076_v51  ;;  %v1294_v54 = vadd.f32 %v1080_v48, %v1079_v45  ;;  %v1282_v30 = vadd.f32 %v1281_v21, %v1280_v13  ;;  %v5172_v0 = vsub.f32 %v3916_v8, %v4980_v62  ;;  %v3919_v20 = vld [vmem:[%s4573_s29 + $0x1a0] sm:$0xff]  ;;  %v3920_v8 = vld [vmem:[%s4573_s29 + $0x1b8] sm:$0xff] }
 0x15b   : > { %7676 = vst [vmem:[#allocation37_spill] sm:$0xff] %v5159_v10  ;;  %7677 = vst [vmem:[#allocation38_spill] sm:$0xff] %v5163_v1  ;;  %v5176_v6 = vsub.f32 %v3917_v16, %v4980_v62  ;;  %v5180_v49 = vsub.f32 %v3918_v17, %v4980_v62  ;;  %v723_v57 = vpop.xlane.xlu1 %722  ;;  %v1082_v51 = vmul.f32 %v5144_v7, %v5144_v7 }
 0x15c   : > { %7678 = vst [vmem:[#allocation39_spill] sm:$0xff] %v5172_v0  ;;  %1256 = vadd.xlane.f32.xlu0 %v5082_v36  ;;  %v1083_v21 = vmul.f32 %v5148_v28, %v5148_v28  ;;  %v1295_v13 = vadd.f32 %v1294_v54, %v1081_v4  ;;  %v5189_v16 = vsub.f32 %v3919_v20, %v4980_v62  ;;  %v5201_v54 = vmul.f32 0.0012755102, %v696_v29 }
 0x15d   : > { %7679 = vst [vmem:[#allocation40_spill] sm:$0xff] %v5176_v6  ;;  %7680 = vst [vmem:[#allocation41_spill] sm:$0xff] %v5180_v49  ;;  %v714_v45 = vpop.xlane.xlu0 %713  ;;  %v1084_v48 = vmul.f32 %v5159_v10, %v5159_v10  ;;  %v1085_v36 = vmul.f32 %v5163_v1, %v5163_v1  ;;  %v5197_v17 = vsub.f32 %v3920_v8, %v4980_v62  ;;  %v5205_v10 = vmul.f32 0.0012755102, %v723_v57  ;;  %v3921_v1 = vld [vmem:[%s4573_s29 + $0x1a8] sm:$0xff]  ;;  %v3922_v8 = vld [vmem:[%s4573_s29 + $0x1b0] sm:$0xff] }
 0x15e   : > { %7681 = vst [vmem:[#allocation42_spill] sm:$0xff] %v5189_v16  ;;  %v1086_v28 = vmul.f32 %v5172_v0, %v5172_v0  ;;  %1283 = vadd.xlane.f32.xlu1 %v1282_v30  ;;  %v1289_v4 = vadd.f32 %v1288_v59, %v1077_v55  ;;  %v1296_v20 = vadd.f32 %v1295_v13, %v1082_v51  ;;  %v3923_v57 = vld [vmem:[%s4573_s29 + $0x1c0] sm:$0xff]  ;;  %v3938_v0 = vld [vmem:[%s4573_s29 + $0x238] sm:$0xff] }
 0x15f   : > { %7682 = vst [vmem:[#allocation43_spill] sm:$0xff] %v5197_v17  ;;  %v1087_v7 = vmul.f32 %v5176_v6, %v5176_v6  ;;  %v5209_v11 = vsub.f32 %v3921_v1, %v4980_v62  ;;  %v5213_v38 = vsub.f32 %v3922_v8, %v4980_v62  ;;  %v1088_v29 = vmul.f32 %v5180_v49, %v5180_v49  ;;  %v3924_v8 = vld [vmem:[%s4573_s29 + $0x1c8] sm:$0xff]  ;;  %v3925_v49 = vld [vmem:[%s4573_s29 + $0x1d0] sm:$0xff]  ;;  %v3936_v6 = vld [vmem:[%s4573_s29 + $0x220] sm:$0xff] }
 0x160   : > { %1274 = vadd.xlane.f32.xlu0 %v1273_v9  ;;  %v1297_v30 = vadd.f32 %v1296_v20, %v1083_v21  ;;  %v1089_v59 = vmul.f32 %v5189_v16, %v5189_v16  ;;  %v5221_v51 = vsub.f32 %v3923_v57, %v5037_v2  ;;  %v5223_v1 = vmul.f32 0.0012755102, %v714_v45  ;;  %v741_v21 = vpop.xlane.xlu1 %740 }
 0x161   : > { %7683 = vst [vmem:[#allocation44_spill] sm:$0xff] %v5209_v11  ;;  %7684 = vst [vmem:[#allocation45_spill] sm:$0xff] %v5213_v38  ;;  %v1303_v55 = vadd.f32 %v1087_v7, %v1086_v28  ;;  %v1299_v62 = vsel %vm548_vm0, %v1085_v36, 0.0  ;;  %v1092_v13 = vmul.f32 %v5197_v17, %v5197_v17  ;;  %v5230_v9 = vsub.f32 %v3924_v8, %v5037_v2  ;;  %v3926_v17 = vld [vmem:[%s4573_s29 + $0x1d8] sm:$0xff] }
 0x162   : > { %7685 = vst [vmem:[#allocation46_spill] sm:$0xff] %v5221_v51  ;;  %v1291_v20 = vadd.f32 %v1290_v52, %v1289_v4  ;;  %v1298_v7 = vadd.f32 %v1297_v30, %v1084_v48  ;;  %v732_v28 = vpop.xlane.xlu0 %731  ;;  %v5234_v45 = vsub.f32 %v3925_v49, %v5037_v2  ;;  %v1090_v36 = vmul.f32 %v5209_v11, %v5209_v11  ;;  %v3927_v49 = vld [vmem:[%s4573_s29 + $0x1e0] sm:$0xff]  ;;  %v3935_v11 = vld [vmem:[%s4573_s29 + $0x218] sm:$0xff] }
 0x163   : > { %7686 = vst [vmem:[#allocation47_spill] sm:$0xff] %v5230_v9  ;;  %v1304_v16 = vadd.f32 %v1303_v55, %v1088_v29  ;;  %v1091_v57 = vmul.f32 %v5213_v38, %v5213_v38  ;;  %v5242_v8 = vsub.f32 %v3926_v17, %v5037_v2  ;;  %v1093_v52 = vmul.f32 %v5221_v51, %v5221_v51 }
 0x164   : > { %7687 = vst [vmem:[#allocation48_spill] sm:$0xff] %v5234_v45  ;;  %1292 = vadd.xlane.f32.xlu0 %v1291_v20  ;;  %v1300_v48 = vadd.f32 %v1299_v62, %v1298_v7  ;;  %v5248_v29 = vsub.f32 %v3927_v49, %v5037_v2  ;;  %v1094_v30 = vmul.f32 %v5230_v9, %v5230_v9  ;;  %v5252_v55 = vmul.f32 0.0012755102, %v741_v21  ;;  %v3928_v20 = vld [vmem:[%s4573_s29 + $0x1f0] sm:$0xff]  ;;  %v3929_v49 = vld [vmem:[%s4573_s29 + $0x1f8] sm:$0xff] }
 0x165   : > { %7688 = vst [vmem:[#allocation49_spill] sm:$0xff] %v5242_v8  ;;  %v1305_v4 = vadd.f32 %v1304_v16, %v1089_v59  ;;  %v5254_v17 = vmul.f32 0.0012755102, %v732_v28  ;;  %v1308_v51 = vsel %vm548_vm0, %v1092_v13, 0.0  ;;  %v5259_v62 = vsub.f32 %v3928_v20, %v5037_v2  ;;  %v3930_v28 = vld [vmem:[%s4573_s29 + $0x1e8] sm:$0xff]  ;;  %v3931_v13 = vld [vmem:[%s4573_s29 + $0x200] sm:$0xff] }
 0x166   : > { %7689 = vst [vmem:[#allocation50_spill] sm:$0xff] %v5248_v29  ;;  %1301 = vadd.xlane.f32.xlu1 %v1300_v48  ;;  %v1095_v59 = vmul.f32 %v5234_v45, %v5234_v45  ;;  %v1312_v7 = vadd.f32 %v1094_v30, %v1093_v52  ;;  %v5265_v21 = vsub.f32 %v3929_v49, %v5029_v63  ;;  %v3932_v20 = vld [vmem:[%s4573_s29 + $0x208] sm:$0xff]  ;;  %v3933_v48 = vld [vmem:[%s4573_s29 + $0x210] sm:$0xff] }
 0x167   : > { %7690 = vst [vmem:[#allocation51_spill] sm:$0xff] %v5259_v62  ;;  %v1306_v16 = vadd.f32 %v1305_v4, %v1090_v36  ;;  %v5269_v9 = vsub.f32 %v3930_v28, %v5037_v2  ;;  %v5273_v38 = vsub.f32 %v3931_v13, %v5029_v63  ;;  %v5277_v36 = vsub.f32 %v3932_v20, %v5029_v63  ;;  %v759_v4 = vpop.xlane.xlu1 %758  ;;  %v3934_v45 = vld [vmem:[%s4573_s29 + $0x228] sm:$0xff] }
 0x168   : > { %7691 = vst [vmem:[#allocation52_spill] sm:$0xff] %v5265_v21  ;;  %v5281_v52 = vsub.f32 %v3933_v48, %v5029_v63  ;;  %v1096_v49 = vmul.f32 %v5242_v8, %v5242_v8  ;;  %v1097_v2 = vmul.f32 %v5248_v29, %v5248_v29  ;;  %v1313_v28 = vadd.f32 %v1312_v7, %v1095_v59  ;;  %v750_v29 = vpop.xlane.xlu0 %749 }
 0x169   : > { %7692 = vst [vmem:[#allocation53_spill] sm:$0xff] %v5269_v9  ;;  %7693 = vst [vmem:[#allocation54_spill] sm:$0xff] %v5273_v38  ;;  %v1307_v30 = vadd.f32 %v1306_v16, %v1091_v57  ;;  %v1099_v13 = vmul.f32 %v5259_v62, %v5259_v62  ;;  %v5291_v20 = vsub.f32 %v3934_v45, %v5029_v63  ;;  %v5303_v45 = vmul.f32 0.0012755102, %v759_v4 }
 0x16a   : > { %7694 = vst [vmem:[#allocation55_spill] sm:$0xff] %v5277_v36  ;;  %7695 = vst [vmem:[#allocation56_spill] sm:$0xff] %v5281_v52  ;;  %v1100_v48 = vmul.f32 %v5265_v21, %v5265_v21  ;;  %v1101_v57 = vmul.f32 %v5273_v38, %v5273_v38  ;;  %v1314_v8 = vadd.f32 %v1313_v28, %v1096_v49  ;;  %v3937_v28 = vld [vmem:[%s4573_s29 + $0x230] sm:$0xff]  ;;  %v3958_v38 = vld [vmem:[%s4573_s29 + $0x2d8] sm:$0xff] }
 0x16b   : > { %7696 = vst [vmem:[#allocation57_spill] sm:$0xff] %v5291_v20  ;;  %v1309_v16 = vadd.f32 %v1308_v51, %v1307_v30  ;;  %v5299_v59 = vsub.f32 %v3935_v11, %v5029_v63  ;;  %v1102_v7 = vmul.f32 %v5277_v36, %v5277_v36  ;;  %v1098_v62 = vmul.f32 %v5269_v9, %v5269_v9  ;;  %v4000_v21 = vld [vmem:[%s4573_s29 + $0x428] sm:$0xff] }
 0x16c   : > { %v5309_v51 = vsub.f32 %v3936_v6, %v5029_v63  ;;  %v1103_v30 = vmul.f32 %v5281_v52, %v5281_v52  ;;  %v1315_v11 = vadd.f32 %v1314_v8, %v1097_v2  ;;  %v1321_v49 = vadd.f32 %v1101_v57, %v1100_v48  ;;  %v3939_v6 = vld [vmem:[%s4573_s29 + $0x240] sm:$0xff]  ;;  %v3940_v8 = vld [vmem:[%s4573_s29 + $0x248] sm:$0xff] }
 0x16d   : > { %7697 = vst [vmem:[#allocation58_spill] sm:$0xff] %v5299_v59  ;;  %1310 = vadd.xlane.f32.xlu0 %v1309_v16  ;;  %v5315_v4 = vsub.f32 %v3937_v28, %v5062_v40  ;;  %v5319_v9 = vsub.f32 %v3938_v0, %v5062_v40  ;;  %v1317_v36 = vsel %vm548_vm0, %v1099_v13, 0.0  ;;  %v1106_v63 = vmul.f32 %v5291_v20, %v5291_v20  ;;  %v3941_v13 = vld [vmem:[%s4573_s29 + $0x250] sm:$0xff]  ;;  %v3942_v20 = vld [vmem:[%s4573_s29 + $0x258] sm:$0xff] }
 0x16e   : > { %7698 = vst [vmem:[#allocation59_spill] sm:$0xff] %v5309_v51  ;;  %v5326_v16 = vsub.f32 %v3939_v6, %v5062_v40  ;;  %v5330_v2 = vsub.f32 %v3940_v8, %v5062_v40  ;;  %v1316_v48 = vadd.f32 %v1315_v11, %v1098_v62  ;;  %v5332_v57 = vmul.f32 0.0012755102, %v750_v29 }
 0x16f   : > { %7699 = vst [vmem:[#allocation60_spill] sm:$0xff] %v5315_v4  ;;  %7700 = vst [vmem:[#allocation61_spill] sm:$0xff] %v5319_v9  ;;  %v1104_v0 = vmul.f32 %v5299_v59, %v5299_v59  ;;  %v1322_v28 = vadd.f32 %v1321_v49, %v1102_v7  ;;  %v5338_v52 = vsub.f32 %v3941_v13, %v5062_v40  ;;  %v3943_v49 = vld [vmem:[%s4573_s29 + $0x260] sm:$0xff] }
 0x170   : > { %7701 = vst [vmem:[#allocation62_spill] sm:$0xff] %v5326_v16  ;;  %7702 = vst [vmem:[#allocation63_spill] sm:$0xff] %v5330_v2  ;;  %v5342_v6 = vsub.f32 %v3942_v20, %v5062_v40  ;;  %v1107_v8 = vmul.f32 %v5315_v4, %v5315_v4  ;;  %v1108_v29 = vmul.f32 %v5319_v9, %v5319_v9  ;;  %v1326_v20 = vsel %vm548_vm0, %v1106_v63, 0.0  ;;  %v3946_v63 = vld [vmem:[%s4573_s29 + $0x278] sm:$0xff] }
 0x171   : > { %7703 = vst [vmem:[#allocation64_spill] sm:$0xff] %v5338_v52  ;;  %v1318_v62 = vadd.f32 %v1317_v36, %v1316_v48  ;;  %v1105_v7 = vmul.f32 %v5309_v51, %v5309_v51  ;;  %v1323_v11 = vadd.f32 %v1322_v28, %v1103_v30  ;;  %v5352_v13 = vsub.f32 %v3943_v49, %v5062_v40  ;;  %v3944_v48 = vld [vmem:[%s4573_s29 + $0x268] sm:$0xff]  ;;  %v3945_v28 = vld [vmem:[%s4573_s29 + $0x270] sm:$0xff] }
 0x172   : > { %7704 = vst [vmem:[#allocation65_spill] sm:$0xff] %v5342_v6  ;;  %v1109_v59 = vmul.f32 %v5326_v16, %v5326_v16  ;;  %v1110_v4 = vmul.f32 %v5330_v2, %v5330_v2  ;;  %v1330_v9 = vadd.f32 %v1108_v29, %v1107_v8  ;;  %v5361_v30 = vsub.f32 %v3944_v48, %v5053_v18  ;;  %v3947_v29 = vld [vmem:[%s4573_s29 + $0x280] sm:$0xff] }
 0x173   : > { %7705 = vst [vmem:[#allocation66_spill] sm:$0xff] %v5352_v13  ;;  %1319 = vadd.xlane.f32.xlu1 %v1318_v62  ;;  %v1324_v36 = vadd.f32 %v1323_v11, %v1104_v0  ;;  %v5365_v40 = vsub.f32 %v3945_v28, %v5053_v18  ;;  %v5369_v49 = vsub.f32 %v3946_v63, %v5053_v18  ;;  %v3948_v28 = vld [vmem:[%s4573_s29 + $0x298] sm:$0xff] }
 0x174   : > { %7706 = vst [vmem:[#allocation67_spill] sm:$0xff] %v5361_v30  ;;  %v1111_v2 = vmul.f32 %v5338_v52, %v5338_v52  ;;  %v1112_v8 = vmul.f32 %v5342_v6, %v5342_v6  ;;  %v1331_v0 = vadd.f32 %v1330_v9, %v1109_v59  ;;  %v5377_v62 = vsub.f32 %v3947_v29, %v5053_v18  ;;  %v777_v6 = vpop.xlane.xlu1 %776  ;;  %v3949_v9 = vld [vmem:[%s4573_s29 + $0x288] sm:$0xff] }
 0x175   : > { %7707 = vst [vmem:[#allocation68_spill] sm:$0xff] %v5365_v40  ;;  %7708 = vst [vmem:[#allocation69_spill] sm:$0xff] %v5369_v49  ;;  %v1325_v11 = vadd.f32 %v1324_v36, %v1105_v7  ;;  %v1113_v48 = vmul.f32 %v5352_v13, %v5352_v13  ;;  %v5383_v63 = vsub.f32 %v3948_v28, %v5053_v18  ;;  %v3950_v28 = vld [vmem:[%s4573_s29 + $0x290] sm:$0xff] }
 0x176   : > { %7709 = vst [vmem:[#allocation70_spill] sm:$0xff] %v5377_v62  ;;  %v1114_v52 = vmul.f32 %v5361_v30, %v5361_v30  ;;  %v1332_v16 = vadd.f32 %v1331_v0, %v1110_v4  ;;  %v5389_v59 = vsub.f32 %v3949_v9, %v5053_v18  ;;  %v1115_v7 = vmul.f32 %v5365_v40, %v5365_v40  ;;  %v3951_v40 = vld [vmem:[%s4573_s29 + $0x2a0] sm:$0xff] }
 0x177   : > { %7710 = vst [vmem:[#allocation71_spill] sm:$0xff] %v5383_v63  ;;  %v1116_v36 = vmul.f32 %v5369_v49, %v5369_v49  ;;  %v1327_v29 = vadd.f32 %v1326_v20, %v1325_v11  ;;  %v5397_v13 = vsub.f32 %v3950_v28, %v5053_v18  ;;  %v1117_v4 = vmul.f32 %v5377_v62, %v5377_v62  ;;  %v3952_v20 = vld [vmem:[%s4573_s29 + $0x2a8] sm:$0xff]  ;;  %v3953_v62 = vld [vmem:[%s4573_s29 + $0x2b0] sm:$0xff] }
 0x178   : > { %7711 = vst [vmem:[#allocation72_spill] sm:$0xff] %v5389_v59  ;;  %v1120_v0 = vmul.f32 %v5383_v63, %v5383_v63  ;;  %v1333_v9 = vadd.f32 %v1332_v16, %v1111_v2  ;;  %v1339_v30 = vadd.f32 %v1115_v7, %v1114_v52  ;;  %v5405_v51 = vsub.f32 %v3951_v40, %v5116_v42  ;;  %v3954_v52 = vld [vmem:[%s4573_s29 + $0x2b8] sm:$0xff]  ;;  %v768_v7 = vpop.xlane.xlu0 %767 }
 0x179   : > { %7712 = vst [vmem:[#allocation73_spill] sm:$0xff] %v5397_v13  ;;  %v5409_v11 = vsub.f32 %v3952_v20, %v5116_v42  ;;  %v5411_v18 = vmul.f32 0.0012755102, %v777_v6  ;;  %1328 = vadd.xlane.f32.xlu0 %v1327_v29  ;;  %v1335_v28 = vsel %vm548_vm0, %v1113_v48, 0.0  ;;  %v5416_v16 = vsub.f32 %v3953_v62, %v5116_v42  ;;  %v3955_v6 = vld [vmem:[%s4573_s29 + $0x2c0] sm:$0xff]  ;;  %v3956_v48 = vld [vmem:[%s4573_s29 + $0x2c8] sm:$0xff] }
 0x17a   : > { %7713 = vst [vmem:[#allocation74_spill] sm:$0xff] %v5405_v51  ;;  %v5420_v2 = vsub.f32 %v3954_v52, %v5116_v42  ;;  %v1334_v40 = vadd.f32 %v1333_v9, %v1112_v8  ;;  %v1118_v20 = vmul.f32 %v5389_v59, %v5389_v59  ;;  %v1340_v63 = vadd.f32 %v1339_v30, %v1116_v36  ;;  %v3957_v62 = vld [vmem:[%s4573_s29 + $0x2d0] sm:$0xff] }
 0x17b   : > { %7714 = vst [vmem:[#allocation75_spill] sm:$0xff] %v5409_v11  ;;  %7715 = vst [vmem:[#allocation76_spill] sm:$0xff] %v5416_v16  ;;  %v5426_v29 = vsub.f32 %v3955_v6, %v5116_v42  ;;  %v5430_v49 = vsub.f32 %v3956_v48, %v5116_v42  ;;  %v5434_v52 = vsub.f32 %v3957_v62, %v5116_v42  ;;  %v1344_v48 = vsel %vm548_vm0, %v1120_v0, 0.0  ;;  %v3961_v0 = vld [vmem:[%s4573_s29 + $0x2f0] sm:$0xff] }
 0x17c   : > { %7716 = vst [vmem:[#allocation77_spill] sm:$0xff] %v5420_v2  ;;  %v1121_v8 = vmul.f32 %v5405_v51, %v5405_v51  ;;  %v1122_v30 = vmul.f32 %v5409_v11, %v5409_v11  ;;  %v1336_v36 = vadd.f32 %v1335_v28, %v1334_v40  ;;  %v1119_v9 = vmul.f32 %v5397_v13, %v5397_v13  ;;  %v3959_v40 = vld [vmem:[%s4573_s29 + $0x2e0] sm:$0xff] }
 0x17d   : > { %7717 = vst [vmem:[#allocation78_spill] sm:$0xff] %v5426_v29  ;;  %7718 = vst [vmem:[#allocation79_spill] sm:$0xff] %v5430_v49  ;;  %v1341_v6 = vadd.f32 %v1340_v63, %v1117_v4  ;;  %v1123_v59 = vmul.f32 %v5416_v16, %v5416_v16  ;;  %v1124_v42 = vmul.f32 %v5420_v2, %v5420_v2  ;;  %v3960_v63 = vld [vmem:[%s4573_s29 + $0x2e8] sm:$0xff]  ;;  %v3963_v16 = vld [vmem:[%s4573_s29 + $0x2f8] sm:$0xff] }
 0x17e   : > { %7719 = vst [vmem:[#allocation80_spill] sm:$0xff] %v5434_v52  ;;  %v1348_v62 = vadd.f32 %v1122_v30, %v1121_v8  ;;  %v5449_v51 = vsub.f32 %v3958_v38, %v5092_v15  ;;  %1337 = vadd.xlane.f32.xlu1 %v1336_v36  ;;  %v5453_v11 = vsub.f32 %v3959_v40, %v5092_v15  ;;  %v5469_v40 = vpop.xlane.xlu0 %785  ;;  %v3979_v13 = vld [vmem:[%s4573_s29 + $0x380] sm:$0xff] }
 0x17f   : > { %v1342_v28 = vadd.f32 %v1341_v6, %v1118_v20  ;;  %v5457_v4 = vsub.f32 %v3960_v63, %v5092_v15  ;;  %v5461_v8 = vsub.f32 %v3961_v0, %v5092_v15  ;;  %v1125_v38 = vmul.f32 %v5426_v29, %v5426_v29  ;;  %v3962_v63 = vld [vmem:[%s4573_s29 + $0x308] sm:$0xff] }
 0x180   : > { %7720 = vst [vmem:[#allocation81_spill] sm:$0xff] %v5449_v51  ;;  %7721 = vst [vmem:[#allocation82_spill] sm:$0xff] %v5453_v11  ;;  %v1126_v20 = vmul.f32 %v5430_v49, %v5430_v49  ;;  %v1127_v30 = vmul.f32 %v5434_v52, %v5434_v52  ;;  %v1349_v36 = vadd.f32 %v1348_v62, %v1123_v59 }
 0x181   : > { %7722 = vst [vmem:[#allocation83_spill] sm:$0xff] %v5457_v4  ;;  %7723 = vst [vmem:[#allocation84_spill] sm:$0xff] %v5461_v8  ;;  %v1343_v6 = vadd.f32 %v1342_v28, %v1119_v9  ;;  %v5473_v2 = vsub.f32 %v3962_v63, %v5092_v15  ;;  %v1128_v0 = vmul.f32 %v5449_v51, %v5449_v51  ;;  %v3964_v9 = vld [vmem:[%s4573_s29 + $0x300] sm:$0xff] }
 0x182   : > { %v1129_v29 = vmul.f32 %v5453_v11, %v5453_v11  ;;  %v1350_v49 = vadd.f32 %v1349_v36, %v1124_v42  ;;  %v5481_v59 = vsub.f32 %v3963_v16, %v5092_v15  ;;  %v5485_v62 = vsub.f32 %v3964_v9, %v5092_v15  ;;  %v3965_v16 = vld [vmem:[%s4573_s29 + $0x310] sm:$0xff]  ;;  %v3966_v15 = vld [vmem:[%s4573_s29 + $0x318] sm:$0xff] }
 0x183   : > { %7724 = vst [vmem:[#allocation85_spill] sm:$0xff] %v5473_v2  ;;  %v1130_v28 = vmul.f32 %v5457_v4, %v5457_v4  ;;  %v1345_v63 = vadd.f32 %v1344_v48, %v1343_v6  ;;  %v1131_v52 = vmul.f32 %v5461_v8, %v5461_v8  ;;  %v1134_v11 = vmul.f32 %v5473_v2, %v5473_v2  ;;  %v3967_v4 = vld [vmem:[%s4573_s29 + $0x320] sm:$0xff]  ;;  %v3969_v2 = vld [vmem:[%s4573_s29 + $0x330] sm:$0xff] }
 0x184   : > { %7725 = vst [vmem:[#allocation86_spill] sm:$0xff] %v5481_v59  ;;  %7726 = vst [vmem:[#allocation87_spill] sm:$0xff] %v5485_v62  ;;  %v1357_v42 = vadd.f32 %v1129_v29, %v1128_v0  ;;  %v1351_v36 = vadd.f32 %v1350_v49, %v1125_v38  ;;  %v5495_v51 = vsub.f32 %v3965_v16, %v5154_v22  ;;  %v5505_v6 = vmul.f32 0.0012755102, %v768_v7  ;;  %v3968_v49 = vld [vmem:[%s4573_s29 + $0x328] sm:$0xff] }
 0x185   : > { %v5499_v9 = vsub.f32 %v3966_v15, %v5154_v22  ;;  %v5503_v48 = vsub.f32 %v3967_v4, %v5154_v22  ;;  %1346 = vadd.xlane.f32.xlu0 %v1345_v63  ;;  %v1353_v29 = vsel %vm548_vm0, %v1127_v30, 0.0  ;;  %v5510_v38 = vsub.f32 %v3968_v49, %v5154_v22  ;;  %v3971_v49 = vld [vmem:[%s4573_s29 + $0x338] sm:$0xff] }
 0x186   : > { %7727 = vst [vmem:[#allocation88_spill] sm:$0xff] %v5495_v51  ;;  %v1358_v0 = vadd.f32 %v1357_v42, %v1130_v28  ;;  %v1352_v16 = vadd.f32 %v1351_v36, %v1126_v20  ;;  %v1132_v15 = vmul.f32 %v5481_v59, %v5481_v59  ;;  %v5516_v8 = vsub.f32 %v3969_v2, %v5154_v22  ;;  %v3970_v28 = vld [vmem:[%s4573_s29 + $0x340] sm:$0xff]  ;;  %v5528_v42 = vpop.xlane.xlu0 %803 }
 0x187   : > { %7728 = vst [vmem:[#allocation89_spill] sm:$0xff] %v5499_v9  ;;  %7729 = vst [vmem:[#allocation90_spill] sm:$0xff] %v5503_v48  ;;  %v1135_v7 = vmul.f32 %v5495_v51, %v5495_v51  ;;  %v1133_v4 = vmul.f32 %v5485_v62, %v5485_v62  ;;  %v5524_v63 = vsub.f32 %v3970_v28, %v5154_v22  ;;  %v1362_v36 = vsel %vm548_vm0, %v1134_v11, 0.0  ;;  %v3972_v62 = vld [vmem:[%s4573_s29 + $0x348] sm:$0xff] }
 0x188   : > { %7730 = vst [vmem:[#allocation91_spill] sm:$0xff] %v5510_v38  ;;  %7731 = vst [vmem:[#allocation92_spill] sm:$0xff] %v5516_v8  ;;  %v1359_v30 = vadd.f32 %v1358_v0, %v1131_v52  ;;  %v1136_v20 = vmul.f32 %v5499_v9, %v5499_v9  ;;  %v1354_v2 = vadd.f32 %v1353_v29, %v1352_v16 }
 0x189   : > { %7732 = vst [vmem:[#allocation93_spill] sm:$0xff] %v5524_v63  ;;  %v5533_v51 = vsub.f32 %v3971_v49, %v5154_v22  ;;  %v1137_v52 = vmul.f32 %v5503_v48, %v5503_v48  ;;  %v1138_v28 = vmul.f32 %v5510_v38, %v5510_v38  ;;  %v5541_v29 = vsub.f32 %v3972_v62, %v5131_v34  ;;  %v3973_v22 = vld [vmem:[%s4573_s29 + $0x350] sm:$0xff]  ;;  %v3974_v49 = vld [vmem:[%s4573_s29 + $0x358] sm:$0xff]  ;;  %v3976_v38 = vld [vmem:[%s4573_s29 + $0x368] sm:$0xff] }
 0x18a   : > { %v1360_v0 = vadd.f32 %v1359_v30, %v1132_v15  ;;  %v1366_v9 = vadd.f32 %v1136_v20, %v1135_v7  ;;  %1355 = vadd.xlane.f32.xlu1 %v1354_v2  ;;  %v1139_v11 = vmul.f32 %v5516_v8, %v5516_v8  ;;  %v5547_v16 = vsub.f32 %v3973_v22, %v5131_v34  ;;  %v3975_v30 = vld [vmem:[%s4573_s29 + $0x360] sm:$0xff]  ;;  %v5563_v22 = vpop.permute.xlu0 %2228  ;;  %v3977_v48 = vld [vmem:[%s4573_s29 + $0x378] sm:$0xff] }
 0x18b   : > { %7733 = vst [vmem:[#allocation94_spill] sm:$0xff] %v5533_v51  ;;  %7734 = vst [vmem:[#allocation95_spill] sm:$0xff] %v5541_v29  ;;  %v5551_v15 = vsub.f32 %v3974_v49, %v5131_v34  ;;  %v5555_v7 = vsub.f32 %v3975_v30, %v5131_v34  ;;  %v1141_v62 = vmul.f32 %v5524_v63, %v5524_v63  ;;  %v3978_v63 = vld [vmem:[%s4573_s29 + $0x370] sm:$0xff] }
 0x18c   : > { %7735 = vst [vmem:[#allocation96_spill] sm:$0xff] %v5547_v16  ;;  %v1361_v20 = vadd.f32 %v1360_v0, %v1133_v4  ;;  %v1367_v2 = vadd.f32 %v1366_v9, %v1137_v52  ;;  %v5561_v8 = vsub.f32 %v3976_v38, %v5131_v34  ;;  %v5567_v49 = vsub.f32 %v3977_v48, %v5131_v34 }
 0x18d   : > { %7736 = vst [vmem:[#allocation97_spill] sm:$0xff] %v5551_v15  ;;  %7737 = vst [vmem:[#allocation98_spill] sm:$0xff] %v5555_v7  ;;  %v1142_v30 = vmul.f32 %v5541_v29, %v5541_v29  ;;  %v1143_v4 = vmul.f32 %v5547_v16, %v5547_v16  ;;  %v1144_v9 = vmul.f32 %v5551_v15, %v5551_v15 }
 0x18e   : > { %7738 = vst [vmem:[#allocation99_spill] sm:$0xff] %v5561_v8  ;;  %7739 = vst [vmem:[#allocation100_spill] sm:$0xff] %v5567_v49  ;;  %v1363_v52 = vadd.f32 %v1362_v36, %v1361_v20  ;;  %v1140_v38 = vmul.f32 %v5533_v51, %v5533_v51  ;;  %v1368_v0 = vadd.f32 %v1367_v2, %v1138_v28  ;;  %v3980_v28 = vld [vmem:[%s4573_s29 + $0x388] sm:$0xff]  ;;  %v3982_v51 = vld [vmem:[%s4573_s29 + $0x398] sm:$0xff] }
 0x18f   : > { %v5579_v48 = vsub.f32 %v3978_v63, %v5131_v34  ;;  %v1145_v29 = vmul.f32 %v5555_v7, %v5555_v7  ;;  %v1148_v16 = vmul.f32 %v5567_v49, %v5567_v49  ;;  %v1375_v59 = vadd.f32 %v1143_v4, %v1142_v30  ;;  %v3981_v34 = vld [vmem:[%s4573_s29 + $0x390] sm:$0xff]  ;;  %v5616_v7 = vpop.permute.xlu0 %2238 }
 0x190   : > { %v5587_v36 = vsub.f32 %v3979_v13, %v5201_v54  ;;  %1364 = vadd.xlane.f32.xlu0 %v1363_v52  ;;  %v1369_v20 = vadd.f32 %v1368_v0, %v1139_v11  ;;  %v5591_v2 = vsub.f32 %v3980_v28, %v5201_v54  ;;  %v5595_v63 = vsub.f32 %v3981_v34, %v5201_v54  ;;  %v3983_v11 = vld [vmem:[%s4573_s29 + $0x3a0] sm:$0xff]  ;;  %v3984_v28 = vld [vmem:[%s4573_s29 + $0x3b0] sm:$0xff] }
 0x191   : > { %7740 = vst [vmem:[#allocation101_spill] sm:$0xff] %v5579_v48  ;;  %v5599_v49 = vsub.f32 %v3982_v51, %v5201_v54  ;;  %v1371_v30 = vsel %vm548_vm0, %v1141_v62, 0.0  ;;  %v1146_v13 = vmul.f32 %v5561_v8, %v5561_v8  ;;  %v1376_v4 = vadd.f32 %v1375_v59, %v1144_v9 }
 0x192   : > { %7741 = vst [vmem:[#allocation102_spill] sm:$0xff] %v5587_v36  ;;  %7742 = vst [vmem:[#allocation103_spill] sm:$0xff] %v5591_v2  ;;  %v5606_v52 = vsub.f32 %v3983_v11, %v5201_v54  ;;  %v1370_v0 = vadd.f32 %v1369_v20, %v1140_v38  ;;  %v5610_v34 = vsub.f32 %v3984_v28, %v5201_v54  ;;  %v1380_v38 = vsel %vm548_vm0, %v1148_v16, 0.0  ;;  %v3985_v20 = vld [vmem:[%s4573_s29 + $0x3a8] sm:$0xff]  ;;  %v5625_v28 = vpop.xlane.xlu1 %794 }
 0x193   : > { %7743 = vst [vmem:[#allocation104_spill] sm:$0xff] %v5595_v63  ;;  %7744 = vst [vmem:[#allocation105_spill] sm:$0xff] %v5599_v49  ;;  %v1149_v51 = vmul.f32 %v5587_v36, %v5587_v36  ;;  %v1150_v62 = vmul.f32 %v5591_v2, %v5591_v2  ;;  %v1147_v59 = vmul.f32 %v5579_v48, %v5579_v48 }
 0x194   : > { %7745 = vst [vmem:[#allocation106_spill] sm:$0xff] %v5606_v52  ;;  %7746 = vst [vmem:[#allocation107_spill] sm:$0xff] %v5610_v34  ;;  %v1377_v9 = vadd.f32 %v1376_v4, %v1145_v29  ;;  %v5623_v11 = vsub.f32 %v3985_v20, %v5201_v54  ;;  %v1372_v36 = vadd.f32 %v1371_v30, %v1370_v0  ;;  %v3986_v29 = vld [vmem:[%s4573_s29 + $0x3b8] sm:$0xff]  ;;  %v3987_v54 = vld [vmem:[%s4573_s29 + $0x3c0] sm:$0xff] }
 0x195   : > { %v1151_v2 = vmul.f32 %v5595_v63, %v5595_v63  ;;  %v1152_v8 = vmul.f32 %v5599_v49, %v5599_v49  ;;  %v1384_v15 = vadd.f32 %v1150_v62, %v1149_v51  ;;  %v5633_v16 = vsub.f32 %v3986_v29, %v5165_v23  ;;  %v3988_v30 = vld [vmem:[%s4573_s29 + $0x3c8] sm:$0xff]  ;;  %v3989_v62 = vld [vmem:[%s4573_s29 + $0x3d0] sm:$0xff] }
 0x196   : > { %7747 = vst [vmem:[#allocation108_spill] sm:$0xff] %v5623_v11  ;;  %v1378_v48 = vadd.f32 %v1377_v9, %v1146_v13  ;;  %v5637_v4 = vsub.f32 %v3987_v54, %v5165_v23  ;;  %v5641_v0 = vsub.f32 %v3988_v30, %v5165_v23  ;;  %1373 = vadd.xlane.f32.xlu1 %v1372_v36  ;;  %v3990_v54 = vld [vmem:[%s4573_s29 + $0x3d8] sm:$0xff]  ;;  %v3991_v63 = vld [vmem:[%s4573_s29 + $0x3e8] sm:$0xff] }
 0x197   : > { %7748 = vst [vmem:[#allocation109_spill] sm:$0xff] %v5633_v16  ;;  %v1153_v20 = vmul.f32 %v5606_v52, %v5606_v52  ;;  %v1155_v13 = vmul.f32 %v5610_v34, %v5610_v34  ;;  %v1385_v51 = vadd.f32 %v1384_v15, %v1151_v2  ;;  %v5649_v9 = vsub.f32 %v3989_v62, %v5165_v23  ;;  %v3992_v15 = vld [vmem:[%s4573_s29 + $0x3e0] sm:$0xff]  ;;  %v5669_v62 = vpop.permute.xlu0 %2248 }
 0x198   : > { %7749 = vst [vmem:[#allocation110_spill] sm:$0xff] %v5637_v4  ;;  %7750 = vst [vmem:[#allocation111_spill] sm:$0xff] %v5641_v0  ;;  %v1379_v29 = vadd.f32 %v1378_v48, %v1147_v59  ;;  %v5653_v49 = vsub.f32 %v3990_v54, %v5165_v23  ;;  %v5657_v36 = vsub.f32 %v3991_v63, %v5165_v23 }
 0x199   : > { %7751 = vst [vmem:[#allocation112_spill] sm:$0xff] %v5649_v9  ;;  %v1156_v30 = vmul.f32 %v5633_v16, %v5633_v16  ;;  %v1386_v34 = vadd.f32 %v1385_v51, %v1152_v8  ;;  %v5663_v2 = vsub.f32 %v3992_v15, %v5165_v23  ;;  %v1157_v48 = vmul.f32 %v5637_v4, %v5637_v4  ;;  %v5677_v51 = vpop.permute.xlu1 %2233  ;;  %v3998_v16 = vld [vmem:[%s4573_s29 + $0x420] sm:$0xff] }
 0x19a   : > { %7752 = vst [vmem:[#allocation113_spill] sm:$0xff] %v5653_v49  ;;  %7753 = vst [vmem:[#allocation114_spill] sm:$0xff] %v5657_v36  ;;  %v1158_v59 = vmul.f32 %v5641_v0, %v5641_v0  ;;  %v1381_v63 = vadd.f32 %v1380_v38, %v1379_v29  ;;  %v1154_v54 = vmul.f32 %v5623_v11, %v5623_v11  ;;  %v3993_v0 = vld [vmem:[%s4573_s29 + $0x3f0] sm:$0xff]  ;;  %v3994_v38 = vld [vmem:[%s4573_s29 + $0x3f8] sm:$0xff]  ;;  %v1389_v11 = vsel %vm548_vm0, %v1155_v13, 0.0 }
 0x19b   : > { %7754 = vst [vmem:[#allocation115_spill] sm:$0xff] %v5663_v2  ;;  %v1159_v8 = vmul.f32 %v5649_v9, %v5649_v9  ;;  %v1162_v23 = vmul.f32 %v5657_v36, %v5657_v36  ;;  %v1387_v15 = vadd.f32 %v1386_v34, %v1153_v20  ;;  %v1393_v52 = vadd.f32 %v1157_v48, %v1156_v30  ;;  %v3995_v9 = vld [vmem:[%s4573_s29 + $0x400] sm:$0xff]  ;;  %v3996_v20 = vld [vmem:[%s4573_s29 + $0x408] sm:$0xff] }
 0x19c   : > { %v5681_v4 = vsub.f32 %v3993_v0, %v5223_v1  ;;  %v5685_v29 = vsub.f32 %v3994_v38, %v5223_v1  ;;  %1382 = vadd.xlane.f32.xlu0 %v1381_v63  ;;  %v1160_v36 = vmul.f32 %v5653_v49, %v5653_v49  ;;  %v5692_v34 = vsub.f32 %v3995_v9, %v5223_v1  ;;  %v3997_v63 = vld [vmem:[%s4573_s29 + $0x410] sm:$0xff] }
 0x19d   : > { %v5696_v0 = vsub.f32 %v3996_v20, %v5223_v1  ;;  %v1388_v30 = vadd.f32 %v1387_v15, %v1154_v54  ;;  %v1161_v48 = vmul.f32 %v5663_v2, %v5663_v2  ;;  %v1394_v38 = vadd.f32 %v1393_v52, %v1158_v59  ;;  %v3999_v59 = vld [vmem:[%s4573_s29 + $0x418] sm:$0xff]  ;;  %v5719_v2 = vpop.permute.xlu0 %2258 }
 0x19e   : > { %7755 = vst [vmem:[#allocation116_spill] sm:$0xff] %v5681_v4  ;;  %7756 = vst [vmem:[#allocation117_spill] sm:$0xff] %v5685_v29  ;;  %v5702_v13 = vsub.f32 %v3997_v63, %v5223_v1  ;;  %v1398_v49 = vsel %vm548_vm0, %v1162_v23, 0.0  ;;  %v5707_v9 = vsub.f32 %v3998_v16, %v5223_v1  ;;  %v1163_v20 = vmul.f32 %v5681_v4, %v5681_v4 }
 0x19f   : > { %7757 = vst [vmem:[#allocation118_spill] sm:$0xff] %v5692_v34  ;;  %7758 = vst [vmem:[#allocation119_spill] sm:$0xff] %v5696_v0  ;;  %v1164_v54 = vmul.f32 %v5685_v29, %v5685_v29  ;;  %v1390_v15 = vadd.f32 %v1389_v11, %v1388_v30  ;;  %v1395_v52 = vadd.f32 %v1394_v38, %v1159_v8  ;;  %v4001_v8 = vld [vmem:[%s4573_s29 + $0x430] sm:$0xff]  ;;  %v4004_v29 = vld [vmem:[%s4573_s29 + $0x448] sm:$0xff] }
 0x1a0   : > { %7759 = vst [vmem:[#allocation120_spill] sm:$0xff] %v5702_v13  ;;  %7760 = vst [vmem:[#allocation121_spill] sm:$0xff] %v5707_v9  ;;  %v5715_v63 = vsub.f32 %v3999_v59, %v5223_v1  ;;  %v1165_v23 = vmul.f32 %v5692_v34, %v5692_v34  ;;  %v1166_v16 = vmul.f32 %v5696_v0, %v5696_v0  ;;  %v5731_v1 = vpop.permute.xlu1 %2243  ;;  %v4002_v34 = vld [vmem:[%s4573_s29 + $0x438] sm:$0xff] }
 0x1a1   : > { %7762 = vst [vmem:[#allocation123_spill] sm:$0xff] %v5719_v2  ;;  %v1402_v4 = vadd.f32 %v1164_v54, %v1163_v20  ;;  %v5725_v11 = vsub.f32 %v4000_v21, %v5205_v10  ;;  %v5729_v30 = vsub.f32 %v4001_v8, %v5205_v10  ;;  %1391 = vadd.xlane.f32.xlu1 %v1390_v15  ;;  %v4003_v54 = vld [vmem:[%s4573_s29 + $0x440] sm:$0xff]  ;;  %v4005_v15 = vld [vmem:[%s4573_s29 + $0x458] sm:$0xff] }
 0x1a2   : > { %7761 = vst [vmem:[#allocation122_spill] sm:$0xff] %v5715_v63  ;;  %v1396_v38 = vadd.f32 %v1395_v52, %v1160_v36  ;;  %v1167_v59 = vmul.f32 %v5702_v13, %v5702_v13  ;;  %v5737_v20 = vsub.f32 %v4002_v34, %v5205_v10  ;;  %v5741_v21 = vsub.f32 %v4003_v54, %v5205_v10  ;;  %v4007_v2 = vld [vmem:[%s4573_s29 + $0x460] sm:$0xff] }
 0x1a3   : > { %7763 = vst [vmem:[#allocation124_spill] sm:$0xff] %v5725_v11  ;;  %7764 = vst [vmem:[#allocation125_spill] sm:$0xff] %v5729_v30  ;;  %v1169_v8 = vmul.f32 %v5707_v9, %v5707_v9  ;;  %v1403_v0 = vadd.f32 %v1402_v4, %v1165_v23  ;;  %v5747_v36 = vsub.f32 %v4004_v29, %v5205_v10  ;;  %v4006_v9 = vld [vmem:[%s4573_s29 + $0x450] sm:$0xff] }
 0x1a4   : > { %7765 = vst [vmem:[#allocation126_spill] sm:$0xff] %v5737_v20  ;;  %7766 = vst [vmem:[#allocation127_spill] sm:$0xff] %v5741_v21  ;;  %v5751_v52 = vsub.f32 %v4005_v15, %v5205_v10  ;;  %v1397_v13 = vadd.f32 %v1396_v38, %v1161_v48  ;;  %v1170_v34 = vmul.f32 %v5725_v11, %v5725_v11 }
 0x1a5   : > { %7767 = vst [vmem:[#allocation128_spill] sm:$0xff] %v5747_v36  ;;  %v1171_v54 = vmul.f32 %v5729_v30, %v5729_v30  ;;  %v1172_v4 = vmul.f32 %v5737_v20, %v5737_v20  ;;  %v1168_v29 = vmul.f32 %v5715_v63, %v5715_v63  ;;  %v1404_v23 = vadd.f32 %v1403_v0, %v1166_v16  ;;  %v5773_v63 = vpop.permute.xlu0 %2268  ;;  %v4008_v16 = vld [vmem:[%s4573_s29 + $0x468] sm:$0xff] }
 0x1a6   : > { %7768 = vst [vmem:[#allocation129_spill] sm:$0xff] %v5751_v52  ;;  %v5763_v15 = vsub.f32 %v4006_v9, %v5205_v10  ;;  %v1173_v48 = vmul.f32 %v5741_v21, %v5741_v21  ;;  %v1399_v38 = vadd.f32 %v1398_v49, %v1397_v13  ;;  %v1176_v30 = vmul.f32 %v5751_v52, %v5751_v52  ;;  %v4009_v9 = vld [vmem:[%s4573_s29 + $0x470] sm:$0xff]  ;;  %v4010_v13 = vld [vmem:[%s4573_s29 + $0x478] sm:$0xff] }
 0x1a7   : > { %v1411_v11 = vadd.f32 %v1171_v54, %v1170_v34  ;;  %v5771_v20 = vsub.f32 %v4007_v2, %v5254_v17  ;;  %7771 = vst [vmem:[#allocation132_spill] sm:$0xff] %v5773_v63  ;;  %v1405_v0 = vadd.f32 %v1404_v23, %v1167_v59  ;;  %v5777_v10 = vsub.f32 %v4008_v16, %v5254_v17  ;;  %v5787_v54 = vpop.permute.xlu1 %2253  ;;  %v4011_v16 = vld [vmem:[%s4573_s29 + $0x480] sm:$0xff]  ;;  %v4012_v21 = vld [vmem:[%s4573_s29 + $0x490] sm:$0xff] }
 0x1a8   : > { %7769 = vst [vmem:[#allocation130_spill] sm:$0xff] %v5763_v15  ;;  %v5781_v49 = vsub.f32 %v4009_v9, %v5254_v17  ;;  %v5785_v34 = vsub.f32 %v4010_v13, %v5254_v17  ;;  %7775 = vst [vmem:[#allocation136_spill] sm:$0xff] %v5787_v54  ;;  %1400 = vadd.xlane.f32.xlu0 %v1399_v38  ;;  %v1407_v2 = vsel %vm548_vm0, %v1169_v8, 0.0  ;;  %v4014_v54 = vld [vmem:[%s4573_s29 + $0x498] sm:$0xff] }
 0x1a9   : > { %7770 = vst [vmem:[#allocation131_spill] sm:$0xff] %v5771_v20  ;;  %7772 = vst [vmem:[#allocation133_spill] sm:$0xff] %v5777_v10  ;;  %v1174_v59 = vmul.f32 %v5747_v36, %v5747_v36  ;;  %v1412_v23 = vadd.f32 %v1411_v11, %v1172_v4  ;;  %v5794_v52 = vsub.f32 %v4011_v16, %v5254_v17  ;;  %v1416_v16 = vsel %vm548_vm0, %v1176_v30, 0.0  ;;  %v4013_v36 = vld [vmem:[%s4573_s29 + $0x488] sm:$0xff]  ;;  %v4015_v30 = vld [vmem:[%s4573_s29 + $0x4a0] sm:$0xff] }
 0x1aa   : > { %7773 = vst [vmem:[#allocation134_spill] sm:$0xff] %v5781_v49  ;;  %7774 = vst [vmem:[#allocation135_spill] sm:$0xff] %v5785_v34  ;;  %v1406_v9 = vadd.f32 %v1405_v0, %v1168_v29  ;;  %v5798_v13 = vsub.f32 %v4012_v21, %v5254_v17  ;;  %v1177_v38 = vmul.f32 %v5771_v20, %v5771_v20 }
 0x1ab   : > { %7776 = vst [vmem:[#allocation137_spill] sm:$0xff] %v5794_v52  ;;  %v1178_v8 = vmul.f32 %v5777_v10, %v5777_v10  ;;  %v1175_v11 = vmul.f32 %v5763_v15, %v5763_v15  ;;  %v1413_v4 = vadd.f32 %v1412_v23, %v1173_v48  ;;  %v5809_v29 = vsub.f32 %v4013_v36, %v5254_v17  ;;  %v4016_v36 = vld [vmem:[%s4573_s29 + $0x4a8] sm:$0xff]  ;;  %v5827_v23 = vpop.permute.xlu0 %2278 }
 0x1ac   : > { %7777 = vst [vmem:[#allocation138_spill] sm:$0xff] %v5798_v13  ;;  %v1408_v0 = vadd.f32 %v1407_v2, %v1406_v9  ;;  %v1179_v21 = vmul.f32 %v5781_v49, %v5781_v49  ;;  %v1180_v20 = vmul.f32 %v5785_v34, %v5785_v34  ;;  %v5817_v48 = vsub.f32 %v4014_v54, %v5252_v55  ;;  %v4028_v15 = vld [vmem:[%s4573_s29 + $0x508] sm:$0xff] }
 0x1ad   : > { %7778 = vst [vmem:[#allocation139_spill] sm:$0xff] %v5809_v29  ;;  %v1420_v63 = vadd.f32 %v1178_v8, %v1177_v38  ;;  %v1414_v10 = vadd.f32 %v1413_v4, %v1174_v59  ;;  %v5821_v17 = vsub.f32 %v4015_v30, %v5252_v55  ;;  %v5825_v2 = vsub.f32 %v4016_v36, %v5252_v55  ;;  %v4017_v38 = vld [vmem:[%s4573_s29 + $0x4b0] sm:$0xff]  ;;  %v5837_v4 = vpop.permute.xlu1 %2263  ;;  %v4018_v36 = vld [vmem:[%s4573_s29 + $0x4b8] sm:$0xff] }
 0x1ae   : > { %7779 = vst [vmem:[#allocation140_spill] sm:$0xff] %v5817_v48  ;;  %7782 = vst [vmem:[#allocation143_spill] sm:$0xff] %v5827_v23  ;;  %1409 = vadd.xlane.f32.xlu1 %v1408_v0  ;;  %v1181_v59 = vmul.f32 %v5794_v52, %v5794_v52  ;;  %v1183_v54 = vmul.f32 %v5798_v13, %v5798_v13  ;;  %v5835_v8 = vsub.f32 %v4017_v38, %v5252_v55  ;;  %v4019_v0 = vld [vmem:[%s4573_s29 + $0x4c8] sm:$0xff]  ;;  %v4020_v13 = vld [vmem:[%s4573_s29 + $0x4c0] sm:$0xff] }
 0x1af   : > { %7780 = vst [vmem:[#allocation141_spill] sm:$0xff] %v5821_v17  ;;  %7781 = vst [vmem:[#allocation142_spill] sm:$0xff] %v5825_v2  ;;  %v1421_v9 = vadd.f32 %v1420_v63, %v1179_v21  ;;  %v1415_v30 = vadd.f32 %v1414_v10, %v1175_v11  ;;  %v5841_v34 = vsub.f32 %v4018_v36, %v5252_v55  ;;  %v1651_v23 = vld [vmem:[%s4581_s1 + $0x28] sm:$0xff] }
 0x1b0   : > { %7783 = vst [vmem:[#allocation144_spill] sm:$0xff] %v5835_v8  ;;  %7784 = vst [vmem:[#allocation145_spill] sm:$0xff] %v5837_v4  ;;  %v5845_v52 = vsub.f32 %v4019_v0, %v5252_v55  ;;  %v1184_v63 = vmul.f32 %v5817_v48, %v5817_v48  ;;  %v5851_v38 = vsub.f32 %v4020_v13, %v5252_v55  ;;  %v4021_v13 = vld [vmem:[%s4573_s29 + $0x4d0] sm:$0xff]  ;;  %v4022_v48 = vld [vmem:[%s4573_s29 + $0x4d8] sm:$0xff] }
 0x1b1   : > { %7785 = vst [vmem:[#allocation146_spill] sm:$0xff] %v5841_v34  ;;  %v1422_v21 = vadd.f32 %v1421_v9, %v1180_v20  ;;  %v1185_v10 = vmul.f32 %v5821_v17, %v5821_v17  ;;  %v1186_v11 = vmul.f32 %v5825_v2, %v5825_v2  ;;  %v1417_v36 = vadd.f32 %v1416_v16, %v1415_v30  ;;  %v4027_v2 = vld [vmem:[%s4573_s29 + $0x4f8] sm:$0xff] }
 0x1b2   : > { %7786 = vst [vmem:[#allocation147_spill] sm:$0xff] %v5845_v52  ;;  %7787 = vst [vmem:[#allocation148_spill] sm:$0xff] %v5851_v38  ;;  %v1182_v0 = vmul.f32 %v5809_v29, %v5809_v29  ;;  %v1187_v49 = vmul.f32 %v5835_v8, %v5835_v8  ;;  %v1190_v20 = vmul.f32 %v5845_v52, %v5845_v52  ;;  %v5872_v30 = vmul.f32 0.0012755102, %v5469_v40  ;;  %v4024_v52 = vld [vmem:[%s4573_s29 + $0x4e8] sm:$0xff] }
 0x1b3   : > { %v1423_v9 = vadd.f32 %v1422_v21, %v1181_v59  ;;  %v1429_v55 = vadd.f32 %v1185_v10, %v1184_v63  ;;  %v5865_v17 = vsub.f32 %v4021_v13, %v5332_v57  ;;  %v5869_v16 = vsub.f32 %v4022_v48, %v5332_v57  ;;  %1418 = vadd.xlane.f32.xlu0 %v1417_v36  ;;  %v4023_v21 = vld [vmem:[%s4573_s29 + $0x4e0] sm:$0xff]  ;;  %v5881_v10 = vpop.permute.xlu0 %2288  ;;  %v5889_v36 = vpop.permute.xlu1 %2273 }
 0x1b4   : > { %v1425_v29 = vsel %vm548_vm0, %v1183_v54, 0.0  ;;  %v1188_v59 = vmul.f32 %v5841_v34, %v5841_v34  ;;  %v5879_v63 = vsub.f32 %v4023_v21, %v5332_v57  ;;  %7791 = vst [vmem:[#allocation152_spill] sm:$0xff] %v5881_v10  ;;  %v1189_v48 = vmul.f32 %v5851_v38, %v5851_v38  ;;  %v4025_v21 = vld [vmem:[%s4573_s29 + $0x500] sm:$0xff] }
 0x1b5   : > { %7788 = vst [vmem:[#allocation149_spill] sm:$0xff] %v5865_v17  ;;  %7789 = vst [vmem:[#allocation150_spill] sm:$0xff] %v5869_v16  ;;  %v1424_v13 = vadd.f32 %v1423_v9, %v1182_v0  ;;  %v1430_v40 = vadd.f32 %v1429_v55, %v1186_v11  ;;  %v5887_v54 = vsub.f32 %v4024_v52, %v5332_v57  ;;  %v1434_v34 = vsel %vm548_vm0, %v1190_v20, 0.0  ;;  %v4026_v52 = vld [vmem:[%s4573_s29 + $0x4f0] sm:$0xff] }
 0x1b6   : > { %7790 = vst [vmem:[#allocation151_spill] sm:$0xff] %v5879_v63  ;;  %v5894_v8 = vsub.f32 %v4025_v21, %v5332_v57  ;;  %v1191_v0 = vmul.f32 %v5865_v17, %v5865_v17  ;;  %v1192_v11 = vmul.f32 %v5869_v16, %v5869_v16  ;;  %v5902_v38 = vsub.f32 %v4026_v52, %v5332_v57  ;;  %v4031_v52 = vld [vmem:[%s4573_s29 + $0x520] sm:$0xff] }
 0x1b7   : > { %7792 = vst [vmem:[#allocation153_spill] sm:$0xff] %v5887_v54  ;;  %v1426_v9 = vadd.f32 %v1425_v29, %v1424_v13  ;;  %v1431_v55 = vadd.f32 %v1430_v40, %v1187_v49  ;;  %v5906_v20 = vsub.f32 %v4027_v2, %v5332_v57  ;;  %v1193_v21 = vmul.f32 %v5879_v63, %v5879_v63  ;;  %v4029_v49 = vld [vmem:[%s4573_s29 + $0x510] sm:$0xff]  ;;  %v4030_v2 = vld [vmem:[%s4573_s29 + $0x518] sm:$0xff] }
 0x1b8   : > { %7793 = vst [vmem:[#allocation154_spill] sm:$0xff] %v5894_v8  ;;  %7794 = vst [vmem:[#allocation155_spill] sm:$0xff] %v5902_v38  ;;  %v1438_v17 = vadd.f32 %v1192_v11, %v1191_v0  ;;  %v5912_v16 = vsub.f32 %v4028_v15, %v5303_v45  ;;  %v5916_v29 = vsub.f32 %v4029_v49, %v5303_v45  ;;  %v4032_v49 = vld [vmem:[%s4573_s29 + $0x528] sm:$0xff]  ;;  %v4034_v63 = vld [vmem:[%s4573_s29 + $0x530] sm:$0xff] }
 0x1b9   : > { %7795 = vst [vmem:[#allocation156_spill] sm:$0xff] %v5906_v20  ;;  %1427 = vadd.xlane.f32.xlu1 %v1426_v9  ;;  %v1432_v13 = vadd.f32 %v1431_v55, %v1188_v59  ;;  %v1194_v57 = vmul.f32 %v5887_v54, %v5887_v54  ;;  %v5922_v40 = vsub.f32 %v4030_v2, %v5303_v45  ;;  %v4033_v59 = vld [vmem:[%s4573_s29 + $0x538] sm:$0xff]  ;;  %v5938_v2 = vpop.permute.xlu0 %2298 }
 0x1ba   : > { %7796 = vst [vmem:[#allocation157_spill] sm:$0xff] %v5912_v16  ;;  %7797 = vst [vmem:[#allocation158_spill] sm:$0xff] %v5916_v29  ;;  %v5926_v0 = vsub.f32 %v4031_v52, %v5303_v45  ;;  %v1197_v15 = vmul.f32 %v5894_v8, %v5894_v8  ;;  %v1439_v11 = vadd.f32 %v1438_v17, %v1193_v21 }
 0x1bb   : > { %7798 = vst [vmem:[#allocation159_spill] sm:$0xff] %v5922_v40  ;;  %v5932_v9 = vsub.f32 %v4032_v49, %v5303_v45  ;;  %v5936_v55 = vsub.f32 %v4033_v59, %v5303_v45  ;;  %7802 = vst [vmem:[#allocation163_spill] sm:$0xff] %v5938_v2  ;;  %v1433_v54 = vadd.f32 %v1432_v13, %v1189_v48  ;;  %v5948_v59 = vpop.permute.xlu1 %2283  ;;  %v4035_v2 = vld [vmem:[%s4573_s29 + $0x540] sm:$0xff] }
 0x1bc   : > { %7799 = vst [vmem:[#allocation160_spill] sm:$0xff] %v5926_v0  ;;  %v1198_v52 = vmul.f32 %v5912_v16, %v5912_v16  ;;  %v1199_v8 = vmul.f32 %v5916_v29, %v5916_v29  ;;  %v1200_v17 = vmul.f32 %v5922_v40, %v5922_v40  ;;  %v1195_v21 = vmul.f32 %v5902_v38, %v5902_v38 }
 0x1bd   : > { %7800 = vst [vmem:[#allocation161_spill] sm:$0xff] %v5932_v9  ;;  %7801 = vst [vmem:[#allocation162_spill] sm:$0xff] %v5936_v55  ;;  %v1440_v49 = vadd.f32 %v1439_v11, %v1194_v57  ;;  %v5952_v48 = vsub.f32 %v4034_v63, %v5303_v45  ;;  %v1201_v13 = vmul.f32 %v5926_v0, %v5926_v0  ;;  %v4036_v45 = vld [vmem:[%s4573_s29 + $0x548] sm:$0xff]  ;;  %v4037_v0 = vld [vmem:[%s4573_s29 + $0x550] sm:$0xff] }
 0x1be   : > { %v1435_v16 = vadd.f32 %v1434_v34, %v1433_v54  ;;  %v1204_v29 = vmul.f32 %v5936_v55, %v5936_v55  ;;  %v1447_v40 = vadd.f32 %v1199_v8, %v1198_v52  ;;  %v5960_v38 = vsub.f32 %v4035_v2, %v5505_v6  ;;  %v4038_v52 = vld [vmem:[%s4573_s29 + $0x558] sm:$0xff]  ;;  %v4041_v55 = vld [vmem:[%s4573_s29 + $0x568] sm:$0xff] }
 0x1bf   : > { %7803 = vst [vmem:[#allocation164_spill] sm:$0xff] %v5952_v48  ;;  %v1196_v57 = vmul.f32 %v5906_v20, %v5906_v20  ;;  %v1441_v11 = vadd.f32 %v1440_v49, %v1195_v21  ;;  %v5966_v63 = vsub.f32 %v4036_v45, %v5505_v6  ;;  %v5970_v34 = vsub.f32 %v4037_v0, %v5505_v6  ;;  %v4039_v45 = vld [vmem:[%s4573_s29 + $0x560] sm:$0xff] }
 0x1c0   : > { %7804 = vst [vmem:[#allocation165_spill] sm:$0xff] %v5960_v38  ;;  %1436 = vadd.xlane.f32.xlu0 %v1435_v16  ;;  %v1443_v8 = vsel %vm548_vm0, %v1197_v15, 0.0  ;;  %v1202_v54 = vmul.f32 %v5932_v9, %v5932_v9  ;;  %v1448_v2 = vadd.f32 %v1447_v40, %v1200_v17  ;;  %v5977_v21 = vsub.f32 %v4038_v52, %v5505_v6  ;;  %v5987_v15 = vpop.permute.xlu0 %2308 }
 0x1c1   : > { %7805 = vst [vmem:[#allocation166_spill] sm:$0xff] %v5966_v63  ;;  %7806 = vst [vmem:[#allocation167_spill] sm:$0xff] %v5970_v34  ;;  %v1442_v49 = vadd.f32 %v1441_v11, %v1196_v57  ;;  %v5981_v20 = vsub.f32 %v4039_v45, %v5505_v6  ;;  %v1205_v16 = vmul.f32 %v5960_v38, %v5960_v38  ;;  %v1452_v57 = vsel %vm548_vm0, %v1204_v29, 0.0  ;;  %v4040_v11 = vld [vmem:[%s4573_s29 + $0x570] sm:$0xff] }
 0x1c2   : > { %7807 = vst [vmem:[#allocation168_spill] sm:$0xff] %v5977_v21  ;;  %v1206_v0 = vmul.f32 %v5966_v63, %v5966_v63  ;;  %7809 = vst [vmem:[#allocation170_spill] sm:$0xff] %v5987_v15  ;;  %v1203_v40 = vmul.f32 %v5952_v48, %v5952_v48  ;;  %v1449_v17 = vadd.f32 %v1448_v2, %v1201_v13  ;;  %v6002_v15 = vpop.permute.xlu1 %2293  ;;  %v4042_v2 = vld [vmem:[%s4573_s29 + $0x578] sm:$0xff] }
 0x1c3   : > { %7808 = vst [vmem:[#allocation169_spill] sm:$0xff] %v5981_v20  ;;  %v5994_v52 = vsub.f32 %v4040_v11, %v5505_v6  ;;  %v1444_v45 = vadd.f32 %v1443_v8, %v1442_v49  ;;  %v5998_v38 = vsub.f32 %v4041_v55, %v5505_v6  ;;  %v1207_v63 = vmul.f32 %v5970_v34, %v5970_v34  ;;  %v4043_v11 = vld [vmem:[%s4573_s29 + $0x580] sm:$0xff]  ;;  %v4044_v49 = vld [vmem:[%s4573_s29 + $0x588] sm:$0xff]  ;;  %v4046_v34 = vld [vmem:[%s4573_s29 + $0x598] sm:$0xff] }
 0x1c4   : > { %v1456_v9 = vadd.f32 %v1206_v0, %v1205_v16  ;;  %7812 = vst [vmem:[#allocation173_spill] sm:$0xff] %v6002_v15  ;;  %v1450_v13 = vadd.f32 %v1449_v17, %v1202_v54  ;;  %v6006_v29 = vsub.f32 %v4042_v2, %v5411_v18  ;;  %v6010_v8 = vsub.f32 %v4043_v11, %v5411_v18  ;;  %v4045_v0 = vld [vmem:[%s4573_s29 + $0x590] sm:$0xff] }
 0x1c5   : > { %7810 = vst [vmem:[#allocation171_spill] sm:$0xff] %v5994_v52  ;;  %7811 = vst [vmem:[#allocation172_spill] sm:$0xff] %v5998_v38  ;;  %v6014_v6 = vsub.f32 %v4044_v49, %v5411_v18  ;;  %1445 = vadd.xlane.f32.xlu1 %v1444_v45  ;;  %v1208_v55 = vmul.f32 %v5977_v21, %v5977_v21  ;;  %v1209_v54 = vmul.f32 %v5981_v20, %v5981_v20  ;;  %v4048_v21 = vld [vmem:[%s4573_s29 + $0x5a0] sm:$0xff] }
 0x1c6   : > { %7813 = vst [vmem:[#allocation174_spill] sm:$0xff] %v6006_v29  ;;  %7814 = vst [vmem:[#allocation175_spill] sm:$0xff] %v6010_v8  ;;  %v1457_v16 = vadd.f32 %v1456_v9, %v1207_v63  ;;  %v6022_v17 = vsub.f32 %v4045_v0, %v5411_v18  ;;  %v1451_v2 = vadd.f32 %v1450_v13, %v1203_v40  ;;  %v4047_v9 = vld [vmem:[%s4573_s29 + $0x5a8] sm:$0xff]  ;;  %v6040_v0 = vpop.permute.xlu0 %2318 }
 0x1c7   : > { %7815 = vst [vmem:[#allocation176_spill] sm:$0xff] %v6014_v6  ;;  %v1211_v11 = vmul.f32 %v5994_v52, %v5994_v52  ;;  %v6028_v45 = vsub.f32 %v4046_v34, %v5411_v18  ;;  %v1212_v49 = vmul.f32 %v6006_v29, %v6006_v29  ;;  %v6034_v63 = vsub.f32 %v4047_v9, %v5411_v18 }
 0x1c8   : > { %7816 = vst [vmem:[#allocation177_spill] sm:$0xff] %v6022_v17  ;;  %v1458_v20 = vadd.f32 %v1457_v16, %v1208_v55  ;;  %v1213_v40 = vmul.f32 %v6010_v8, %v6010_v8  ;;  %v1214_v13 = vmul.f32 %v6014_v6, %v6014_v6  ;;  %7819 = vst [vmem:[#allocation180_spill] sm:$0xff] %v6040_v0  ;;  %v4049_v8 = vld [vmem:[%s4573_s29 + $0x5b0] sm:$0xff]  ;;  %v4055_v0 = vld [vmem:[%s4573_s29 + $0x5e8] sm:$0xff] }
 0x1c9   : > { %7817 = vst [vmem:[#allocation178_spill] sm:$0xff] %v6028_v45  ;;  %7818 = vst [vmem:[#allocation179_spill] sm:$0xff] %v6034_v63  ;;  %v1453_v52 = vadd.f32 %v1452_v57, %v1451_v2  ;;  %v1210_v34 = vmul.f32 %v5998_v38, %v5998_v38  ;;  %v6046_v55 = vsub.f32 %v4048_v21, %v5411_v18  ;;  %v4050_v57 = vld [vmem:[%s4573_s29 + $0x5b8] sm:$0xff]  ;;  %v6058_v38 = vpop.permute.xlu1 %2303  ;;  %v6061_v18 = vmul.f32 0.0012755102, %v5625_v28 }
 0x1ca   : > { %v1215_v16 = vmul.f32 %v6022_v17, %v6022_v17  ;;  %v1459_v9 = vadd.f32 %v1458_v20, %v1209_v54  ;;  %v1465_v29 = vadd.f32 %v1213_v40, %v1212_v49  ;;  %v6052_v6 = vsub.f32 %v4049_v8, %v5872_v30  ;;  %7823 = vst [vmem:[#allocation184_spill] sm:$0xff] %v6058_v38  ;;  %v4051_v54 = vld [vmem:[%s4573_s29 + $0x5c0] sm:$0xff]  ;;  %v4052_v17 = vld [vmem:[%s4573_s29 + $0x5c8] sm:$0xff] }
 0x1cb   : > { %7820 = vst [vmem:[#allocation181_spill] sm:$0xff] %v6046_v55  ;;  %v6056_v2 = vsub.f32 %v4050_v57, %v5872_v30  ;;  %v6064_v21 = vmul.f32 0.0012755102, %v5528_v42  ;;  %1454 = vadd.xlane.f32.xlu0 %v1453_v52  ;;  %v1461_v20 = vsel %vm548_vm0, %v1211_v11, 0.0  ;;  %v6069_v8 = vsub.f32 %v4051_v54, %v5872_v30  ;;  %v4053_v52 = vld [vmem:[%s4573_s29 + $0x5d0] sm:$0xff] }
 0x1cc   : > { %7821 = vst [vmem:[#allocation182_spill] sm:$0xff] %v6052_v6  ;;  %v1460_v49 = vadd.f32 %v1459_v9, %v1210_v34  ;;  %v1216_v40 = vmul.f32 %v6028_v45, %v6028_v45  ;;  %v1218_v57 = vmul.f32 %v6034_v63, %v6034_v63  ;;  %v1466_v28 = vadd.f32 %v1465_v29, %v1214_v13  ;;  %v4054_v63 = vld [vmem:[%s4573_s29 + $0x5e0] sm:$0xff] }
 0x1cd   : > { %7822 = vst [vmem:[#allocation183_spill] sm:$0xff] %v6056_v2  ;;  %7824 = vst [vmem:[#allocation185_spill] sm:$0xff] %v6069_v8  ;;  %v6077_v42 = vsub.f32 %v4052_v17, %v5872_v30  ;;  %v6081_v11 = vsub.f32 %v4053_v52, %v5872_v30  ;;  %v1219_v34 = vmul.f32 %v6052_v6, %v6052_v6  ;;  %v6093_v52 = vpop.permute.xlu0 %2328 }
 0x1ce   : > { %v1220_v9 = vmul.f32 %v6056_v2, %v6056_v2  ;;  %v1462_v54 = vadd.f32 %v1461_v20, %v1460_v49  ;;  %v1217_v29 = vmul.f32 %v6046_v55, %v6046_v55  ;;  %v1467_v13 = vadd.f32 %v1466_v28, %v1215_v16  ;;  %7828 = vst [vmem:[#allocation189_spill] sm:$0xff] %v6093_v52  ;;  %v4056_v20 = vld [vmem:[%s4573_s29 + $0x5f0] sm:$0xff]  ;;  %v4057_v28 = vld [vmem:[%s4573_s29 + $0x5f8] sm:$0xff]  ;;  %v4058_v55 = vld [vmem:[%s4573_s29 + $0x600] sm:$0xff] }
 0x1cf   : > { %7825 = vst [vmem:[#allocation186_spill] sm:$0xff] %v6077_v42  ;;  %7826 = vst [vmem:[#allocation187_spill] sm:$0xff] %v6081_v11  ;;  %v6091_v17 = vsub.f32 %v4054_v63, %v5872_v30  ;;  %v1221_v6 = vmul.f32 %v6069_v8, %v6069_v8  ;;  %v6099_v2 = vsub.f32 %v4055_v0, %v6061_v18  ;;  %v1470_v63 = vsel %vm548_vm0, %v1218_v57, 0.0  ;;  %v6114_v0 = vpop.permute.xlu1 %2313  ;;  %v4060_v8 = vld [vmem:[%s4573_s29 + $0x608] sm:$0xff] }
 0x1d0   : > { %v1474_v45 = vadd.f32 %v1220_v9, %v1219_v34  ;;  %v6103_v49 = vsub.f32 %v4056_v20, %v6061_v18  ;;  %1463 = vadd.xlane.f32.xlu1 %v1462_v54  ;;  %v1468_v16 = vadd.f32 %v1467_v13, %v1216_v40  ;;  %v6108_v52 = vsub.f32 %v4057_v28, %v6061_v18  ;;  %v4059_v9 = vld [vmem:[%s4573_s29 + $0x5d8] sm:$0xff] }
 0x1d1   : > { %7827 = vst [vmem:[#allocation188_spill] sm:$0xff] %v6091_v17  ;;  %7829 = vst [vmem:[#allocation190_spill] sm:$0xff] %v6099_v2  ;;  %v6112_v34 = vsub.f32 %v4058_v55, %v6061_v18  ;;  %v6118_v20 = vsub.f32 %v4059_v9, %v5872_v30  ;;  %v1222_v40 = vmul.f32 %v6077_v42, %v6077_v42 }
 0x1d2   : > { %7830 = vst [vmem:[#allocation191_spill] sm:$0xff] %v6103_v49  ;;  %7831 = vst [vmem:[#allocation192_spill] sm:$0xff] %v6108_v52  ;;  %v1223_v57 = vmul.f32 %v6081_v11, %v6081_v11  ;;  %v1475_v54 = vadd.f32 %v1474_v45, %v1221_v6  ;;  %v1469_v13 = vadd.f32 %v1468_v16, %v1217_v29  ;;  %v4061_v6 = vld [vmem:[%s4573_s29 + $0x618] sm:$0xff] }
 0x1d3   : > { %7832 = vst [vmem:[#allocation193_spill] sm:$0xff] %v6112_v34  ;;  %7833 = vst [vmem:[#allocation194_spill] sm:$0xff] %v6114_v0  ;;  %v1226_v28 = vmul.f32 %v6099_v2, %v6099_v2  ;;  %v1227_v55 = vmul.f32 %v6103_v49, %v6103_v49  ;;  %v1228_v30 = vmul.f32 %v6108_v52, %v6108_v52  ;;  %v4062_v52 = vld [vmem:[%s4573_s29 + $0x620] sm:$0xff]  ;;  %v4063_v2 = vld [vmem:[%s4573_s29 + $0x628] sm:$0xff] }
 0x1d4   : > { %7834 = vst [vmem:[#allocation195_spill] sm:$0xff] %v6118_v20  ;;  %v1225_v9 = vmul.f32 %v6091_v17, %v6091_v17  ;;  %v1476_v42 = vadd.f32 %v1475_v54, %v1222_v40  ;;  %v6134_v11 = vsub.f32 %v4060_v8, %v6061_v18  ;;  %v6138_v45 = vsub.f32 %v4061_v6, %v6061_v18  ;;  %v6146_v40 = vpop.permute.xlu0 %2338 }
 0x1d5   : > { %v1471_v29 = vadd.f32 %v1470_v63, %v1469_v13  ;;  %v1229_v16 = vmul.f32 %v6112_v34, %v6112_v34  ;;  %v1483_v49 = vadd.f32 %v1227_v55, %v1226_v28  ;;  %v6144_v17 = vsub.f32 %v4062_v52, %v6064_v21  ;;  %7838 = vst [vmem:[#allocation199_spill] sm:$0xff] %v6146_v40  ;;  %v4064_v63 = vld [vmem:[%s4573_s29 + $0x630] sm:$0xff]  ;;  %v6162_v40 = vpop.permute.xlu1 %2323 }
 0x1d6   : > { %7835 = vst [vmem:[#allocation196_spill] sm:$0xff] %v6134_v11  ;;  %7836 = vst [vmem:[#allocation197_spill] sm:$0xff] %v6138_v45  ;;  %v1224_v8 = vmul.f32 %v6118_v20, %v6118_v20  ;;  %v1477_v54 = vadd.f32 %v1476_v42, %v1223_v57  ;;  %v6152_v6 = vsub.f32 %v4063_v2, %v6064_v21  ;;  %v4065_v28 = vld [vmem:[%s4573_s29 + $0x610] sm:$0xff]  ;;  %v4066_v42 = vld [vmem:[%s4573_s29 + $0x638] sm:$0xff] }
 0x1d7   : > { %7837 = vst [vmem:[#allocation198_spill] sm:$0xff] %v6144_v17  ;;  %v6156_v13 = vsub.f32 %v4064_v63, %v6064_v21  ;;  %1472 = vadd.xlane.f32.xlu0 %v1471_v29  ;;  %v6160_v52 = vsub.f32 %v4065_v28, %v6061_v18  ;;  %v1484_v55 = vadd.f32 %v1483_v49, %v1228_v30  ;;  %7842 = vst [vmem:[#allocation203_spill] sm:$0xff] %v6162_v40  ;;  %v4068_v20 = vld [vmem:[%s4573_s29 + $0x650] sm:$0xff] }
 0x1d8   : > { %7839 = vst [vmem:[#allocation200_spill] sm:$0xff] %v6152_v6  ;;  %v1478_v34 = vadd.f32 %v1477_v54, %v1224_v8  ;;  %v6166_v57 = vsub.f32 %v4066_v42, %v6064_v21  ;;  %v1233_v2 = vmul.f32 %v6144_v17, %v6144_v17  ;;  %v1234_v63 = vmul.f32 %v6152_v6, %v6152_v6  ;;  %v4067_v54 = vld [vmem:[%s4573_s29 + $0x640] sm:$0xff]  ;;  %v6189_v48 = vpop.permute.xlu0 %2348 }
 0x1d9   : > { %7840 = vst [vmem:[#allocation201_spill] sm:$0xff] %v6156_v13  ;;  %7841 = vst [vmem:[#allocation202_spill] sm:$0xff] %v6160_v52  ;;  %v1479_v29 = vsel %vm548_vm0, %v1225_v9, 0.0  ;;  %v1230_v18 = vmul.f32 %v6134_v11, %v6134_v11  ;;  %v1232_v49 = vmul.f32 %v6138_v45, %v6138_v45  ;;  %v1485_v30 = vadd.f32 %v1484_v55, %v1229_v16 }
 0x1da   : > { %7843 = vst [vmem:[#allocation204_spill] sm:$0xff] %v6166_v57  ;;  %v1480_v8 = vadd.f32 %v1479_v29, %v1478_v34  ;;  %v6179_v28 = vsub.f32 %v4067_v54, %v6064_v21  ;;  %v1235_v42 = vmul.f32 %v6156_v13, %v6156_v13  ;;  %v1492_v17 = vadd.f32 %v1234_v63, %v1233_v2  ;;  %v4069_v34 = vld [vmem:[%s4573_s29 + $0x648] sm:$0xff]  ;;  %v6197_v63 = vpop.permute.xlu1 %2333  ;;  %v2590_v13 = vld [vmem:[%s4591_s20 + $0x80] sm:$0xff] }
 0x1db   : > { %v1231_v6 = vmul.f32 %v6160_v52, %v6160_v52  ;;  %v1486_v9 = vadd.f32 %v1485_v30, %v1230_v18  ;;  %v6187_v11 = vsub.f32 %v4068_v20, %v6064_v21  ;;  %7846 = vst [vmem:[#allocation207_spill] sm:$0xff] %v6189_v48  ;;  %v6193_v16 = vsub.f32 %v4069_v34, %v6064_v21 }
 0x1dc   : > { %7844 = vst [vmem:[#allocation205_spill] sm:$0xff] %v6179_v28  ;;  %1481 = vadd.xlane.f32.xlu1 %v1480_v8  ;;  %v1236_v55 = vmul.f32 %v6166_v57, %v6166_v57  ;;  %v1493_v29 = vadd.f32 %v1492_v17, %v1235_v42  ;;  %7848 = vst [vmem:[#allocation209_spill] sm:$0xff] %v6197_v63  ;;  %v1488_v18 = vsel %vm548_vm0, %v1232_v49, 0.0  ;;  %v6206_v17 = vpop.permute.xlu0 %2358  ;;  %v2595_v63 = vld [vmem:[%s4591_s20 + $0xa8] sm:$0xff] }
 0x1dd   : > { %7845 = vst [vmem:[#allocation206_spill] sm:$0xff] %v6187_v11  ;;  %7847 = vst [vmem:[#allocation208_spill] sm:$0xff] %v6193_v16  ;;  %v1487_v2 = vadd.f32 %v1486_v9, %v1231_v6  ;;  %v1237_v20 = vmul.f32 %v6179_v28, %v6179_v28  ;;  %v1239_v8 = vmul.f32 %v6187_v11, %v6187_v11  ;;  %v2585_v28 = vld [vmem:[%s4591_s20 + $0x58] sm:$0xff] }
 0x1de   : > { %v1494_v30 = vadd.f32 %v1493_v29, %v1236_v55  ;;  %v1238_v21 = vmul.f32 %v6193_v16, %v6193_v16  ;;  %7849 = vst [vmem:[#allocation210_spill] sm:$0xff] %v6206_v17  ;;  %v6209_v42 = vpop.permute.xlu1 %2343  ;;  %v2586_v16 = vld [vmem:[%s4591_s20 + $0x60] sm:$0xff]  ;;  %v2589_v17 = vld [vmem:[%s4591_s20 + $0x78] sm:$0xff] }
 0x1df   : > { %v1489_v54 = vadd.f32 %v1488_v18, %v1487_v2  ;;  %v1497_v49 = vsel %vm548_vm0, %v1239_v8, 0.0  ;;  %7850 = vst [vmem:[#allocation211_spill] sm:$0xff] %v6209_v42 }
 0x1e0   : > { %v1495_v34 = vadd.f32 %v1494_v30, %v1237_v20  ;;  %v6211_v55 = vpop.permute.xlu0 %2368  ;;  %v2580_v30 = vld [vmem:[%s4591_s20 + $0x30] sm:$0xff] }
 0x1e1   : > { %1490 = vadd.xlane.f32.xlu0 %v1489_v54  ;;  %7851 = vst [vmem:[#allocation212_spill] sm:$0xff] %v6211_v55  ;;  %v2579_v54 = vld [vmem:[%s4591_s20 + $0x28] sm:$0xff] }
 0x1e2   : > { %v1496_v6 = vadd.f32 %v1495_v34, %v1238_v21  ;;  %v6213_v29 = vpop.permute.xlu1 %2353  ;;  %v2582_v34 = vld [vmem:[%s4591_s20 + $0x40] sm:$0xff]  ;;  %v2583_v55 = vld [vmem:[%s4591_s20 + $0x48] sm:$0xff] }
 0x1e3   : > { %7852 = vst [vmem:[#allocation213_spill] sm:$0xff] %v6213_v29  ;;  %v2593_v29 = vld [vmem:[%s4591_s20 + $0x98] sm:$0xff] }
 0x1e4   : > { %v1498_v9 = vadd.f32 %v1497_v49, %v1496_v6  ;;  %v6215_v2 = vpop.permute.xlu0 %2610  ;;  %v2581_v6 = vld [vmem:[%s4591_s20 + $0x38] sm:$0xff] }
 0x1e6   : > { %1499 = vadd.xlane.f32.xlu1 %v1498_v9  ;;  %v6217_v18 = vpop.permute.xlu1 %2363  ;;  %v2584_v9 = vld [vmem:[%s4591_s20 + $0x50] sm:$0xff] }
 0x1e7   : > { %7853 = vst [vmem:[#allocation214_spill] sm:$0xff] %v6217_v18  ;;  %v2592_v18 = vld [vmem:[%s4591_s20 + $0x90] sm:$0xff] }
 0x1e8   : > { %v6219_v20 = vpop.permute.xlu0 %2620 }
 0x1ea   : > { %v6223_v8 = vpop.permute.xlu1 %2605 }
 0x1ec   : > { %v1257_v21 = vpop.xlane.xlu0 %1256 }
 0x1ed   : > { %v1502_v48 = vmul.f32 0.0012755102, %v1257_v21 }
 0x1ee   : > { %v6227_v49 = vpop.permute.xlu1 %2615 }
 0x1ef   : > { %v1531_v52 = vadd.f32 1e-05, %v1502_v48 }
 0x1f0   : > { %v1275_v11 = vpop.xlane.xlu0 %1274 }
 0x1f1   : > { %v1504_v40 = vmul.f32 0.0012755102, %v1275_v11  ;;  %v2600_v11 = vld [vmem:[%s4591_s20 + $0xd0] sm:$0xff] }
 0x1f7   : > { %2635 = vperm.xlu1 %3808, %v2580_v30   ;;  %2630 = vperm.xlu0 %3807, %v2579_v54   ;;  %v6233_v30 = vpop.permute.xlu1 %2625  ;;  %v1293_v54 = vpop.xlane.xlu0 %1292 }
 0x1fb   : > { %2645 = vperm.xlu1 %3808, %v2582_v34   ;;  %2640 = vperm.xlu0 %3807, %v2581_v6   ;;  %v2588_v34 = vld [vmem:[%s4591_s20 + $0x70] sm:$0xff]  ;;  %v2587_v6 = vld [vmem:[%s4591_s20 + $0x68] sm:$0xff]  ;;  %v1248_v57 = vpop.xlane.xlu1 %1247 }
 0x1ff   : > { %2655 = vperm.xlu1 %3808, %v2584_v9   ;;  %2650 = vperm.xlu0 %3807, %v2583_v55   ;;  %v1501_v9 = vmul.f32 0.0012755102, %v1248_v57  ;;  %v6239_v55 = vpop.xlane.xlu0 %1310 }
 0x201   : > { %v1530_v45 = vadd.f32 1e-05, %v1501_v9 }
 0x203   : > { %2665 = vperm.xlu1 %3808, %v2586_v16   ;;  %2660 = vperm.xlu0 %3807, %v2585_v28   ;;  %v1266_v16 = vpop.xlane.xlu1 %1265  ;;  %v2591_v28 = vld [vmem:[%s4591_s20 + $0x88] sm:$0xff]  ;;  %3809 = vrsqrt.f32 %v1530_v45  ;;  %v1533_v45 = vadd.f32 1e-05, %v1504_v40 }
 0x204   : > { %v1503_v42 = vmul.f32 0.0012755102, %v1266_v16  ;;  %3811 = vrsqrt.f32 %v1531_v52  ;;  %v2597_v16 = vld [vmem:[%s4591_s20 + $0xb8] sm:$0xff] }
 0x206   : > { %v1532_v9 = vadd.f32 1e-05, %v1503_v42 }
 0x207   : > { %2675 = vperm.xlu1 %3808, %v2588_v34   ;;  %2670 = vperm.xlu0 %3807, %v2587_v6   ;;  %v1329_v34 = vpop.xlane.xlu0 %1328  ;;  %v2594_v6 = vld [vmem:[%s4591_s20 + $0xa0] sm:$0xff]  ;;  %v1284_v21 = vpop.xlane.xlu1 %1283 }
 0x208   : > { %v1510_v57 = vmul.f32 0.0012755102, %v1329_v34 }
 0x20b   : > { %2685 = vperm.xlu1 %3808, %v2590_v13   ;;  %2680 = vperm.xlu0 %3807, %v2589_v17   ;;  %v1539_v13 = vadd.f32 1e-05, %v1510_v57  ;;  %v2596_v17 = vld [vmem:[%s4591_s20 + $0xb0] sm:$0xff]  ;;  %v1302_v48 = vpop.xlane.xlu1 %1301 }
 0x20d   : > { %3813 = vrsqrt.f32 %v1539_v13  ;;  %v3810_v34 = vpop.eup %3809  ;;  %v1506_v13 = vmul.f32 0.0012755102, %v1293_v54  ;;  %v4072_v54 = vld [vmem:[%s4588_s23 + $0x48] sm:$0xff] }
 0x20e   : > { %3815 = vrsqrt.f32 %v1532_v9  ;;  %v3812_v42 = vpop.eup %3811  ;;  %v4071_v9 = vld [vmem:[%s4588_s23 + $0x8] sm:$0xff] }
 0x20f   : > { %2695 = vperm.xlu1 %3808, %v2592_v18   ;;  %2690 = vperm.xlu0 %3807, %v2591_v28   ;;  %v2598_v18 = vld [vmem:[%s4591_s20 + $0xc0] sm:$0xff]  ;;  %v1505_v28 = vmul.f32 0.0012755102, %v1284_v21  ;;  %3817 = vrsqrt.f32 %v1533_v45  ;;  %v4070_v21 = vld [vmem:[%s4588_s23] sm:$0xff]  ;;  %v1618_v10 = vmul.f32 %v4071_v9, %v3812_v42  ;;  %v4074_v9 = vld [vmem:[%s4588_s23 + $0x18] sm:$0xff] }
 0x210   : > { %v1617_v40 = vmul.f32 %v4070_v21, %v3810_v34 }
 0x211   : > { %v1534_v57 = vadd.f32 1e-05, %v1505_v28 }
 0x212   : > { %v1347_v52 = vpop.xlane.xlu0 %1346 }
 0x213   : > { %2705 = vperm.xlu1 %3808, %v2594_v6   ;;  %2700 = vperm.xlu0 %3807, %v2593_v29   ;;  %v1512_v29 = vmul.f32 0.0012755102, %v1347_v52  ;;  %v2599_v6 = vld [vmem:[%s4591_s20 + $0xc8] sm:$0xff]  ;;  %v1535_v52 = vadd.f32 1e-05, %v1506_v13 }
 0x217   : > { %2715 = vperm.xlu1 %3808, %v2596_v17   ;;  %2710 = vperm.xlu0 %3807, %v2595_v63   ;;  %v1320_v63 = vpop.xlane.xlu1 %1319  ;;  %v1541_v17 = vadd.f32 1e-05, %v1512_v29 }
 0x219   : > { %3819 = vrsqrt.f32 %v1541_v17 }
 0x21a   : > { %3821 = vrsqrt.f32 %v1534_v57  ;;  %v1509_v57 = vmul.f32 0.0012755102, %v1320_v63 }
 0x21b   : > { %2725 = vperm.xlu1 %3808, %v2598_v18   ;;  %2720 = vperm.xlu0 %3807, %v2597_v16   ;;  %v3814_v18 = vpop.eup %3813  ;;  %v1507_v16 = vmul.f32 0.0012755102, %v1302_v48  ;;  %v1338_v28 = vpop.xlane.xlu1 %1337  ;;  %3823 = vrsqrt.f32 %v1535_v52 }
 0x21c   : > { %v3816_v0 = vpop.eup %3815  ;;  %v1626_v45 = vmul.f32 %v4072_v54, %v3814_v18  ;;  %v1511_v54 = vmul.f32 0.0012755102, %v1338_v28 }
 0x21d   : > { %v1536_v29 = vadd.f32 1e-05, %v1507_v16  ;;  %v1365_v34 = vpop.xlane.xlu0 %1364  ;;  %v3818_v21 = vpop.eup %3817 }
 0x21e   : > { %v1514_v17 = vmul.f32 0.0012755102, %v1365_v34  ;;  %v1620_v18 = vmul.f32 %v4074_v9, %v3818_v21  ;;  %v4076_v34 = vld [vmem:[%s4588_s23 + $0x20] sm:$0xff]  ;;  %v4077_v21 = vld [vmem:[%s4588_s23 + $0x28] sm:$0xff] }
 0x21f   : > { %2735 = vperm.xlu1 %3808, %v2600_v11   ;;  %2730 = vperm.xlu0 %3807, %v2599_v6   ;;  %v1508_v11 = vmul.f32 0.0012755102, %v6239_v55  ;;  %v4073_v6 = vld [vmem:[%s4588_s23 + $0x10] sm:$0xff]  ;;  %3825 = vrsqrt.f32 %v1536_v29  ;;  %v4075_v55 = vld [vmem:[%s4588_s23 + $0x58] sm:$0xff] }
 0x220   : > { %v1619_v42 = vmul.f32 %v4073_v6, %v3816_v0  ;;  %v1543_v48 = vadd.f32 1e-05, %v1514_v17  ;;  %v1538_v0 = vadd.f32 1e-05, %v1509_v57  ;;  %v1540_v6 = vadd.f32 1e-05, %v1511_v54 }
 0x222   : > { %3827 = vrsqrt.f32 %v1543_v48 }
 0x223   : > { %1851 = vperm.xlu0 %3807, %v1617_v40   ;;  %1856 = vperm.xlu1 %3808, %v1618_v10   ;;  %v1537_v10 = vadd.f32 1e-05, %v1508_v11  ;;  %v3820_v13 = vpop.eup %3819  ;;  %v1356_v40 = vpop.xlane.xlu1 %1355 }
 0x224   : > { %v3822_v16 = vpop.eup %3821  ;;  %v1628_v52 = vmul.f32 %v4075_v55, %v3820_v13 }
 0x225   : > { %3829 = vrsqrt.f32 %v1537_v10  ;;  %v3824_v29 = vpop.eup %3823 }
 0x226   : > { %3831 = vrsqrt.f32 %v1538_v0  ;;  %v1622_v48 = vmul.f32 %v4077_v21, %v3824_v29 }
 0x227   : > { %1861 = vperm.xlu1 %3808, %v1619_v42   ;;  %1896 = vperm.xlu0 %3807, %v1626_v45   ;;  %v1621_v45 = vmul.f32 %v4076_v34, %v3822_v16  ;;  %v1374_v63 = vpop.xlane.xlu1 %1373  ;;  %v1513_v42 = vmul.f32 0.0012755102, %v1356_v40  ;;  %3833 = vrsqrt.f32 %v1540_v6 }
 0x228   : > { %v1515_v10 = vmul.f32 0.0012755102, %v1374_v63 }
 0x229   : > { %v1383_v11 = vpop.xlane.xlu0 %1382  ;;  %v3826_v13 = vpop.eup %3825  ;;  %v1542_v57 = vadd.f32 1e-05, %v1513_v42 }
 0x22a   : > { %v1516_v17 = vmul.f32 0.0012755102, %v1383_v11  ;;  %v1544_v40 = vadd.f32 1e-05, %v1515_v10 }
 0x22b   : > { %1866 = vperm.xlu1 %3808, %v1620_v18   ;;  %1906 = vperm.xlu0 %3807, %v1628_v52   ;;  %v4078_v18 = vld [vmem:[%s4588_s23 + $0x68] sm:$0xff]  ;;  %v4079_v52 = vld [vmem:[%s4588_s23 + $0x30] sm:$0xff] }
 0x22c   : > { %v1545_v28 = vadd.f32 1e-05, %v1516_v17  ;;  %v3828_v9 = vpop.eup %3827  ;;  %v1623_v54 = vmul.f32 %v4079_v52, %v3826_v13 }
 0x22d   : > { %v1630_v16 = vmul.f32 %v4078_v18, %v3828_v9 }
 0x22e   : > { %3835 = vrsqrt.f32 %v1545_v28  ;;  %v1392_v55 = vpop.xlane.xlu1 %1391 }
 0x22f   : > { %1871 = vperm.xlu1 %3808, %v1621_v45   ;;  %v3830_v0 = vpop.eup %3829  ;;  %1916 = vperm.xlu0 %3807, %v1630_v16   ;;  %3837 = vrsqrt.f32 %v1542_v57  ;;  %v1517_v34 = vmul.f32 0.0012755102, %v1392_v55  ;;  %v4080_v45 = vld [vmem:[%s4588_s23 + $0x38] sm:$0xff]  ;;  %v4083_v16 = vld [vmem:[%s4588_s23 + $0x50] sm:$0xff] }
 0x230   : > { %v1624_v29 = vmul.f32 %v4080_v45, %v3830_v0  ;;  %v3832_v6 = vpop.eup %3831  ;;  %3839 = vrsqrt.f32 %v1544_v40  ;;  %v4082_v57 = vld [vmem:[%s4588_s23 + $0x78] sm:$0xff] }
 0x231   : > { %v1546_v63 = vadd.f32 1e-05, %v1517_v34  ;;  %v3834_v17 = vpop.eup %3833  ;;  %v4084_v34 = vld [vmem:[%s4588_s23 + $0x60] sm:$0xff] }
 0x232   : > { %v1627_v55 = vmul.f32 %v4083_v16, %v3834_v17 }
 0x233   : > { %1876 = vperm.xlu1 %3808, %v1622_v48   ;;  %v4081_v48 = vld [vmem:[%s4588_s23 + $0x40] sm:$0xff] }
 0x234   : > { %v1625_v13 = vmul.f32 %v4081_v48, %v3832_v6 }
 0x235   : > { %v1401_v11 = vpop.xlane.xlu0 %1400 }
 0x236   : > { %v1518_v42 = vmul.f32 0.0012755102, %v1401_v11 }
 0x237   : > { %1881 = vperm.xlu1 %3808, %v1623_v54  }
 0x238   : > { %v1547_v21 = vadd.f32 1e-05, %v1518_v42  ;;  %v3836_v28 = vpop.eup %3835 }
 0x239   : > { %v1632_v10 = vmul.f32 %v4082_v57, %v3836_v28  ;;  %v3838_v52 = vpop.eup %3837  ;;  %v4087_v57 = vld [vmem:[%s4588_s23 + $0x80] sm:$0xff] }
 0x23a   : > { %3841 = vrsqrt.f32 %v1547_v21  ;;  %v1629_v45 = vmul.f32 %v4084_v34, %v3838_v52  ;;  %v4088_v52 = vld [vmem:[%s4588_s23 + $0x90] sm:$0xff] }
 0x23b   : > { %1886 = vperm.xlu1 %3808, %v1624_v29   ;;  %v1410_v9 = vpop.xlane.xlu1 %1409  ;;  %3843 = vrsqrt.f32 %v1546_v63  ;;  %1926 = vperm.xlu0 %3807, %v1632_v10   ;;  %v3840_v29 = vpop.eup %3839  ;;  %v4085_v63 = vld [vmem:[%s4588_s23 + $0x70] sm:$0xff] }
 0x23c   : > { %v1519_v18 = vmul.f32 0.0012755102, %v1410_v9  ;;  %v1631_v21 = vmul.f32 %v4085_v63, %v3840_v29 }
 0x23e   : > { %v1548_v54 = vadd.f32 1e-05, %v1519_v18 }
 0x23f   : > { %1891 = vperm.xlu1 %3808, %v1625_v13   ;;  %v4086_v13 = vld [vmem:[%s4588_s23 + $0x88] sm:$0xff] }
 0x240   : > { %3845 = vrsqrt.f32 %v1548_v54  ;;  %v1419_v0 = vpop.xlane.xlu0 %1418 }
 0x241   : > { %v1520_v40 = vmul.f32 0.0012755102, %v1419_v0 }
 0x243   : > { %1901 = vperm.xlu1 %3808, %v1627_v55   ;;  %v1549_v6 = vadd.f32 1e-05, %v1520_v40 }
 0x244   : > { %v3842_v11 = vpop.eup %3841 }
 0x245   : > { %3847 = vrsqrt.f32 %v1549_v6  ;;  %v3844_v17 = vpop.eup %3843  ;;  %v1634_v28 = vmul.f32 %v4086_v13, %v3842_v11 }
 0x246   : > { %v1428_v42 = vpop.xlane.xlu1 %1427  ;;  %v1633_v10 = vmul.f32 %v4087_v57, %v3844_v17 }
 0x247   : > { %1911 = vperm.xlu1 %3808, %v1629_v45   ;;  %v1521_v48 = vmul.f32 0.0012755102, %v1428_v42  ;;  %1936 = vperm.xlu0 %3807, %v1634_v28   ;;  %v4089_v45 = vld [vmem:[%s4588_s23 + $0x98] sm:$0xff] }
 0x249   : > { %v1550_v9 = vadd.f32 1e-05, %v1521_v48 }
 0x24a   : > { %v3846_v18 = vpop.eup %3845 }
 0x24b   : > { %1921 = vperm.xlu1 %3808, %v1631_v21   ;;  %3849 = vrsqrt.f32 %v1550_v9  ;;  %v1635_v54 = vmul.f32 %v4088_v52, %v3846_v18  ;;  %v4090_v21 = vld [vmem:[%s4588_s23 + $0xa0] sm:$0xff] }
 0x24d   : > { %v1437_v16 = vpop.xlane.xlu0 %1436 }
 0x24e   : > { %v1522_v55 = vmul.f32 0.0012755102, %v1437_v16 }
 0x24f   : > { %1931 = vperm.xlu1 %3808, %v1633_v10   ;;  %v3848_v40 = vpop.eup %3847  ;;  %v4091_v10 = vld [vmem:[%s4588_s23 + $0xa8] sm:$0xff] }
 0x250   : > { %v1551_v0 = vadd.f32 1e-05, %v1522_v55  ;;  %v1636_v29 = vmul.f32 %v4089_v45, %v3848_v40 }
 0x252   : > { %v1446_v34 = vpop.xlane.xlu1 %1445  ;;  %3851 = vrsqrt.f32 %v1551_v0  ;;  %1946 = vperm.xlu0 %3807, %v1636_v29  }
 0x253   : > { %1941 = vperm.xlu1 %3808, %v1635_v54   ;;  %v1523_v6 = vmul.f32 0.0012755102, %v1446_v34  ;;  %v4092_v54 = vld [vmem:[%s4588_s23 + $0xb0] sm:$0xff] }
 0x255   : > { %v1552_v11 = vadd.f32 1e-05, %v1523_v6  ;;  %v3850_v42 = vpop.eup %3849  ;;  %v4093_v6 = vld [vmem:[%s4588_s23 + $0xb8] sm:$0xff] }
 0x256   : > { %v1637_v17 = vmul.f32 %v4090_v21, %v3850_v42 }
 0x257   : > { %3853 = vrsqrt.f32 %v1552_v11 }
 0x258   : > { %v1455_v63 = vpop.xlane.xlu0 %1454  ;;  %1951 = vperm.xlu1 %3808, %v1637_v17  }
 0x259   : > { %v1524_v48 = vmul.f32 0.0012755102, %v1455_v63 }
 0x25b   : > { %v1553_v13 = vadd.f32 1e-05, %v1524_v48  ;;  %v4094_v48 = vld [vmem:[%s4588_s23 + $0xc0] sm:$0xff] }
 0x25c   : > { %v3852_v28 = vpop.eup %3851 }
 0x25d   : > { %v1464_v9 = vpop.xlane.xlu1 %1463  ;;  %3855 = vrsqrt.f32 %v1553_v13  ;;  %v1638_v18 = vmul.f32 %v4091_v10, %v3852_v28 }
 0x25e   : > { %v1525_v57 = vmul.f32 0.0012755102, %v1464_v9 }
 0x25f   : > { %1956 = vperm.xlu0 %3807, %v1638_v18  }
 0x260   : > { %v1554_v16 = vadd.f32 1e-05, %v1525_v57 }
 0x261   : > { %v3854_v55 = vpop.eup %3853 }
 0x262   : > { %3857 = vrsqrt.f32 %v1554_v16  ;;  %v1639_v0 = vmul.f32 %v4092_v54, %v3854_v55  ;;  %v4095_v16 = vld [vmem:[%s4588_s23 + $0xc8] sm:$0xff] }
 0x264   : > { %v1473_v52 = vpop.xlane.xlu0 %1472  ;;  %1961 = vperm.xlu1 %3808, %v1639_v0  }
 0x265   : > { %v1526_v40 = vmul.f32 0.0012755102, %v1473_v52 }
 0x267   : > { %v1555_v34 = vadd.f32 1e-05, %v1526_v40  ;;  %v3856_v45 = vpop.eup %3855 }
 0x268   : > { %v1640_v11 = vmul.f32 %v4093_v6, %v3856_v45 }
 0x269   : > { %v1482_v29 = vpop.xlane.xlu1 %1481  ;;  %3859 = vrsqrt.f32 %v1555_v34  ;;  %v4096_v34 = vld [vmem:[%s4588_s23 + $0xd0] sm:$0xff] }
 0x26a   : > { %v1527_v42 = vmul.f32 0.0012755102, %v1482_v29  ;;  %1966 = vperm.xlu0 %3807, %v1640_v11  }
 0x26c   : > { %v1556_v63 = vadd.f32 1e-05, %v1527_v42  ;;  %v3858_v21 = vpop.eup %3857 }
 0x26d   : > { %v1641_v13 = vmul.f32 %v4094_v48, %v3858_v21  ;;  %v2601_v48 = vld [vmem:[%s4591_s20 + $0xd8] sm:$0xff] }
 0x26e   : > { %3861 = vrsqrt.f32 %v1556_v63  ;;  %v1491_v17 = vpop.xlane.xlu0 %1490  ;;  %v4097_v63 = vld [vmem:[%s4588_s23 + $0xd8] sm:$0xff] }
 0x26f   : > { %v1528_v28 = vmul.f32 0.0012755102, %v1491_v17  ;;  %1971 = vperm.xlu1 %3808, %v1641_v13  }
 0x271   : > { %v1557_v9 = vadd.f32 1e-05, %v1528_v28 }
 0x273   : > { %v3860_v57 = vpop.eup %3859  ;;  %v1500_v10 = vpop.xlane.xlu1 %1499  ;;  %3863 = vrsqrt.f32 %v1557_v9 }
 0x274   : > { %v1529_v18 = vmul.f32 0.0012755102, %v1500_v10  ;;  %v1642_v55 = vmul.f32 %v4095_v16, %v3860_v57  ;;  %v4098_v57 = vld [vmem:[%s4588_s23 + $0xe0] sm:$0xff]  ;;  %v2602_v16 = vld [vmem:[%s4591_s20 + $0xe0] sm:$0xff] }
 0x276   : > { %v1558_v52 = vadd.f32 1e-05, %v1529_v18  ;;  %v6278_v54 = vpop.permute.xlu0 %2630  ;;  %1976 = vperm.xlu0 %3807, %v1642_v55  }
 0x277   : > { %v6280_v0 = vpop.permute.xlu1 %2635 }
 0x278   : > { %v3862_v40 = vpop.eup %3861  ;;  %3865 = vrsqrt.f32 %v1558_v52 }
 0x279   : > { %v1643_v45 = vmul.f32 %v4096_v34, %v3862_v40 }
 0x27a   : > { %v6283_v29 = vpop.permute.xlu0 %2640 }
 0x27b   : > { %7854 = vst [vmem:[#allocation215_spill] sm:$0xff] %v6283_v29  ;;  %v6285_v6 = vpop.permute.xlu1 %2645  ;;  %1981 = vperm.xlu1 %3808, %v1643_v45  }
 0x27c   : > { %7855 = vst [vmem:[#allocation216_spill] sm:$0xff] %v6285_v6 }
 0x27d   : > { %v3864_v11 = vpop.eup %3863 }
 0x27e   : > { %v6287_v42 = vpop.permute.xlu0 %2650  ;;  %v1644_v21 = vmul.f32 %v4097_v63, %v3864_v11 }
 0x27f   : > { %v6290_v17 = vpop.permute.xlu1 %2655 }
 0x280   : > { %7856 = vst [vmem:[#allocation217_spill] sm:$0xff] %v6290_v17  ;;  %1986 = vperm.xlu0 %3807, %v1644_v21  }
 0x282   : > { %v3866_v13 = vpop.eup %3865  ;;  %v6293_v28 = vpop.permute.xlu0 %2660 }
 0x283   : > { %7857 = vst [vmem:[#allocation218_spill] sm:$0xff] %v6293_v28  ;;  %v6295_v9 = vpop.permute.xlu1 %2665  ;;  %v1645_v10 = vmul.f32 %v4098_v57, %v3866_v13 }
 0x284   : > { %7858 = vst [vmem:[#allocation219_spill] sm:$0xff] %v6295_v9  ;;  %2740 = vperm.xlu0 %3807, %v2601_v48   ;;  %v1647_v9 = vld [vmem:[%s4581_s1 + $0x8] sm:$0xff] }
 0x285   : > { %1991 = vperm.xlu1 %3808, %v1645_v10  }
 0x286   : > { %v6298_v18 = vpop.permute.xlu0 %2670 }
 0x287   : > { %7859 = vst [vmem:[#allocation220_spill] sm:$0xff] %v6298_v18  ;;  %v6301_v55 = vpop.permute.xlu1 %2675 }
 0x288   : > { %7860 = vst [vmem:[#allocation221_spill] sm:$0xff] %v6301_v55 }
 0x289   : > { %2745 = vperm.xlu1 %3808, %v2602_v16  }
 0x28a   : > { %v6303_v52 = vpop.permute.xlu0 %2680 }
 0x28b   : > { %7861 = vst [vmem:[#allocation222_spill] sm:$0xff] %v6303_v52  ;;  %v6305_v40 = vpop.permute.xlu1 %2685 }
 0x28c   : > { %7862 = vst [vmem:[#allocation223_spill] sm:$0xff] %v6305_v40 }
 0x28e   : > { %v6307_v34 = vpop.permute.xlu0 %2690 }
 0x28f   : > { %7863 = vst [vmem:[#allocation224_spill] sm:$0xff] %v6307_v34  ;;  %v6309_v45 = vpop.permute.xlu1 %2695  ;;  %v1649_v34 = vld [vmem:[%s4581_s1 + $0x18] sm:$0xff] }
 0x290   : > { %7864 = vst [vmem:[#allocation225_spill] sm:$0xff] %v6309_v45 }
 0x292   : > { %v6311_v11 = vpop.permute.xlu0 %2700 }
 0x293   : > { %7865 = vst [vmem:[#allocation226_spill] sm:$0xff] %v6311_v11  ;;  %v6313_v63 = vpop.permute.xlu1 %2705 }
 0x294   : > { %7866 = vst [vmem:[#allocation227_spill] sm:$0xff] %v6313_v63 }
 0x296   : > { %v6315_v21 = vpop.permute.xlu0 %2710 }
 0x297   : > { %7867 = vst [vmem:[#allocation228_spill] sm:$0xff] %v6315_v21  ;;  %v6317_v48 = vpop.permute.xlu1 %2715 }
 0x298   : > { %7868 = vst [vmem:[#allocation229_spill] sm:$0xff] %v6317_v48 }
 0x29a   : > { %v6319_v13 = vpop.permute.xlu0 %2720 }
 0x29b   : > { %7869 = vst [vmem:[#allocation230_spill] sm:$0xff] %v6319_v13  ;;  %v6321_v57 = vpop.permute.xlu1 %2725 }
 0x29c   : > { %7870 = vst [vmem:[#allocation231_spill] sm:$0xff] %v6321_v57 }
 0x29e   : > { %v6323_v10 = vpop.permute.xlu0 %2730 }
 0x29f   : > { %7871 = vst [vmem:[#allocation232_spill] sm:$0xff] %v6323_v10  ;;  %v6325_v16 = vpop.permute.xlu1 %2735 }
 0x2a0   : > { %7872 = vst [vmem:[#allocation233_spill] sm:$0xff] %v6325_v16 }
 0x2a2   : > { %v1852_v40 = vpop.permute.xlu0 %1851 }
 0x2a3   : > { %v1994_v45 = vmul.f32 %v1852_v40, %v4869_v31  ;;  %v1995_v63 = vmul.f32 %v1852_v40, %v4872_v33  ;;  %v1996_v21 = vmul.f32 %v1852_v40, %v4875_v35  ;;  %v1997_v48 = vmul.f32 %v1852_v40, %v4881_v39  ;;  %v1857_v55 = vpop.permute.xlu1 %1856  ;;  %v1646_v31 = vld [vmem:[%s4581_s1] sm:$0xff] }
 0x2a4   : > { %v1998_v13 = vmul.f32 %v1852_v40, %v4890_v46  ;;  %v1999_v57 = vmul.f32 %v1852_v40, %v4900_v53  ;;  %v2000_v16 = vmul.f32 %v1852_v40, %v4884_v41  ;;  %v2001_v10 = vmul.f32 %v1857_v55, %v4932_v12  ;;  %v1648_v46 = vld [vmem:[%s4581_s1 + $0x10] sm:$0xff]  ;;  %v1650_v40 = vld [vmem:[%s4581_s1 + $0x20] sm:$0xff] }
 0x2a5   : > { %v2371_v11 = vadd.f32 %v5563_v22, %v1994_v45  ;;  %v2372_v33 = vadd.f32 %v5563_v22, %v1995_v63  ;;  %v2373_v35 = vadd.f32 %v5563_v22, %v1996_v21  ;;  %v2374_v39 = vadd.f32 %v5563_v22, %v1997_v48  ;;  %v1652_v45 = vld [vmem:[%s4581_s1 + $0x30] sm:$0xff] }
 0x2a6   : > { %v2375_v53 = vadd.f32 %v5563_v22, %v1998_v13  ;;  %v2376_v17 = vadd.f32 %v5563_v22, %v1999_v57  ;;  %v2377_v41 = vadd.f32 %v5563_v22, %v2000_v16  ;;  %v2002_v12 = vmul.f32 %v1857_v55, %v4935_v14 }
 0x2a7   : > { %v2748_v63 = vadd.f32 %v6223_v8, %v2371_v11  ;;  %v2749_v21 = vadd.f32 %v6223_v8, %v2372_v33  ;;  %v2750_v48 = vadd.f32 %v6223_v8, %v2373_v35  ;;  %v2751_v52 = vadd.f32 %v6223_v8, %v2374_v39  ;;  %v1862_v28 = vpop.permute.xlu1 %1861 }
 0x2a8   : > { %v2752_v38 = vadd.f32 %v6223_v8, %v2375_v53  ;;  %v2753_v13 = vadd.f32 %v6223_v8, %v2376_v17  ;;  %v2754_v57 = vadd.f32 %v6223_v8, %v2377_v41  ;;  %v2003_v22 = vmul.f32 %v1857_v55, %v4940_v19  ;;  %v1658_v41 = vld [vmem:[%s4581_s1 + $0x60] sm:$0xff] }
 0x2a9   : > { %v2951_v14 = vadd.f32 %v2748_v63, %v1646_v31  ;;  %v2952_v16 = vadd.f32 %v2749_v21, %v1647_v9  ;;  %v2953_v6 = vadd.f32 %v2750_v48, %v1648_v46  ;;  %v2954_v18 = vadd.f32 %v2751_v52, %v1649_v34  ;;  %v1657_v52 = vld [vmem:[%s4581_s1 + $0x58] sm:$0xff] }
 0x2aa   : > { %v2955_v11 = vadd.f32 %v2752_v38, %v1650_v40  ;;  %v2956_v15 = vadd.f32 %v2753_v13, %v1651_v23  ;;  %v2957_v33 = vadd.f32 %v2754_v57, %v1652_v45  ;;  %v2004_v35 = vmul.f32 %v1857_v55, %v4946_v24 }
 0x2ab   : > { %v3154_v29 = vmax.f32 %v2951_v14, 0.0  ;;  %v3155_v39 = vmax.f32 %v2952_v16, 0.0  ;;  %v3156_v4 = vmax.f32 %v2953_v6, 0.0  ;;  %v3157_v53 = vmax.f32 %v2954_v18, 0.0  ;;  %v1655_v18 = vld [vmem:[%s4581_s1 + $0x48] sm:$0xff] }
 0x2ac   : > { %v3158_v17 = vmax.f32 %v2955_v11, 0.0  ;;  %v3159_v8 = vmax.f32 %v2956_v15, 0.0  ;;  %v3160_v19 = vmax.f32 %v2957_v33, 0.0  ;;  %v2005_v9 = vmul.f32 %v1857_v55, %v4960_v44  ;;  %v1653_v15 = vld [vmem:[%s4581_s1 + $0x38] sm:$0xff] }
 0x2ad   : > { %3357 = vst [vmem:[%s6361_s25] sm:$0xff] %v3154_v29  ;;  %3358 = vst [vmem:[%s6361_s25 + $0x8] sm:$0xff] %v3155_v39  ;;  %v2006_v24 = vmul.f32 %v1857_v55, %v4963_v47  ;;  %v2007_v44 = vmul.f32 %v1857_v55, %v4951_v32  ;;  %v2378_v23 = vadd.f32 %v5677_v51, %v2001_v10  ;;  %v1654_v29 = vld [vmem:[%s4581_s1 + $0x40] sm:$0xff]  ;;  %v1656_v55 = vld [vmem:[%s4581_s1 + $0x50] sm:$0xff] }
 0x2ae   : > { %3359 = vst [vmem:[%s6361_s25 + $0x10] sm:$0xff] %v3156_v4  ;;  %3360 = vst [vmem:[%s6361_s25 + $0x18] sm:$0xff] %v3157_v53  ;;  %v2379_v38 = vadd.f32 %v5677_v51, %v2002_v12  ;;  %v2380_v4 = vadd.f32 %v5677_v51, %v2003_v22  ;;  %v2381_v6 = vadd.f32 %v5677_v51, %v2004_v35  ;;  %v1659_v12 = vld [vmem:[%s4581_s1 + $0x68] sm:$0xff] }
 0x2af   : > { %3361 = vst [vmem:[%s6361_s25 + $0x20] sm:$0xff] %v3158_v17  ;;  %3362 = vst [vmem:[%s6361_s25 + $0x28] sm:$0xff] %v3159_v8  ;;  %v2382_v47 = vadd.f32 %v5677_v51, %v2005_v9  ;;  %v2008_v32 = vmul.f32 %v1862_v28, %v4862_v25  ;;  %v2383_v34 = vadd.f32 %v5677_v51, %v2006_v24  ;;  %v1867_v8 = vpop.permute.xlu1 %1866 }
 0x2b0   : > { %3363 = vst.msk [vmem:[%s6361_s25 + $0x30] sm:$0xff] %vm548_vm0, %v3160_v19  ;;  %v2384_v10 = vadd.f32 %v5677_v51, %v2007_v44  ;;  %v2755_v31 = vadd.f32 %v6215_v2, %v2378_v23  ;;  %v2756_v46 = vadd.f32 %v6215_v2, %v2379_v38  ;;  %v2757_v40 = vadd.f32 %v6215_v2, %v2380_v4 }
 0x2b1   : > { %v2758_v45 = vadd.f32 %v6215_v2, %v2381_v6  ;;  %v2759_v63 = vadd.f32 %v6215_v2, %v2382_v47  ;;  %v2009_v25 = vmul.f32 %v1862_v28, %v4865_v27  ;;  %v2760_v21 = vadd.f32 %v6215_v2, %v2383_v34  ;;  %v1664_v47 = vld [vmem:[%s4581_s1 + $0x90] sm:$0xff] }
 0x2b2   : > { %v2761_v48 = vadd.f32 %v6215_v2, %v2384_v10  ;;  %v2958_v13 = vadd.f32 %v2755_v31, %v1653_v15  ;;  %v2959_v51 = vadd.f32 %v2756_v46, %v1654_v29  ;;  %v2960_v57 = vadd.f32 %v2757_v40, %v1655_v18  ;;  %v1662_v15 = vld [vmem:[%s4581_s1 + $0x80] sm:$0xff] }
 0x2b3   : > { %v2961_v22 = vadd.f32 %v2758_v45, %v1656_v55  ;;  %v2962_v14 = vadd.f32 %v2759_v63, %v1657_v52  ;;  %v2010_v16 = vmul.f32 %v1862_v28, %v4878_v37  ;;  %v2963_v11 = vadd.f32 %v2760_v21, %v1658_v41  ;;  %v1666_v10 = vld [vmem:[%s4581_s1 + $0xa0] sm:$0xff] }
 0x2b4   : > { %v2964_v33 = vadd.f32 %v2761_v48, %v1659_v12  ;;  %v3161_v35 = vmax.f32 %v2958_v13, 0.0  ;;  %v3162_v27 = vmax.f32 %v2959_v51, 0.0  ;;  %v3163_v39 = vmax.f32 %v2960_v57, 0.0 }
 0x2b5   : > { %v3164_v53 = vmax.f32 %v2961_v22, 0.0  ;;  %v3165_v17 = vmax.f32 %v2962_v14, 0.0  ;;  %v2011_v2 = vmul.f32 %v1862_v28, %v4887_v43  ;;  %v3166_v19 = vmax.f32 %v2963_v11, 0.0  ;;  %v1872_v11 = vpop.permute.xlu1 %1871 }
 0x2b6   : > { %v3167_v9 = vmax.f32 %v2964_v33, 0.0  ;;  %3364 = vst [vmem:[%s6361_s25 + $0x38] sm:$0xff] %v3161_v35  ;;  %3365 = vst [vmem:[%s6361_s25 + $0x40] sm:$0xff] %v3162_v27  ;;  %v2012_v37 = vmul.f32 %v1862_v28, %v4897_v50  ;;  %v2013_v24 = vmul.f32 %v1862_v28, %v4921_v3  ;;  %v2014_v43 = vmul.f32 %v1862_v28, %v4905_v56  ;;  %v1660_v50 = vld [vmem:[%s4581_s1 + $0x70] sm:$0xff]  ;;  %v1661_v3 = vld [vmem:[%s4581_s1 + $0x78] sm:$0xff] }
 0x2b7   : > { %3366 = vst [vmem:[%s6361_s25 + $0x48] sm:$0xff] %v3163_v39  ;;  %3367 = vst [vmem:[%s6361_s25 + $0x50] sm:$0xff] %v3164_v53  ;;  %v2385_v44 = vadd.f32 %v5616_v7, %v2008_v32  ;;  %v2386_v23 = vadd.f32 %v5616_v7, %v2009_v25  ;;  %v2387_v38 = vadd.f32 %v5616_v7, %v2010_v16  ;;  %v1663_v28 = vld [vmem:[%s4581_s1 + $0x88] sm:$0xff]  ;;  %v1665_v32 = vld [vmem:[%s4581_s1 + $0x98] sm:$0xff] }
 0x2b8   : > { %3368 = vst [vmem:[%s6361_s25 + $0x58] sm:$0xff] %v3165_v17  ;;  %3369 = vst [vmem:[%s6361_s25 + $0x60] sm:$0xff] %v3166_v19  ;;  %v2388_v29 = vadd.f32 %v5616_v7, %v2011_v2  ;;  %v2389_v4 = vadd.f32 %v5616_v7, %v2012_v37  ;;  %v2390_v6 = vadd.f32 %v5616_v7, %v2013_v24  ;;  %v7873_v35 = vld [vmem:[#allocation17_spill] sm:$0xff]  ;;  %v7874_v39 = vld [vmem:[#allocation16_spill] sm:$0xff] }
 0x2b9   : > { %3370 = vst.msk [vmem:[%s6361_s25 + $0x68] sm:$0xff] %vm548_vm0, %v3167_v9  ;;  %v2015_v56 = vmul.f32 %v1867_v8, %v4970_v58  ;;  %v2391_v18 = vadd.f32 %v5616_v7, %v2014_v43  ;;  %v2762_v55 = vadd.f32 %v6227_v49, %v2385_v44  ;;  %v2763_v52 = vadd.f32 %v6227_v49, %v2386_v23  ;;  %v1669_v37 = vld [vmem:[%s4581_s1 + $0xb8] sm:$0xff] }
 0x2ba   : > { %v2764_v34 = vadd.f32 %v6227_v49, %v2387_v38  ;;  %v2765_v31 = vadd.f32 %v6227_v49, %v2388_v29  ;;  %v2766_v46 = vadd.f32 %v6227_v49, %v2389_v4  ;;  %v2767_v41 = vadd.f32 %v6227_v49, %v2390_v6  ;;  %v7875_v23 = vld [vmem:[#allocation18_spill] sm:$0xff] }
 0x2bb   : > { %v2016_v58 = vmul.f32 %v1867_v8, %v4974_v60  ;;  %v2768_v12 = vadd.f32 %v6227_v49, %v2391_v18  ;;  %v2965_v40 = vadd.f32 %v2762_v55, %v1660_v50  ;;  %v2966_v45 = vadd.f32 %v2763_v52, %v1661_v3  ;;  %v1671_v50 = vld [vmem:[%s4581_s1 + $0xc8] sm:$0xff]  ;;  %v1672_v3 = vld [vmem:[%s4581_s1 + $0xd0] sm:$0xff] }
 0x2bc   : > { %v2967_v7 = vadd.f32 %v2764_v34, %v1662_v15  ;;  %v2968_v63 = vadd.f32 %v2765_v31, %v1663_v28  ;;  %v2969_v25 = vadd.f32 %v2766_v46, %v1664_v47  ;;  %v2970_v21 = vadd.f32 %v2767_v41, %v1665_v32  ;;  %v1673_v15 = vld [vmem:[%s4581_s1 + $0xd8] sm:$0xff] }
 0x2bd   : > { %v2017_v48 = vmul.f32 %v1867_v8, %v4978_v61  ;;  %v2971_v13 = vadd.f32 %v2768_v12, %v1666_v10  ;;  %v3168_v51 = vmax.f32 %v2965_v40, 0.0  ;;  %v3169_v57 = vmax.f32 %v2966_v45, 0.0 }
 0x2be   : > { %v3170_v60 = vmax.f32 %v2967_v7, 0.0  ;;  %v3171_v49 = vmax.f32 %v2968_v63, 0.0  ;;  %v3172_v22 = vmax.f32 %v2969_v25, 0.0  ;;  %v3173_v14 = vmax.f32 %v2970_v21, 0.0  ;;  %v1877_v63 = vpop.permute.xlu1 %1876 }
 0x2bf   : > { %v2018_v16 = vmul.f32 %v1867_v8, %v4988_v5  ;;  %v3174_v33 = vmax.f32 %v2971_v13, 0.0  ;;  %3371 = vst [vmem:[%s6361_s25 + $0x70] sm:$0xff] %v3168_v51  ;;  %3372 = vst [vmem:[%s6361_s25 + $0x78] sm:$0xff] %v3169_v57  ;;  %v2019_v61 = vmul.f32 %v1867_v8, %v5008_v26  ;;  %v2020_v27 = vmul.f32 %v1867_v8, %v7873_v35  ;;  %v1667_v5 = vld [vmem:[%s4581_s1 + $0xa8] sm:$0xff]  ;;  %v1668_v26 = vld [vmem:[%s4581_s1 + $0xb0] sm:$0xff] }
 0x2c0   : > { %3373 = vst [vmem:[%s6361_s25 + $0x80] sm:$0xff] %v3170_v60  ;;  %v2021_v53 = vmul.f32 %v1867_v8, %v7874_v39  ;;  %3374 = vst [vmem:[%s6361_s25 + $0x88] sm:$0xff] %v3171_v49  ;;  %v2392_v17 = vadd.f32 %v5731_v1, %v2015_v56  ;;  %v2393_v2 = vadd.f32 %v5731_v1, %v2016_v58  ;;  %v1670_v8 = vld [vmem:[%s4581_s1 + $0xc0] sm:$0xff]  ;;  %v7878_v13 = vld [vmem:[#allocation21_spill] sm:$0xff] }
 0x2c1   : > { %3375 = vst [vmem:[%s6361_s25 + $0x90] sm:$0xff] %v3172_v22  ;;  %3376 = vst [vmem:[%s6361_s25 + $0x98] sm:$0xff] %v3173_v14  ;;  %v2394_v19 = vadd.f32 %v5731_v1, %v2017_v48  ;;  %v2395_v9 = vadd.f32 %v5731_v1, %v2018_v16  ;;  %v2396_v24 = vadd.f32 %v5731_v1, %v2019_v61  ;;  %v7877_v58 = vld [vmem:[#allocation20_spill] sm:$0xff]  ;;  %v7879_v57 = vld [vmem:[#allocation22_spill] sm:$0xff] }
 0x2c2   : > { %3377 = vst.msk [vmem:[%s6361_s25 + $0xa0] sm:$0xff] %vm548_vm0, %v3174_v33  ;;  %v2397_v43 = vadd.f32 %v5731_v1, %v2020_v27  ;;  %v2398_v44 = vadd.f32 %v5731_v1, %v2021_v53  ;;  %v2022_v38 = vmul.f32 %v1872_v11, %v7875_v23  ;;  %v2769_v29 = vadd.f32 %v6219_v20, %v2392_v17  ;;  %v7876_v1 = vld [vmem:[#allocation19_spill] sm:$0xff]  ;;  %v7880_v49 = vld [vmem:[#allocation24_spill] sm:$0xff]  ;;  %v7882_v53 = vld [vmem:[#allocation25_spill] sm:$0xff] }
 0x2c3   : > { %v2770_v4 = vadd.f32 %v6219_v20, %v2393_v2  ;;  %v2771_v6 = vadd.f32 %v6219_v20, %v2394_v19  ;;  %v2772_v56 = vadd.f32 %v6219_v20, %v2395_v9  ;;  %v2773_v28 = vadd.f32 %v6219_v20, %v2396_v24  ;;  %v7881_v14 = vld [vmem:[#allocation23_spill] sm:$0xff]  ;;  %v1675_v17 = vld [vmem:[%s4581_s1 + $0xe8] sm:$0xff] }
 0x2c4   : > { %v2774_v47 = vadd.f32 %v6219_v20, %v2397_v43  ;;  %v2775_v32 = vadd.f32 %v6219_v20, %v2398_v44  ;;  %v2023_v18 = vmul.f32 %v1872_v11, %v7876_v1  ;;  %v2972_v55 = vadd.f32 %v2769_v29, %v1667_v5  ;;  %v1674_v61 = vld [vmem:[%s4581_s1 + $0xe0] sm:$0xff]  ;;  %v1677_v2 = vld [vmem:[%s4581_s1 + $0xf8] sm:$0xff]  ;;  %v1679_v24 = vld [vmem:[%s4581_s1 + $0x108] sm:$0xff] }
 0x2c5   : > { %v2973_v52 = vadd.f32 %v2770_v4, %v1668_v26  ;;  %v2974_v34 = vadd.f32 %v2771_v6, %v1669_v37  ;;  %v2975_v10 = vadd.f32 %v2772_v56, %v1670_v8  ;;  %v2976_v31 = vadd.f32 %v2773_v28, %v1671_v50  ;;  %v1678_v8 = vld [vmem:[%s4581_s1 + $0x100] sm:$0xff]  ;;  %v1680_v43 = vld [vmem:[%s4581_s1 + $0x110] sm:$0xff] }
 0x2c6   : > { %v2977_v46 = vadd.f32 %v2774_v47, %v1672_v3  ;;  %v2978_v41 = vadd.f32 %v2775_v32, %v1673_v15  ;;  %v2024_v12 = vmul.f32 %v1872_v11, %v7877_v58  ;;  %v3175_v40 = vmax.f32 %v2972_v55, 0.0  ;;  %v7883_v50 = vld [vmem:[#allocation26_spill] sm:$0xff]  ;;  %v7884_v47 = vld [vmem:[#allocation27_spill] sm:$0xff] }
 0x2c7   : > { %v3176_v45 = vmax.f32 %v2973_v52, 0.0  ;;  %v3177_v7 = vmax.f32 %v2974_v34, 0.0  ;;  %v3178_v20 = vmax.f32 %v2975_v10, 0.0  ;;  %v3179_v25 = vmax.f32 %v2976_v31, 0.0 }
 0x2c8   : > { %v3180_v21 = vmax.f32 %v2977_v46, 0.0  ;;  %v3181_v48 = vmax.f32 %v2978_v41, 0.0  ;;  %v2025_v51 = vmul.f32 %v1872_v11, %v7878_v13  ;;  %3378 = vst [vmem:[%s6361_s25 + $0xa8] sm:$0xff] %v3175_v40  ;;  %v2026_v60 = vmul.f32 %v1872_v11, %v7879_v57  ;;  %v7885_v46 = vld [vmem:[#allocation28_spill] sm:$0xff]  ;;  %v1897_v41 = vpop.permute.xlu0 %1896 }
 0x2c9   : > { %3379 = vst [vmem:[%s6361_s25 + $0xb0] sm:$0xff] %v3176_v45  ;;  %3380 = vst [vmem:[%s6361_s25 + $0xb8] sm:$0xff] %v3177_v7  ;;  %v2027_v22 = vmul.f32 %v1872_v11, %v7880_v49  ;;  %v2028_v16 = vmul.f32 %v1872_v11, %v7881_v14  ;;  %v2399_v33 = vadd.f32 %v5669_v62, %v2022_v38  ;;  %v1676_v11 = vld [vmem:[%s4581_s1 + $0xf0] sm:$0xff]  ;;  %v7889_v13 = vld [vmem:[#allocation136_spill] sm:$0xff] }
 0x2ca   : > { %3381 = vst [vmem:[%s6361_s25 + $0xc0] sm:$0xff] %v3178_v20  ;;  %3382 = vst [vmem:[%s6361_s25 + $0xc8] sm:$0xff] %v3179_v25  ;;  %v2400_v35 = vadd.f32 %v5669_v62, %v2023_v18  ;;  %v2401_v27 = vadd.f32 %v5669_v62, %v2024_v12  ;;  %v2402_v39 = vadd.f32 %v5669_v62, %v2025_v51  ;;  %v7886_v45 = vld [vmem:[#allocation30_spill] sm:$0xff]  ;;  %v7887_v20 = vld [vmem:[#allocation31_spill] sm:$0xff] }
 0x2cb   : > { %3383 = vst [vmem:[%s6361_s25 + $0xd0] sm:$0xff] %v3180_v21  ;;  %3384 = vst.msk [vmem:[%s6361_s25 + $0xd8] sm:$0xff] %vm548_vm0, %v3181_v48  ;;  %v2029_v5 = vmul.f32 %v1877_v63, %v7882_v53  ;;  %v2403_v19 = vadd.f32 %v5669_v62, %v2026_v60  ;;  %v2404_v9 = vadd.f32 %v5669_v62, %v2027_v22  ;;  %v7888_v21 = vld [vmem:[#allocation29_spill] sm:$0xff]  ;;  %v1681_v60 = vld [vmem:[%s4581_s1 + $0x118] sm:$0xff] }
 0x2cc   : > { %v2405_v26 = vadd.f32 %v5669_v62, %v2028_v16  ;;  %v2776_v37 = vadd.f32 %v6233_v30, %v2399_v33  ;;  %v2777_v44 = vadd.f32 %v6233_v30, %v2400_v35  ;;  %v2778_v23 = vadd.f32 %v6233_v30, %v2401_v27  ;;  %v1682_v49 = vld [vmem:[%s4581_s1 + $0x120] sm:$0xff]  ;;  %v1684_v35 = vld [vmem:[%s4581_s1 + $0x130] sm:$0xff]  ;;  %v1685_v27 = vld [vmem:[%s4581_s1 + $0x138] sm:$0xff] }
 0x2cd   : > { %v2779_v38 = vadd.f32 %v6233_v30, %v2402_v39  ;;  %v2030_v3 = vmul.f32 %v1877_v63, %v7883_v50  ;;  %v2780_v15 = vadd.f32 %v6233_v30, %v2403_v19  ;;  %v2781_v29 = vadd.f32 %v6233_v30, %v2404_v9  ;;  %v7890_v33 = vld [vmem:[#allocation52_spill] sm:$0xff] }
 0x2ce   : > { %v2782_v4 = vadd.f32 %v6233_v30, %v2405_v26  ;;  %v2979_v62 = vadd.f32 %v2776_v37, %v1674_v61  ;;  %v2980_v6 = vadd.f32 %v2777_v44, %v1675_v17  ;;  %v2981_v56 = vadd.f32 %v2778_v23, %v1676_v11  ;;  %v1683_v61 = vld [vmem:[%s4581_s1 + $0x128] sm:$0xff]  ;;  %v1686_v11 = vld [vmem:[%s4581_s1 + $0x140] sm:$0xff]  ;;  %v7891_v37 = vld [vmem:[#allocation54_spill] sm:$0xff] }
 0x2cf   : > { %v2982_v28 = vadd.f32 %v2779_v38, %v1677_v2  ;;  %v2031_v32 = vmul.f32 %v1877_v63, %v7884_v47  ;;  %v2983_v1 = vadd.f32 %v2780_v15, %v1678_v8  ;;  %v2984_v18 = vadd.f32 %v2781_v29, %v1679_v24  ;;  %v1687_v2 = vld [vmem:[%s4581_s1 + $0x148] sm:$0xff]  ;;  %v7892_v15 = vld [vmem:[#allocation55_spill] sm:$0xff] }
 0x2d0   : > { %v2985_v55 = vadd.f32 %v2782_v4, %v1680_v43  ;;  %v3182_v52 = vmax.f32 %v2979_v62, 0.0  ;;  %v3183_v34 = vmax.f32 %v2980_v6, 0.0  ;;  %v3184_v10 = vmax.f32 %v2981_v56, 0.0 }
 0x2d1   : > { %v3185_v31 = vmax.f32 %v2982_v28, 0.0  ;;  %v2032_v30 = vmul.f32 %v1877_v63, %v7885_v46  ;;  %v3186_v58 = vmax.f32 %v2983_v1, 0.0  ;;  %v3187_v12 = vmax.f32 %v2984_v18, 0.0  ;;  %v1882_v18 = vpop.permute.xlu1 %1881 }
 0x2d2   : > { %v3188_v40 = vmax.f32 %v2985_v55, 0.0  ;;  %3385 = vst [vmem:[%s6361_s25 + $0xe0] sm:$0xff] %v3182_v52  ;;  %v2033_v7 = vmul.f32 %v1877_v63, %v7886_v45  ;;  %3386 = vst [vmem:[%s6361_s25 + $0xe8] sm:$0xff] %v3183_v34  ;;  %v2034_v25 = vmul.f32 %v1877_v63, %v7887_v20  ;;  %v2035_v48 = vmul.f32 %v1877_v63, %v7888_v21  ;;  %v7894_v34 = vld [vmem:[#allocation58_spill] sm:$0xff]  ;;  %v1710_v20 = vld [vmem:[%s4581_s1 + $0x200] sm:$0xff] }
 0x2d3   : > { %3387 = vst [vmem:[%s6361_s25 + $0xf0] sm:$0xff] %v3184_v10  ;;  %3388 = vst [vmem:[%s6361_s25 + $0xf8] sm:$0xff] %v3185_v31  ;;  %v2406_v51 = vadd.f32 %v7889_v13, %v2029_v5  ;;  %v2407_v57 = vadd.f32 %v7889_v13, %v2030_v3  ;;  %v2408_v22 = vadd.f32 %v7889_v13, %v2031_v32  ;;  %v7895_v31 = vld [vmem:[#allocation59_spill] sm:$0xff] }
 0x2d4   : > { %3389 = vst [vmem:[%s6361_s25 + $0x100] sm:$0xff] %v3186_v58  ;;  %3390 = vst [vmem:[%s6361_s25 + $0x108] sm:$0xff] %v3187_v12  ;;  %v2409_v14 = vadd.f32 %v7889_v13, %v2032_v30  ;;  %v2410_v16 = vadd.f32 %v7889_v13, %v2033_v7  ;;  %v2057_v63 = vmul.f32 %v1897_v41, %v7890_v33  ;;  %v7896_v30 = vld [vmem:[#allocation57_spill] sm:$0xff]  ;;  %v1709_v7 = vld [vmem:[%s4581_s1 + $0x1f8] sm:$0xff] }
 0x2d5   : > { %3391 = vst.msk [vmem:[%s6361_s25 + $0x110] sm:$0xff] %vm548_vm0, %v3188_v40  ;;  %v2411_v39 = vadd.f32 %v7889_v13, %v2034_v25  ;;  %v2412_v53 = vadd.f32 %v7889_v13, %v2035_v48  ;;  %v2783_v5 = vadd.f32 %v6278_v54, %v2406_v51  ;;  %v2784_v17 = vadd.f32 %v6278_v54, %v2407_v57  ;;  %v1711_v25 = vld [vmem:[%s4581_s1 + $0x208] sm:$0xff]  ;;  %v1712_v57 = vld [vmem:[%s4581_s1 + $0x210] sm:$0xff] }
 0x2d6   : > { %v2785_v19 = vadd.f32 %v6278_v54, %v2408_v22  ;;  %v2786_v9 = vadd.f32 %v6278_v54, %v2409_v14  ;;  %v2787_v26 = vadd.f32 %v6278_v54, %v2410_v16  ;;  %v2058_v8 = vmul.f32 %v1897_v41, %v7891_v37 }
 0x2d7   : > { %v2788_v24 = vadd.f32 %v6278_v54, %v2411_v39  ;;  %v2789_v43 = vadd.f32 %v6278_v54, %v2412_v53  ;;  %v2986_v44 = vadd.f32 %v2783_v5, %v1681_v60  ;;  %v2987_v23 = vadd.f32 %v2784_v17, %v1682_v49  ;;  %v7893_v54 = vld [vmem:[#allocation56_spill] sm:$0xff]  ;;  %v1713_v60 = vld [vmem:[%s4581_s1 + $0x218] sm:$0xff]  ;;  %v7898_v39 = vld [vmem:[#allocation33_spill] sm:$0xff] }
 0x2d8   : > { %v2988_v38 = vadd.f32 %v2785_v19, %v1683_v61  ;;  %v2989_v50 = vadd.f32 %v2786_v9, %v1684_v35  ;;  %v2990_v3 = vadd.f32 %v2787_v26, %v1685_v27  ;;  %v2059_v29 = vmul.f32 %v1897_v41, %v7892_v15  ;;  %v1714_v49 = vld [vmem:[%s4581_s1 + $0x220] sm:$0xff]  ;;  %v7899_v26 = vld [vmem:[#allocation34_spill] sm:$0xff]  ;;  %v1907_v15 = vpop.permute.xlu0 %1906 }
 0x2d9   : > { %v2991_v4 = vadd.f32 %v2788_v24, %v1686_v11  ;;  %v2992_v62 = vadd.f32 %v2789_v43, %v1687_v2  ;;  %v3189_v6 = vmax.f32 %v2986_v44, 0.0  ;;  %v3190_v56 = vmax.f32 %v2987_v23, 0.0 }
 0x2da   : > { %v3191_v28 = vmax.f32 %v2988_v38, 0.0  ;;  %v3192_v47 = vmax.f32 %v2989_v50, 0.0  ;;  %v3193_v32 = vmax.f32 %v2990_v3, 0.0  ;;  %v2060_v1 = vmul.f32 %v1897_v41, %v7893_v54  ;;  %v7900_v50 = vld [vmem:[#allocation35_spill] sm:$0xff] }
 0x2db   : > { %v3194_v55 = vmax.f32 %v2991_v4, 0.0  ;;  %v3195_v52 = vmax.f32 %v2992_v62, 0.0  ;;  %3392 = vst [vmem:[%s6361_s25 + $0x118] sm:$0xff] %v3189_v6  ;;  %3393 = vst [vmem:[%s6361_s25 + $0x120] sm:$0xff] %v3190_v56  ;;  %v2061_v10 = vmul.f32 %v1897_v41, %v7894_v34  ;;  %v2062_v46 = vmul.f32 %v1897_v41, %v7895_v31  ;;  %v7901_v4 = vld [vmem:[#allocation36_spill] sm:$0xff]  ;;  %v7902_v6 = vld [vmem:[#allocation37_spill] sm:$0xff] }
 0x2dc   : > { %3394 = vst [vmem:[%s6361_s25 + $0x128] sm:$0xff] %v3191_v28  ;;  %3395 = vst [vmem:[%s6361_s25 + $0x130] sm:$0xff] %v3192_v47  ;;  %v2063_v58 = vmul.f32 %v1897_v41, %v7896_v30  ;;  %v2434_v12 = vadd.f32 %v5889_v36, %v2057_v63  ;;  %v2435_v40 = vadd.f32 %v5889_v36, %v2058_v8  ;;  %v7897_v41 = vld [vmem:[#allocation32_spill] sm:$0xff]  ;;  %v7903_v28 = vld [vmem:[#allocation38_spill] sm:$0xff] }
 0x2dd   : > { %3396 = vst [vmem:[%s6361_s25 + $0x138] sm:$0xff] %v3193_v32  ;;  %v2436_v45 = vadd.f32 %v5889_v36, %v2059_v29  ;;  %3397 = vst [vmem:[%s6361_s25 + $0x140] sm:$0xff] %v3194_v55  ;;  %v2437_v21 = vadd.f32 %v5889_v36, %v2060_v1  ;;  %v2438_v48 = vadd.f32 %v5889_v36, %v2061_v10  ;;  %v1715_v63 = vld [vmem:[%s4581_s1 + $0x228] sm:$0xff]  ;;  %v1688_v32 = vld [vmem:[%s4581_s1 + $0x150] sm:$0xff] }
 0x2de   : > { %3398 = vst.msk [vmem:[%s6361_s25 + $0x148] sm:$0xff] %vm548_vm0, %v3195_v52  ;;  %v2439_v13 = vadd.f32 %v5889_v36, %v2062_v46  ;;  %v2036_v51 = vmul.f32 %v1882_v18, %v7897_v41  ;;  %v2440_v22 = vadd.f32 %v5889_v36, %v2063_v58  ;;  %v2811_v14 = vadd.f32 %v6287_v42, %v2434_v12  ;;  %v7904_v54 = vld [vmem:[#allocation123_spill] sm:$0xff] }
 0x2df   : > { %v2812_v16 = vadd.f32 %v6287_v42, %v2435_v40  ;;  %v2813_v33 = vadd.f32 %v6287_v42, %v2436_v45  ;;  %v2814_v61 = vadd.f32 %v6287_v42, %v2437_v21  ;;  %v2815_v35 = vadd.f32 %v6287_v42, %v2438_v48  ;;  %v1689_v10 = vld [vmem:[%s4581_s1 + $0x158] sm:$0xff]  ;;  %v1690_v31 = vld [vmem:[%s4581_s1 + $0x160] sm:$0xff]  ;;  %v1692_v45 = vld [vmem:[%s4581_s1 + $0x170] sm:$0xff] }
 0x2e0   : > { %v2816_v27 = vadd.f32 %v6287_v42, %v2439_v13  ;;  %v2037_v53 = vmul.f32 %v1882_v18, %v7898_v39  ;;  %v2817_v5 = vadd.f32 %v6287_v42, %v2440_v22  ;;  %v3014_v17 = vadd.f32 %v2811_v14, %v1709_v7  ;;  %v7905_v12 = vld [vmem:[#allocation67_spill] sm:$0xff] }
 0x2e1   : > { %v3015_v11 = vadd.f32 %v2812_v16, %v1710_v20  ;;  %v3016_v36 = vadd.f32 %v2813_v33, %v1711_v25  ;;  %v3017_v2 = vadd.f32 %v2814_v61, %v1712_v57  ;;  %v3018_v19 = vadd.f32 %v2815_v35, %v1713_v60  ;;  %v1693_v7 = vld [vmem:[%s4581_s1 + $0x178] sm:$0xff]  ;;  %v1694_v20 = vld [vmem:[%s4581_s1 + $0x180] sm:$0xff] }
 0x2e2   : > { %v3019_v9 = vadd.f32 %v2816_v27, %v1714_v49  ;;  %v2038_v37 = vmul.f32 %v1882_v18, %v7899_v26  ;;  %v3020_v8 = vadd.f32 %v2817_v5, %v1715_v63  ;;  %v3217_v24 = vmax.f32 %v3014_v17, 0.0  ;;  %v7906_v60 = vld [vmem:[#allocation68_spill] sm:$0xff]  ;;  %v7907_v27 = vld [vmem:[#allocation69_spill] sm:$0xff] }
 0x2e3   : > { %v3218_v43 = vmax.f32 %v3015_v11, 0.0  ;;  %v3219_v44 = vmax.f32 %v3016_v36, 0.0  ;;  %v3220_v42 = vmax.f32 %v3017_v2, 0.0  ;;  %v3221_v23 = vmax.f32 %v3018_v19, 0.0  ;;  %v1887_v11 = vpop.permute.xlu1 %1886 }
 0x2e4   : > { %v3222_v38 = vmax.f32 %v3019_v9, 0.0  ;;  %v2039_v3 = vmul.f32 %v1882_v18, %v7900_v50  ;;  %v3223_v29 = vmax.f32 %v3020_v8, 0.0  ;;  %3420 = vst [vmem:[%s6361_s25 + $0x1f8] sm:$0xff] %v3217_v24  ;;  %v2040_v62 = vmul.f32 %v1882_v18, %v7901_v4  ;;  %v7908_v9 = vld [vmem:[#allocation70_spill] sm:$0xff]  ;;  %v7910_v24 = vld [vmem:[#allocation73_spill] sm:$0xff]  ;;  %v7912_v4 = vld [vmem:[#allocation39_spill] sm:$0xff] }
 0x2e5   : > { %3421 = vst [vmem:[%s6361_s25 + $0x200] sm:$0xff] %v3218_v43  ;;  %3422 = vst [vmem:[%s6361_s25 + $0x208] sm:$0xff] %v3219_v44  ;;  %v2041_v56 = vmul.f32 %v1882_v18, %v7902_v6  ;;  %v2042_v47 = vmul.f32 %v1882_v18, %v7903_v28  ;;  %v2413_v1 = vadd.f32 %v7904_v54, %v2036_v51  ;;  %v1691_v18 = vld [vmem:[%s4581_s1 + $0x168] sm:$0xff]  ;;  %v7911_v44 = vld [vmem:[#allocation71_spill] sm:$0xff] }
 0x2e6   : > { %3423 = vst [vmem:[%s6361_s25 + $0x210] sm:$0xff] %v3220_v42  ;;  %3424 = vst [vmem:[%s6361_s25 + $0x218] sm:$0xff] %v3221_v23  ;;  %v2414_v55 = vadd.f32 %v7904_v54, %v2037_v53  ;;  %v2415_v52 = vadd.f32 %v7904_v54, %v2038_v37  ;;  %v2416_v34 = vadd.f32 %v7904_v54, %v2039_v3  ;;  %v7909_v37 = vld [vmem:[#allocation72_spill] sm:$0xff]  ;;  %v1724_v6 = vld [vmem:[%s4581_s1 + $0x270] sm:$0xff] }
 0x2e7   : > { %3425 = vst [vmem:[%s6361_s25 + $0x220] sm:$0xff] %v3222_v38  ;;  %3426 = vst.msk [vmem:[%s6361_s25 + $0x228] sm:$0xff] %vm548_vm0, %v3223_v29  ;;  %v2417_v46 = vadd.f32 %v7904_v54, %v2040_v62  ;;  %v2418_v30 = vadd.f32 %v7904_v54, %v2041_v56  ;;  %v2419_v58 = vadd.f32 %v7904_v54, %v2042_v47  ;;  %v1723_v38 = vld [vmem:[%s4581_s1 + $0x268] sm:$0xff]  ;;  %v1726_v56 = vld [vmem:[%s4581_s1 + $0x280] sm:$0xff] }
 0x2e8   : > { %v2071_v40 = vmul.f32 %v1907_v15, %v7905_v12  ;;  %v2790_v25 = vadd.f32 %v6280_v0, %v2413_v1  ;;  %v2791_v21 = vadd.f32 %v6280_v0, %v2414_v55  ;;  %v2792_v48 = vadd.f32 %v6280_v0, %v2415_v52  ;;  %v7913_v54 = vld [vmem:[#allocation218_spill] sm:$0xff]  ;;  %v1727_v55 = vld [vmem:[%s4581_s1 + $0x288] sm:$0xff] }
 0x2e9   : > { %v2793_v13 = vadd.f32 %v6280_v0, %v2416_v34  ;;  %v2794_v41 = vadd.f32 %v6280_v0, %v2417_v46  ;;  %v2795_v51 = vadd.f32 %v6280_v0, %v2418_v30  ;;  %v2796_v57 = vadd.f32 %v6280_v0, %v2419_v58  ;;  %v1728_v52 = vld [vmem:[%s4581_s1 + $0x290] sm:$0xff]  ;;  %v1729_v34 = vld [vmem:[%s4581_s1 + $0x298] sm:$0xff]  ;;  %v7914_v46 = vld [vmem:[#allocation40_spill] sm:$0xff] }
 0x2ea   : > { %v2072_v49 = vmul.f32 %v1907_v15, %v7906_v60  ;;  %v2993_v22 = vadd.f32 %v2790_v25, %v1688_v32  ;;  %v2994_v14 = vadd.f32 %v2791_v21, %v1689_v10  ;;  %v2995_v16 = vadd.f32 %v2792_v48, %v1690_v31  ;;  %v7915_v25 = vld [vmem:[#allocation41_spill] sm:$0xff] }
 0x2eb   : > { %v2996_v33 = vadd.f32 %v2793_v13, %v1691_v18  ;;  %v2997_v63 = vadd.f32 %v2794_v41, %v1692_v45  ;;  %v2998_v61 = vadd.f32 %v2795_v51, %v1693_v7  ;;  %v2999_v35 = vadd.f32 %v2796_v57, %v1694_v20 }
 0x2ec   : > { %v2073_v39 = vmul.f32 %v1907_v15, %v7907_v27  ;;  %v3196_v53 = vmax.f32 %v2993_v22, 0.0  ;;  %v3197_v5 = vmax.f32 %v2994_v14, 0.0  ;;  %v3198_v17 = vmax.f32 %v2995_v16, 0.0  ;;  %v7916_v22 = vld [vmem:[#allocation42_spill] sm:$0xff]  ;;  %v1917_v16 = vpop.permute.xlu0 %1916 }
 0x2ed   : > { %v3199_v0 = vmax.f32 %v2996_v33, 0.0  ;;  %v3200_v36 = vmax.f32 %v2997_v63, 0.0  ;;  %v3201_v2 = vmax.f32 %v2998_v61, 0.0  ;;  %v3202_v19 = vmax.f32 %v2999_v35, 0.0  ;;  %v7917_v35 = vld [vmem:[#allocation44_spill] sm:$0xff] }
 0x2ee   : > { %v2074_v26 = vmul.f32 %v1907_v15, %v7908_v9  ;;  %3399 = vst [vmem:[%s6361_s25 + $0x150] sm:$0xff] %v3196_v53  ;;  %3400 = vst [vmem:[%s6361_s25 + $0x158] sm:$0xff] %v3197_v5  ;;  %v2075_v8 = vmul.f32 %v1907_v15, %v7909_v37  ;;  %v2076_v43 = vmul.f32 %v1907_v15, %v7910_v24  ;;  %v7919_v5 = vld [vmem:[#allocation43_spill] sm:$0xff]  ;;  %v1696_v9 = vld [vmem:[%s4581_s1 + $0x190] sm:$0xff] }
 0x2ef   : > { %3401 = vst [vmem:[%s6361_s25 + $0x160] sm:$0xff] %v3198_v17  ;;  %3402 = vst [vmem:[%s6361_s25 + $0x168] sm:$0xff] %v3199_v0  ;;  %v2077_v42 = vmul.f32 %v1907_v15, %v7911_v44  ;;  %v2448_v23 = vadd.f32 %v5948_v59, %v2071_v40  ;;  %v2449_v50 = vadd.f32 %v5948_v59, %v2072_v49  ;;  %v1725_v15 = vld [vmem:[%s4581_s1 + $0x278] sm:$0xff]  ;;  %v7920_v0 = vld [vmem:[#allocation145_spill] sm:$0xff] }
 0x2f0   : > { %3403 = vst [vmem:[%s6361_s25 + $0x170] sm:$0xff] %v3200_v36  ;;  %3404 = vst [vmem:[%s6361_s25 + $0x178] sm:$0xff] %v3201_v2  ;;  %v2450_v3 = vadd.f32 %v5948_v59, %v2073_v39  ;;  %v2451_v29 = vadd.f32 %v5948_v59, %v2074_v26  ;;  %v2043_v62 = vmul.f32 %v1887_v11, %v7912_v4  ;;  %v7918_v39 = vld [vmem:[#allocation45_spill] sm:$0xff]  ;;  %v1698_v44 = vld [vmem:[%s4581_s1 + $0x1a0] sm:$0xff] }
 0x2f1   : > { %3405 = vst.msk [vmem:[%s6361_s25 + $0x180] sm:$0xff] %vm548_vm0, %v3202_v19  ;;  %v2452_v28 = vadd.f32 %v5948_v59, %v2075_v8  ;;  %v2453_v47 = vadd.f32 %v5948_v59, %v2076_v43  ;;  %v2454_v32 = vadd.f32 %v5948_v59, %v2077_v42  ;;  %v2825_v1 = vadd.f32 %v7913_v54, %v2448_v23  ;;  %v1695_v19 = vld [vmem:[%s4581_s1 + $0x188] sm:$0xff]  ;;  %v1697_v43 = vld [vmem:[%s4581_s1 + $0x198] sm:$0xff]  ;;  %v1700_v4 = vld [vmem:[%s4581_s1 + $0x1b0] sm:$0xff] }
 0x2f2   : > { %v2826_v10 = vadd.f32 %v7913_v54, %v2449_v50  ;;  %v2827_v31 = vadd.f32 %v7913_v54, %v2450_v3  ;;  %v2828_v18 = vadd.f32 %v7913_v54, %v2451_v29  ;;  %v2044_v30 = vmul.f32 %v1887_v11, %v7914_v46  ;;  %v7921_v24 = vld [vmem:[#allocation81_spill] sm:$0xff]  ;;  %v7922_v50 = vld [vmem:[#allocation215_spill] sm:$0xff] }
 0x2f3   : > { %v2829_v58 = vadd.f32 %v7913_v54, %v2452_v28  ;;  %v2830_v12 = vadd.f32 %v7913_v54, %v2453_v47  ;;  %v2831_v40 = vadd.f32 %v7913_v54, %v2454_v32  ;;  %v3028_v59 = vadd.f32 %v2825_v1, %v1723_v38  ;;  %v1699_v42 = vld [vmem:[%s4581_s1 + $0x1a8] sm:$0xff]  ;;  %v7923_v28 = vld [vmem:[#allocation82_spill] sm:$0xff] }
 0x2f4   : > { %v3029_v45 = vadd.f32 %v2826_v10, %v1724_v6  ;;  %v3030_v7 = vadd.f32 %v2827_v31, %v1725_v15  ;;  %v3031_v20 = vadd.f32 %v2828_v18, %v1726_v56  ;;  %v2045_v21 = vmul.f32 %v1887_v11, %v7915_v25  ;;  %v7924_v31 = vld [vmem:[#allocation83_spill] sm:$0xff]  ;;  %v1892_v25 = vpop.permute.xlu1 %1891 }
 0x2f5   : > { %v3032_v48 = vadd.f32 %v2829_v58, %v1727_v55  ;;  %v3033_v13 = vadd.f32 %v2830_v12, %v1728_v52  ;;  %v3034_v41 = vadd.f32 %v2831_v40, %v1729_v34  ;;  %v3231_v51 = vmax.f32 %v3028_v59, 0.0 }
 0x2f6   : > { %v3232_v57 = vmax.f32 %v3029_v45, 0.0  ;;  %v3233_v60 = vmax.f32 %v3030_v7, 0.0  ;;  %v3234_v49 = vmax.f32 %v3031_v20, 0.0  ;;  %v2046_v14 = vmul.f32 %v1887_v11, %v7916_v22  ;;  %v7925_v7 = vld [vmem:[#allocation84_spill] sm:$0xff]  ;;  %v7929_v22 = vld [vmem:[#allocation173_spill] sm:$0xff] }
 0x2f7   : > { %v3235_v33 = vmax.f32 %v3032_v48, 0.0  ;;  %v3236_v63 = vmax.f32 %v3033_v13, 0.0  ;;  %v3237_v61 = vmax.f32 %v3034_v41, 0.0  ;;  %3434 = vst [vmem:[%s6361_s25 + $0x268] sm:$0xff] %v3231_v51  ;;  %v2047_v27 = vmul.f32 %v1887_v11, %v7917_v35  ;;  %v7926_v13 = vld [vmem:[#allocation86_spill] sm:$0xff]  ;;  %v7927_v51 = vld [vmem:[#allocation87_spill] sm:$0xff] }
 0x2f8   : > { %3435 = vst [vmem:[%s6361_s25 + $0x270] sm:$0xff] %v3232_v57  ;;  %3436 = vst [vmem:[%s6361_s25 + $0x278] sm:$0xff] %v3233_v60  ;;  %v2048_v53 = vmul.f32 %v1887_v11, %v7918_v39  ;;  %v2049_v17 = vmul.f32 %v1887_v11, %v7919_v5  ;;  %v2420_v36 = vadd.f32 %v7920_v0, %v2043_v62  ;;  %v1701_v62 = vld [vmem:[%s4581_s1 + $0x1b8] sm:$0xff]  ;;  %v7928_v60 = vld [vmem:[#allocation85_spill] sm:$0xff] }
 0x2f9   : > { %3437 = vst [vmem:[%s6361_s25 + $0x280] sm:$0xff] %v3234_v49  ;;  %v2421_v2 = vadd.f32 %v7920_v0, %v2044_v30  ;;  %3438 = vst [vmem:[%s6361_s25 + $0x288] sm:$0xff] %v3235_v33  ;;  %v2422_v26 = vadd.f32 %v7920_v0, %v2045_v21  ;;  %v2423_v37 = vadd.f32 %v7920_v0, %v2046_v14  ;;  %v1738_v35 = vld [vmem:[%s4581_s1 + $0x2e0] sm:$0xff] }
 0x2fa   : > { %3439 = vst [vmem:[%s6361_s25 + $0x290] sm:$0xff] %v3236_v63  ;;  %3440 = vst.msk [vmem:[%s6361_s25 + $0x298] sm:$0xff] %vm548_vm0, %v3237_v61  ;;  %v2424_v8 = vadd.f32 %v7920_v0, %v2047_v27  ;;  %v2085_v11 = vmul.f32 %v1917_v16, %v7921_v24  ;;  %v2425_v23 = vadd.f32 %v7920_v0, %v2048_v53  ;;  %v1737_v61 = vld [vmem:[%s4581_s1 + $0x2d8] sm:$0xff]  ;;  %v1739_v27 = vld [vmem:[%s4581_s1 + $0x2e8] sm:$0xff] }
 0x2fb   : > { %v2426_v38 = vadd.f32 %v7920_v0, %v2049_v17  ;;  %v2797_v3 = vadd.f32 %v7922_v50, %v2420_v36  ;;  %v2798_v29 = vadd.f32 %v7922_v50, %v2421_v2  ;;  %v2799_v6 = vadd.f32 %v7922_v50, %v2422_v26  ;;  %v1740_v0 = vld [vmem:[%s4581_s1 + $0x2f0] sm:$0xff]  ;;  %v1741_v36 = vld [vmem:[%s4581_s1 + $0x2f8] sm:$0xff]  ;;  %v1742_v2 = vld [vmem:[%s4581_s1 + $0x300] sm:$0xff] }
 0x2fc   : > { %v2800_v15 = vadd.f32 %v7922_v50, %v2423_v37  ;;  %v2801_v56 = vadd.f32 %v7922_v50, %v2424_v8  ;;  %v2086_v47 = vmul.f32 %v1917_v16, %v7923_v28  ;;  %v2802_v32 = vadd.f32 %v7922_v50, %v2425_v23  ;;  %v1743_v24 = vld [vmem:[%s4581_s1 + $0x308] sm:$0xff] }
 0x2fd   : > { %v2803_v54 = vadd.f32 %v7922_v50, %v2426_v38  ;;  %v3000_v1 = vadd.f32 %v2797_v3, %v1695_v19  ;;  %v3001_v55 = vadd.f32 %v2798_v29, %v1696_v9  ;;  %v3002_v52 = vadd.f32 %v2799_v6, %v1697_v43  ;;  %v7931_v9 = vld [vmem:[#allocation220_spill] sm:$0xff] }
 0x2fe   : > { %v3003_v34 = vadd.f32 %v2800_v15, %v1698_v44  ;;  %v3004_v10 = vadd.f32 %v2801_v56, %v1699_v42  ;;  %v2087_v18 = vmul.f32 %v1917_v16, %v7924_v31  ;;  %v3005_v46 = vadd.f32 %v2802_v32, %v1700_v4  ;;  %v7932_v42 = vld [vmem:[#allocation47_spill] sm:$0xff]  ;;  %v7933_v15 = vld [vmem:[#allocation48_spill] sm:$0xff]  ;;  %v1927_v31 = vpop.permute.xlu0 %1926 }
 0x2ff   : > { %v3006_v30 = vadd.f32 %v2803_v54, %v1701_v62  ;;  %v3203_v58 = vmax.f32 %v3000_v1, 0.0  ;;  %v3204_v12 = vmax.f32 %v3001_v55, 0.0  ;;  %v3205_v40 = vmax.f32 %v3002_v52, 0.0 }
 0x300   : > { %v3206_v59 = vmax.f32 %v3003_v34, 0.0  ;;  %v3207_v45 = vmax.f32 %v3004_v10, 0.0  ;;  %v2088_v20 = vmul.f32 %v1917_v16, %v7925_v7  ;;  %v3208_v21 = vmax.f32 %v3005_v46, 0.0  ;;  %v7934_v34 = vld [vmem:[#allocation49_spill] sm:$0xff]  ;;  %v7935_v46 = vld [vmem:[#allocation50_spill] sm:$0xff]  ;;  %v7938_v7 = vld [vmem:[#allocation132_spill] sm:$0xff] }
 0x301   : > { %v3209_v48 = vmax.f32 %v3006_v30, 0.0  ;;  %3406 = vst [vmem:[%s6361_s25 + $0x188] sm:$0xff] %v3203_v58  ;;  %3407 = vst [vmem:[%s6361_s25 + $0x190] sm:$0xff] %v3204_v12  ;;  %v2089_v41 = vmul.f32 %v1917_v16, %v7926_v13  ;;  %v2090_v57 = vmul.f32 %v1917_v16, %v7927_v51  ;;  %v2091_v49 = vmul.f32 %v1917_v16, %v7928_v60  ;;  %v7930_v16 = vld [vmem:[#allocation46_spill] sm:$0xff]  ;;  %v7936_v58 = vld [vmem:[#allocation53_spill] sm:$0xff] }
 0x302   : > { %3408 = vst [vmem:[%s6361_s25 + $0x198] sm:$0xff] %v3205_v40  ;;  %3409 = vst [vmem:[%s6361_s25 + $0x1a0] sm:$0xff] %v3206_v59  ;;  %v2462_v14 = vadd.f32 %v7929_v22, %v2085_v11  ;;  %v2463_v33 = vadd.f32 %v7929_v22, %v2086_v47  ;;  %v2464_v63 = vadd.f32 %v7929_v22, %v2087_v18  ;;  %v7937_v40 = vld [vmem:[#allocation51_spill] sm:$0xff]  ;;  %v1704_v51 = vld [vmem:[%s4581_s1 + $0x1d0] sm:$0xff] }
 0x303   : > { %3410 = vst [vmem:[%s6361_s25 + $0x1a8] sm:$0xff] %v3207_v45  ;;  %3411 = vst [vmem:[%s6361_s25 + $0x1b0] sm:$0xff] %v3208_v21  ;;  %v2465_v39 = vadd.f32 %v7929_v22, %v2088_v20  ;;  %v2466_v53 = vadd.f32 %v7929_v22, %v2089_v41  ;;  %v2467_v5 = vadd.f32 %v7929_v22, %v2090_v57  ;;  %v1702_v45 = vld [vmem:[%s4581_s1 + $0x1c0] sm:$0xff]  ;;  %v1703_v41 = vld [vmem:[%s4581_s1 + $0x1c8] sm:$0xff] }
 0x304   : > { %3412 = vst.msk [vmem:[%s6361_s25 + $0x1b8] sm:$0xff] %vm548_vm0, %v3209_v48  ;;  %v2050_v17 = vmul.f32 %v1892_v25, %v7930_v16  ;;  %v2468_v19 = vadd.f32 %v7929_v22, %v2091_v49  ;;  %v2839_v26 = vadd.f32 %v7931_v9, %v2462_v14  ;;  %v2840_v37 = vadd.f32 %v7931_v9, %v2463_v33  ;;  %v7939_v22 = vld [vmem:[#allocation95_spill] sm:$0xff] }
 0x305   : > { %v2841_v8 = vadd.f32 %v7931_v9, %v2464_v63  ;;  %v2842_v11 = vadd.f32 %v7931_v9, %v2465_v39  ;;  %v2843_v43 = vadd.f32 %v7931_v9, %v2466_v53  ;;  %v2844_v44 = vadd.f32 %v7931_v9, %v2467_v5  ;;  %v1706_v33 = vld [vmem:[%s4581_s1 + $0x1e0] sm:$0xff]  ;;  %v1707_v63 = vld [vmem:[%s4581_s1 + $0x1e8] sm:$0xff] }
 0x306   : > { %v2051_v23 = vmul.f32 %v1892_v25, %v7932_v42  ;;  %v2845_v38 = vadd.f32 %v7931_v9, %v2468_v19  ;;  %v3042_v50 = vadd.f32 %v2839_v26, %v1737_v61  ;;  %v3043_v3 = vadd.f32 %v2840_v37, %v1738_v35  ;;  %v1708_v61 = vld [vmem:[%s4581_s1 + $0x1f0] sm:$0xff]  ;;  %v7940_v35 = vld [vmem:[#allocation216_spill] sm:$0xff] }
 0x307   : > { %v3044_v29 = vadd.f32 %v2841_v8, %v1739_v27  ;;  %v3045_v4 = vadd.f32 %v2842_v11, %v1740_v0  ;;  %v3046_v62 = vadd.f32 %v2843_v43, %v1741_v36  ;;  %v3047_v6 = vadd.f32 %v2844_v44, %v1742_v2  ;;  %v7941_v36 = vld [vmem:[#allocation96_spill] sm:$0xff]  ;;  %v7942_v43 = vld [vmem:[#allocation97_spill] sm:$0xff] }
 0x308   : > { %v2052_v56 = vmul.f32 %v1892_v25, %v7933_v15  ;;  %v3048_v28 = vadd.f32 %v2845_v38, %v1743_v24  ;;  %v3245_v47 = vmax.f32 %v3042_v50, 0.0  ;;  %v3246_v32 = vmax.f32 %v3043_v3, 0.0  ;;  %v1902_v3 = vpop.permute.xlu1 %1901 }
 0x309   : > { %v3247_v54 = vmax.f32 %v3044_v29, 0.0  ;;  %v3248_v1 = vmax.f32 %v3045_v4, 0.0  ;;  %v3249_v55 = vmax.f32 %v3046_v62, 0.0  ;;  %v3250_v52 = vmax.f32 %v3047_v6, 0.0  ;;  %v7943_v6 = vld [vmem:[#allocation98_spill] sm:$0xff] }
 0x30a   : > { %v2053_v10 = vmul.f32 %v1892_v25, %v7934_v34  ;;  %v3251_v18 = vmax.f32 %v3048_v28, 0.0  ;;  %3448 = vst [vmem:[%s6361_s25 + $0x2d8] sm:$0xff] %v3245_v47  ;;  %3449 = vst [vmem:[%s6361_s25 + $0x2e0] sm:$0xff] %v3246_v32  ;;  %v2054_v30 = vmul.f32 %v1892_v25, %v7935_v46  ;;  %v2055_v12 = vmul.f32 %v1892_v25, %v7936_v58  ;;  %v7945_v47 = vld [vmem:[#allocation101_spill] sm:$0xff] }
 0x30b   : > { %3450 = vst [vmem:[%s6361_s25 + $0x2e8] sm:$0xff] %v3247_v54  ;;  %v2056_v59 = vmul.f32 %v1892_v25, %v7937_v40  ;;  %3451 = vst [vmem:[%s6361_s25 + $0x2f0] sm:$0xff] %v3248_v1  ;;  %v2427_v20 = vadd.f32 %v7938_v7, %v2050_v17  ;;  %v2428_v21 = vadd.f32 %v7938_v7, %v2051_v23  ;;  %v1705_v25 = vld [vmem:[%s4581_s1 + $0x1d8] sm:$0xff]  ;;  %v7946_v54 = vld [vmem:[#allocation100_spill] sm:$0xff] }
 0x30c   : > { %3452 = vst [vmem:[%s6361_s25 + $0x2f8] sm:$0xff] %v3249_v55  ;;  %3453 = vst [vmem:[%s6361_s25 + $0x300] sm:$0xff] %v3250_v52  ;;  %v2429_v48 = vadd.f32 %v7938_v7, %v2052_v56  ;;  %v2430_v13 = vadd.f32 %v7938_v7, %v2053_v10  ;;  %v2431_v57 = vadd.f32 %v7938_v7, %v2054_v30  ;;  %v7944_v56 = vld [vmem:[#allocation99_spill] sm:$0xff]  ;;  %v7947_v55 = vld [vmem:[#allocation184_spill] sm:$0xff] }
 0x30d   : > { %3454 = vst.msk [vmem:[%s6361_s25 + $0x308] sm:$0xff] %vm548_vm0, %v3251_v18  ;;  %v2432_v60 = vadd.f32 %v7938_v7, %v2055_v12  ;;  %v2433_v49 = vadd.f32 %v7938_v7, %v2056_v59  ;;  %v2099_v14 = vmul.f32 %v1927_v31, %v7939_v22  ;;  %v2804_v27 = vadd.f32 %v7940_v35, %v2427_v20  ;;  %v1751_v34 = vld [vmem:[%s4581_s1 + $0x348] sm:$0xff]  ;;  %v1752_v12 = vld [vmem:[%s4581_s1 + $0x350] sm:$0xff]  ;;  %v1754_v40 = vld [vmem:[%s4581_s1 + $0x360] sm:$0xff] }
 0x30e   : > { %v2805_v39 = vadd.f32 %v7940_v35, %v2428_v21  ;;  %v2806_v53 = vadd.f32 %v7940_v35, %v2429_v48  ;;  %v2807_v5 = vadd.f32 %v7940_v35, %v2430_v13  ;;  %v2808_v16 = vadd.f32 %v7940_v35, %v2431_v57  ;;  %v7948_v30 = vld [vmem:[#allocation60_spill] sm:$0xff]  ;;  %v7949_v20 = vld [vmem:[#allocation222_spill] sm:$0xff] }
 0x30f   : > { %v2809_v17 = vadd.f32 %v7940_v35, %v2432_v60  ;;  %v2810_v0 = vadd.f32 %v7940_v35, %v2433_v49  ;;  %v2100_v2 = vmul.f32 %v1927_v31, %v7941_v36  ;;  %v3007_v19 = vadd.f32 %v2804_v27, %v1702_v45  ;;  %v1755_v48 = vld [vmem:[%s4581_s1 + $0x368] sm:$0xff]  ;;  %v1756_v13 = vld [vmem:[%s4581_s1 + $0x370] sm:$0xff] }
 0x310   : > { %v3008_v9 = vadd.f32 %v2805_v39, %v1703_v41  ;;  %v3009_v26 = vadd.f32 %v2806_v53, %v1704_v51  ;;  %v3010_v37 = vadd.f32 %v2807_v5, %v1705_v25  ;;  %v3011_v8 = vadd.f32 %v2808_v16, %v1706_v33  ;;  %v1757_v41 = vld [vmem:[%s4581_s1 + $0x378] sm:$0xff]  ;;  %v7950_v60 = vld [vmem:[#allocation61_spill] sm:$0xff] }
 0x311   : > { %v3012_v24 = vadd.f32 %v2809_v17, %v1707_v63  ;;  %v3013_v11 = vadd.f32 %v2810_v0, %v1708_v61  ;;  %v2101_v44 = vmul.f32 %v1927_v31, %v7942_v43  ;;  %v3210_v42 = vmax.f32 %v3007_v19, 0.0  ;;  %v7951_v39 = vld [vmem:[#allocation62_spill] sm:$0xff]  ;;  %v7953_v43 = vld [vmem:[#allocation64_spill] sm:$0xff] }
 0x312   : > { %v3211_v23 = vmax.f32 %v3008_v9, 0.0  ;;  %v3212_v38 = vmax.f32 %v3009_v26, 0.0  ;;  %v3213_v50 = vmax.f32 %v3010_v37, 0.0  ;;  %v3214_v29 = vmax.f32 %v3011_v8, 0.0  ;;  %v7952_v9 = vld [vmem:[#allocation63_spill] sm:$0xff]  ;;  %v1937_v37 = vpop.permute.xlu0 %1936 }
 0x313   : > { %v3215_v4 = vmax.f32 %v3012_v24, 0.0  ;;  %v3216_v62 = vmax.f32 %v3013_v11, 0.0  ;;  %v2102_v15 = vmul.f32 %v1927_v31, %v7943_v6  ;;  %3413 = vst [vmem:[%s6361_s25 + $0x1c0] sm:$0xff] %v3210_v42  ;;  %v2103_v28 = vmul.f32 %v1927_v31, %v7944_v56  ;;  %v7954_v42 = vld [vmem:[#allocation65_spill] sm:$0xff] }
 0x314   : > { %3414 = vst [vmem:[%s6361_s25 + $0x1c8] sm:$0xff] %v3211_v23  ;;  %3415 = vst [vmem:[%s6361_s25 + $0x1d0] sm:$0xff] %v3212_v38  ;;  %v2104_v32 = vmul.f32 %v1927_v31, %v7945_v47  ;;  %v2105_v1 = vmul.f32 %v1927_v31, %v7946_v54  ;;  %v2476_v52 = vadd.f32 %v7947_v55, %v2099_v14  ;;  %v1753_v31 = vld [vmem:[%s4581_s1 + $0x358] sm:$0xff]  ;;  %v1716_v6 = vld [vmem:[%s4581_s1 + $0x230] sm:$0xff] }
 0x315   : > { %3416 = vst [vmem:[%s6361_s25 + $0x1d8] sm:$0xff] %v3213_v50  ;;  %3417 = vst [vmem:[%s6361_s25 + $0x1e0] sm:$0xff] %v3214_v29  ;;  %v2477_v10 = vadd.f32 %v7947_v55, %v2100_v2  ;;  %v2478_v18 = vadd.f32 %v7947_v55, %v2101_v44  ;;  %v2479_v46 = vadd.f32 %v7947_v55, %v2102_v15  ;;  %v7955_v38 = vld [vmem:[#allocation66_spill] sm:$0xff]  ;;  %v7956_v29 = vld [vmem:[#allocation143_spill] sm:$0xff] }
 0x316   : > { %3418 = vst [vmem:[%s6361_s25 + $0x1e8] sm:$0xff] %v3215_v4  ;;  %3419 = vst.msk [vmem:[%s6361_s25 + $0x1f0] sm:$0xff] %vm548_vm0, %v3216_v62  ;;  %v2064_v58 = vmul.f32 %v1902_v3, %v7948_v30  ;;  %v2480_v59 = vadd.f32 %v7947_v55, %v2103_v28  ;;  %v2481_v45 = vadd.f32 %v7947_v55, %v2104_v32  ;;  %v1717_v15 = vld [vmem:[%s4581_s1 + $0x238] sm:$0xff]  ;;  %v7957_v32 = vld [vmem:[#allocation109_spill] sm:$0xff] }
 0x317   : > { %v2482_v7 = vadd.f32 %v7947_v55, %v2105_v1  ;;  %v2853_v21 = vadd.f32 %v7949_v20, %v2476_v52  ;;  %v2854_v51 = vadd.f32 %v7949_v20, %v2477_v10  ;;  %v2855_v25 = vadd.f32 %v7949_v20, %v2478_v18  ;;  %v1718_v54 = vld [vmem:[%s4581_s1 + $0x240] sm:$0xff]  ;;  %v1719_v1 = vld [vmem:[%s4581_s1 + $0x248] sm:$0xff]  ;;  %v1720_v55 = vld [vmem:[%s4581_s1 + $0x250] sm:$0xff] }
 0x318   : > { %v2856_v57 = vadd.f32 %v7949_v20, %v2479_v46  ;;  %v2065_v49 = vmul.f32 %v1902_v3, %v7950_v60  ;;  %v2857_v22 = vadd.f32 %v7949_v20, %v2480_v59  ;;  %v2858_v14 = vadd.f32 %v7949_v20, %v2481_v45  ;;  %v7958_v10 = vld [vmem:[#allocation217_spill] sm:$0xff]  ;;  %v1721_v30 = vld [vmem:[%s4581_s1 + $0x258] sm:$0xff] }
 0x319   : > { %v2859_v33 = vadd.f32 %v7949_v20, %v2482_v7  ;;  %v3056_v63 = vadd.f32 %v2853_v21, %v1751_v34  ;;  %v3057_v61 = vadd.f32 %v2854_v51, %v1752_v12  ;;  %v3058_v35 = vadd.f32 %v2855_v25, %v1753_v31  ;;  %v7959_v59 = vld [vmem:[#allocation110_spill] sm:$0xff]  ;;  %v7960_v25 = vld [vmem:[#allocation111_spill] sm:$0xff] }
 0x31a   : > { %v3059_v27 = vadd.f32 %v2856_v57, %v1754_v40  ;;  %v2066_v53 = vmul.f32 %v1902_v3, %v7951_v39  ;;  %v3060_v5 = vadd.f32 %v2857_v22, %v1755_v48  ;;  %v3061_v16 = vadd.f32 %v2858_v14, %v1756_v13  ;;  %v1912_v39 = vpop.permute.xlu1 %1911 }
 0x31b   : > { %v3062_v17 = vadd.f32 %v2859_v33, %v1757_v41  ;;  %v3259_v0 = vmax.f32 %v3056_v63, 0.0  ;;  %v3260_v36 = vmax.f32 %v3057_v61, 0.0  ;;  %v3261_v2 = vmax.f32 %v3058_v35, 0.0  ;;  %v7961_v35 = vld [vmem:[#allocation112_spill] sm:$0xff] }
 0x31c   : > { %v3262_v19 = vmax.f32 %v3059_v27, 0.0  ;;  %v2067_v26 = vmul.f32 %v1902_v3, %v7952_v9  ;;  %v3263_v8 = vmax.f32 %v3060_v5, 0.0  ;;  %v3264_v24 = vmax.f32 %v3061_v16, 0.0  ;;  %v7962_v16 = vld [vmem:[#allocation113_spill] sm:$0xff]  ;;  %v7965_v9 = vld [vmem:[#allocation194_spill] sm:$0xff] }
 0x31d   : > { %v3265_v11 = vmax.f32 %v3062_v17, 0.0  ;;  %3462 = vst [vmem:[%s6361_s25 + $0x348] sm:$0xff] %v3259_v0  ;;  %v2068_v44 = vmul.f32 %v1902_v3, %v7953_v43  ;;  %3463 = vst [vmem:[%s6361_s25 + $0x350] sm:$0xff] %v3260_v36  ;;  %v2069_v23 = vmul.f32 %v1902_v3, %v7954_v42  ;;  %v2070_v50 = vmul.f32 %v1902_v3, %v7955_v38  ;;  %v7963_v0 = vld [vmem:[#allocation115_spill] sm:$0xff] }
 0x31e   : > { %3464 = vst [vmem:[%s6361_s25 + $0x358] sm:$0xff] %v3261_v2  ;;  %3465 = vst [vmem:[%s6361_s25 + $0x360] sm:$0xff] %v3262_v19  ;;  %v2441_v4 = vadd.f32 %v7956_v29, %v2064_v58  ;;  %v2442_v62 = vadd.f32 %v7956_v29, %v2065_v49  ;;  %v2443_v56 = vadd.f32 %v7956_v29, %v2066_v53  ;;  %v1722_v58 = vld [vmem:[%s4581_s1 + $0x260] sm:$0xff]  ;;  %v7964_v2 = vld [vmem:[#allocation114_spill] sm:$0xff] }
 0x31f   : > { %3466 = vst [vmem:[%s6361_s25 + $0x368] sm:$0xff] %v3263_v8  ;;  %3467 = vst [vmem:[%s6361_s25 + $0x370] sm:$0xff] %v3264_v24  ;;  %v2444_v28 = vadd.f32 %v7956_v29, %v2067_v26  ;;  %v2445_v47 = vadd.f32 %v7956_v29, %v2068_v44  ;;  %v2113_v3 = vmul.f32 %v1937_v37, %v7957_v32  ;;  %v1766_v43 = vld [vmem:[%s4581_s1 + $0x3c0] sm:$0xff]  ;;  %v1767_v44 = vld [vmem:[%s4581_s1 + $0x3c8] sm:$0xff] }
 0x320   : > { %3468 = vst.msk [vmem:[%s6361_s25 + $0x378] sm:$0xff] %vm548_vm0, %v3265_v11  ;;  %v2446_v52 = vadd.f32 %v7956_v29, %v2069_v23  ;;  %v2447_v34 = vadd.f32 %v7956_v29, %v2070_v50  ;;  %v2818_v18 = vadd.f32 %v7958_v10, %v2441_v4  ;;  %v2819_v46 = vadd.f32 %v7958_v10, %v2442_v62  ;;  %v1765_v11 = vld [vmem:[%s4581_s1 + $0x3b8] sm:$0xff]  ;;  %v1768_v29 = vld [vmem:[%s4581_s1 + $0x3d0] sm:$0xff]  ;;  %v1770_v62 = vld [vmem:[%s4581_s1 + $0x3e0] sm:$0xff] }
 0x321   : > { %v2820_v12 = vadd.f32 %v7958_v10, %v2443_v56  ;;  %v2821_v31 = vadd.f32 %v7958_v10, %v2444_v28  ;;  %v2822_v40 = vadd.f32 %v7958_v10, %v2445_v47  ;;  %v2114_v45 = vmul.f32 %v1937_v37, %v7959_v59  ;;  %v1769_v4 = vld [vmem:[%s4581_s1 + $0x3d8] sm:$0xff]  ;;  %v1771_v32 = vld [vmem:[%s4581_s1 + $0x3e8] sm:$0xff] }
 0x322   : > { %v2823_v7 = vadd.f32 %v7958_v10, %v2446_v52  ;;  %v2824_v20 = vadd.f32 %v7958_v10, %v2447_v34  ;;  %v3021_v21 = vadd.f32 %v2818_v18, %v1716_v6  ;;  %v3022_v48 = vadd.f32 %v2819_v46, %v1717_v15  ;;  %v7967_v15 = vld [vmem:[#allocation224_spill] sm:$0xff] }
 0x323   : > { %v3023_v13 = vadd.f32 %v2820_v12, %v1718_v54  ;;  %v3024_v41 = vadd.f32 %v2821_v31, %v1719_v1  ;;  %v3025_v51 = vadd.f32 %v2822_v40, %v1720_v55  ;;  %v2115_v57 = vmul.f32 %v1937_v37, %v7960_v25  ;;  %v7968_v55 = vld [vmem:[#allocation75_spill] sm:$0xff]  ;;  %v7969_v31 = vld [vmem:[#allocation76_spill] sm:$0xff]  ;;  %v1947_v25 = vpop.permute.xlu0 %1946 }
 0x324   : > { %v3026_v60 = vadd.f32 %v2823_v7, %v1721_v30  ;;  %v3027_v49 = vadd.f32 %v2824_v20, %v1722_v58  ;;  %v3224_v22 = vmax.f32 %v3021_v21, 0.0  ;;  %v3225_v14 = vmax.f32 %v3022_v48, 0.0 }
 0x325   : > { %v3226_v33 = vmax.f32 %v3023_v13, 0.0  ;;  %v3227_v63 = vmax.f32 %v3024_v41, 0.0  ;;  %v3228_v61 = vmax.f32 %v3025_v51, 0.0  ;;  %v2116_v27 = vmul.f32 %v1937_v37, %v7961_v35  ;;  %v7970_v41 = vld [vmem:[#allocation77_spill] sm:$0xff]  ;;  %v7974_v35 = vld [vmem:[#allocation152_spill] sm:$0xff] }
 0x326   : > { %v3229_v53 = vmax.f32 %v3026_v60, 0.0  ;;  %v3230_v5 = vmax.f32 %v3027_v49, 0.0  ;;  %3427 = vst [vmem:[%s6361_s25 + $0x230] sm:$0xff] %v3224_v22  ;;  %3428 = vst [vmem:[%s6361_s25 + $0x238] sm:$0xff] %v3225_v14  ;;  %v2117_v17 = vmul.f32 %v1937_v37, %v7962_v16  ;;  %v2118_v36 = vmul.f32 %v1937_v37, %v7963_v0  ;;  %v7971_v60 = vld [vmem:[#allocation78_spill] sm:$0xff]  ;;  %v7972_v22 = vld [vmem:[#allocation79_spill] sm:$0xff] }
 0x327   : > { %3429 = vst [vmem:[%s6361_s25 + $0x240] sm:$0xff] %v3226_v33  ;;  %3430 = vst [vmem:[%s6361_s25 + $0x248] sm:$0xff] %v3227_v63  ;;  %v2119_v19 = vmul.f32 %v1937_v37, %v7964_v2  ;;  %v2490_v26 = vadd.f32 %v7965_v9, %v2113_v3  ;;  %v2491_v8 = vadd.f32 %v7965_v9, %v2114_v45  ;;  %v7966_v37 = vld [vmem:[#allocation74_spill] sm:$0xff]  ;;  %v7973_v33 = vld [vmem:[#allocation80_spill] sm:$0xff] }
 0x328   : > { %3431 = vst [vmem:[%s6361_s25 + $0x250] sm:$0xff] %v3228_v61  ;;  %v2492_v24 = vadd.f32 %v7965_v9, %v2115_v57  ;;  %3432 = vst [vmem:[%s6361_s25 + $0x258] sm:$0xff] %v3229_v53  ;;  %v2493_v42 = vadd.f32 %v7965_v9, %v2116_v27  ;;  %v2494_v23 = vadd.f32 %v7965_v9, %v2117_v17  ;;  %v1730_v61 = vld [vmem:[%s4581_s1 + $0x2a0] sm:$0xff]  ;;  %v1731_v17 = vld [vmem:[%s4581_s1 + $0x2a8] sm:$0xff] }
 0x329   : > { %3433 = vst.msk [vmem:[%s6361_s25 + $0x260] sm:$0xff] %vm548_vm0, %v3230_v5  ;;  %v2495_v38 = vadd.f32 %v7965_v9, %v2118_v36  ;;  %v2078_v50 = vmul.f32 %v1912_v39, %v7966_v37  ;;  %v2496_v6 = vadd.f32 %v7965_v9, %v2119_v19  ;;  %v2867_v56 = vadd.f32 %v7967_v15, %v2490_v26  ;;  %v1732_v0 = vld [vmem:[%s4581_s1 + $0x2b0] sm:$0xff]  ;;  %v7975_v9 = vld [vmem:[#allocation124_spill] sm:$0xff] }
 0x32a   : > { %v2868_v28 = vadd.f32 %v7967_v15, %v2491_v8  ;;  %v2869_v47 = vadd.f32 %v7967_v15, %v2492_v24  ;;  %v2870_v3 = vadd.f32 %v7967_v15, %v2493_v42  ;;  %v2871_v54 = vadd.f32 %v7967_v15, %v2494_v23  ;;  %v1734_v8 = vld [vmem:[%s4581_s1 + $0x2c0] sm:$0xff]  ;;  %v1735_v24 = vld [vmem:[%s4581_s1 + $0x2c8] sm:$0xff] }
 0x32b   : > { %v2872_v1 = vadd.f32 %v7967_v15, %v2495_v38  ;;  %v2079_v52 = vmul.f32 %v1912_v39, %v7968_v55  ;;  %v2873_v34 = vadd.f32 %v7967_v15, %v2496_v6  ;;  %v3070_v10 = vadd.f32 %v2867_v56, %v1765_v11  ;;  %v1736_v11 = vld [vmem:[%s4581_s1 + $0x2d0] sm:$0xff] }
 0x32c   : > { %v3071_v18 = vadd.f32 %v2868_v28, %v1766_v43  ;;  %v3072_v46 = vadd.f32 %v2869_v47, %v1767_v44  ;;  %v3073_v30 = vadd.f32 %v2870_v3, %v1768_v29  ;;  %v3074_v58 = vadd.f32 %v2871_v54, %v1769_v4  ;;  %v7976_v43 = vld [vmem:[#allocation219_spill] sm:$0xff]  ;;  %v7977_v4 = vld [vmem:[#allocation125_spill] sm:$0xff]  ;;  %v7978_v54 = vld [vmem:[#allocation126_spill] sm:$0xff] }
 0x32d   : > { %v3075_v12 = vadd.f32 %v2872_v1, %v1770_v62  ;;  %v2080_v40 = vmul.f32 %v1912_v39, %v7969_v31  ;;  %v3076_v59 = vadd.f32 %v2873_v34, %v1771_v32  ;;  %v3273_v45 = vmax.f32 %v3070_v10, 0.0 }
 0x32e   : > { %v3274_v7 = vmax.f32 %v3071_v18, 0.0  ;;  %v3275_v20 = vmax.f32 %v3072_v46, 0.0  ;;  %v3276_v21 = vmax.f32 %v3073_v30, 0.0  ;;  %v3277_v48 = vmax.f32 %v3074_v58, 0.0  ;;  %v1922_v18 = vpop.permute.xlu1 %1921 }
 0x32f   : > { %v3278_v13 = vmax.f32 %v3075_v12, 0.0  ;;  %v2081_v51 = vmul.f32 %v1912_v39, %v7970_v41  ;;  %v3279_v57 = vmax.f32 %v3076_v59, 0.0  ;;  %3476 = vst [vmem:[%s6361_s25 + $0x3b8] sm:$0xff] %v3273_v45  ;;  %v2082_v49 = vmul.f32 %v1912_v39, %v7971_v60  ;;  %v7979_v12 = vld [vmem:[#allocation127_spill] sm:$0xff]  ;;  %v7981_v45 = vld [vmem:[#allocation130_spill] sm:$0xff]  ;;  %v1779_v41 = vld [vmem:[%s4581_s1 + $0x428] sm:$0xff] }
 0x330   : > { %3477 = vst [vmem:[%s6361_s25 + $0x3c0] sm:$0xff] %v3274_v7  ;;  %3478 = vst [vmem:[%s6361_s25 + $0x3c8] sm:$0xff] %v3275_v20  ;;  %v2083_v14 = vmul.f32 %v1912_v39, %v7972_v22  ;;  %v2084_v63 = vmul.f32 %v1912_v39, %v7973_v33  ;;  %v2455_v27 = vadd.f32 %v7974_v35, %v2078_v50  ;;  %v1733_v39 = vld [vmem:[%s4581_s1 + $0x2b8] sm:$0xff]  ;;  %v7982_v20 = vld [vmem:[#allocation129_spill] sm:$0xff] }
 0x331   : > { %3479 = vst [vmem:[%s6361_s25 + $0x3d0] sm:$0xff] %v3276_v21  ;;  %3480 = vst [vmem:[%s6361_s25 + $0x3d8] sm:$0xff] %v3277_v48  ;;  %v2456_v53 = vadd.f32 %v7974_v35, %v2079_v52  ;;  %v2457_v5 = vadd.f32 %v7974_v35, %v2080_v40  ;;  %v2458_v16 = vadd.f32 %v7974_v35, %v2081_v51  ;;  %v7980_v40 = vld [vmem:[#allocation128_spill] sm:$0xff]  ;;  %v7983_v48 = vld [vmem:[#allocation203_spill] sm:$0xff] }
 0x332   : > { %3481 = vst [vmem:[%s6361_s25 + $0x3e0] sm:$0xff] %v3278_v13  ;;  %3482 = vst.msk [vmem:[%s6361_s25 + $0x3e8] sm:$0xff] %vm548_vm0, %v3279_v57  ;;  %v2459_v36 = vadd.f32 %v7974_v35, %v2082_v49  ;;  %v2460_v2 = vadd.f32 %v7974_v35, %v2083_v14  ;;  %v2461_v19 = vadd.f32 %v7974_v35, %v2084_v63  ;;  %v7984_v49 = vld [vmem:[#allocation88_spill] sm:$0xff]  ;;  %v1780_v14 = vld [vmem:[%s4581_s1 + $0x430] sm:$0xff] }
 0x333   : > { %v2127_v26 = vmul.f32 %v1947_v25, %v7975_v9  ;;  %v2832_v44 = vadd.f32 %v7976_v43, %v2455_v27  ;;  %v2833_v42 = vadd.f32 %v7976_v43, %v2456_v53  ;;  %v2834_v23 = vadd.f32 %v7976_v43, %v2457_v5  ;;  %v1782_v33 = vld [vmem:[%s4581_s1 + $0x440] sm:$0xff]  ;;  %v7985_v27 = vld [vmem:[#allocation226_spill] sm:$0xff]  ;;  %v1783_v5 = vld [vmem:[%s4581_s1 + $0x448] sm:$0xff] }
 0x334   : > { %v2835_v38 = vadd.f32 %v7976_v43, %v2458_v16  ;;  %v2836_v37 = vadd.f32 %v7976_v43, %v2459_v36  ;;  %v2837_v50 = vadd.f32 %v7976_v43, %v2460_v2  ;;  %v2838_v29 = vadd.f32 %v7976_v43, %v2461_v19  ;;  %v1784_v16 = vld [vmem:[%s4581_s1 + $0x450] sm:$0xff] }
 0x335   : > { %v2128_v62 = vmul.f32 %v1947_v25, %v7977_v4  ;;  %v3035_v6 = vadd.f32 %v2832_v44, %v1730_v61  ;;  %v3036_v15 = vadd.f32 %v2833_v42, %v1731_v17  ;;  %v3037_v56 = vadd.f32 %v2834_v23, %v1732_v0  ;;  %v1785_v17 = vld [vmem:[%s4581_s1 + $0x458] sm:$0xff]  ;;  %v7986_v2 = vld [vmem:[#allocation89_spill] sm:$0xff] }
 0x336   : > { %v3038_v28 = vadd.f32 %v2835_v38, %v1733_v39  ;;  %v3039_v47 = vadd.f32 %v2836_v37, %v1734_v8  ;;  %v3040_v32 = vadd.f32 %v2837_v50, %v1735_v24  ;;  %v3041_v3 = vadd.f32 %v2838_v29, %v1736_v11  ;;  %v7987_v42 = vld [vmem:[#allocation90_spill] sm:$0xff] }
 0x337   : > { %v2129_v1 = vmul.f32 %v1947_v25, %v7978_v54  ;;  %v3238_v55 = vmax.f32 %v3035_v6, 0.0  ;;  %v3239_v52 = vmax.f32 %v3036_v15, 0.0  ;;  %v3240_v34 = vmax.f32 %v3037_v56, 0.0  ;;  %v7988_v15 = vld [vmem:[#allocation91_spill] sm:$0xff]  ;;  %v7989_v54 = vld [vmem:[#allocation92_spill] sm:$0xff] }
 0x338   : > { %v3241_v10 = vmax.f32 %v3038_v28, 0.0  ;;  %v3242_v46 = vmax.f32 %v3039_v47, 0.0  ;;  %v3243_v30 = vmax.f32 %v3040_v32, 0.0  ;;  %v3244_v58 = vmax.f32 %v3041_v3, 0.0  ;;  %v1957_v28 = vpop.permute.xlu0 %1956 }
 0x339   : > { %v2130_v31 = vmul.f32 %v1947_v25, %v7979_v12  ;;  %3441 = vst [vmem:[%s6361_s25 + $0x2a0] sm:$0xff] %v3238_v55  ;;  %3442 = vst [vmem:[%s6361_s25 + $0x2a8] sm:$0xff] %v3239_v52  ;;  %v2131_v59 = vmul.f32 %v1947_v25, %v7980_v40  ;;  %v2132_v7 = vmul.f32 %v1947_v25, %v7981_v45  ;;  %v7990_v55 = vld [vmem:[#allocation94_spill] sm:$0xff] }
 0x33a   : > { %3443 = vst [vmem:[%s6361_s25 + $0x2b0] sm:$0xff] %v3240_v34  ;;  %3444 = vst [vmem:[%s6361_s25 + $0x2b8] sm:$0xff] %v3241_v10  ;;  %v2133_v21 = vmul.f32 %v1947_v25, %v7982_v20  ;;  %v2504_v13 = vadd.f32 %v7983_v48, %v2127_v26  ;;  %v2505_v51 = vadd.f32 %v7983_v48, %v2128_v62  ;;  %v1781_v25 = vld [vmem:[%s4581_s1 + $0x438] sm:$0xff]  ;;  %v7991_v34 = vld [vmem:[#allocation93_spill] sm:$0xff] }
 0x33b   : > { %3445 = vst [vmem:[%s6361_s25 + $0x2c0] sm:$0xff] %v3242_v46  ;;  %3446 = vst [vmem:[%s6361_s25 + $0x2c8] sm:$0xff] %v3243_v30  ;;  %v2506_v57 = vadd.f32 %v7983_v48, %v2129_v1  ;;  %v2507_v60 = vadd.f32 %v7983_v48, %v2130_v31  ;;  %v2092_v22 = vmul.f32 %v1922_v18, %v7984_v49  ;;  %v7992_v46 = vld [vmem:[#allocation163_spill] sm:$0xff]  ;;  %v1744_v12 = vld [vmem:[%s4581_s1 + $0x310] sm:$0xff] }
 0x33c   : > { %3447 = vst.msk [vmem:[%s6361_s25 + $0x2d0] sm:$0xff] %vm548_vm0, %v3244_v58  ;;  %v2508_v63 = vadd.f32 %v7983_v48, %v2131_v59  ;;  %v2509_v61 = vadd.f32 %v7983_v48, %v2132_v7  ;;  %v2510_v35 = vadd.f32 %v7983_v48, %v2133_v21  ;;  %v2881_v53 = vadd.f32 %v7985_v27, %v2504_v13  ;;  %v1745_v31 = vld [vmem:[%s4581_s1 + $0x318] sm:$0xff]  ;;  %v7993_v7 = vld [vmem:[#allocation140_spill] sm:$0xff]  ;;  %v1748_v48 = vld [vmem:[%s4581_s1 + $0x330] sm:$0xff] }
 0x33d   : > { %v2882_v0 = vadd.f32 %v7985_v27, %v2505_v51  ;;  %v2883_v39 = vadd.f32 %v7985_v27, %v2506_v57  ;;  %v2884_v36 = vadd.f32 %v7985_v27, %v2507_v60  ;;  %v2093_v19 = vmul.f32 %v1922_v18, %v7986_v2  ;;  %v1746_v20 = vld [vmem:[%s4581_s1 + $0x320] sm:$0xff]  ;;  %v1747_v21 = vld [vmem:[%s4581_s1 + $0x328] sm:$0xff]  ;;  %v1749_v49 = vld [vmem:[%s4581_s1 + $0x338] sm:$0xff] }
 0x33e   : > { %v2885_v9 = vadd.f32 %v7985_v27, %v2508_v63  ;;  %v2886_v26 = vadd.f32 %v7985_v27, %v2509_v61  ;;  %v2887_v8 = vadd.f32 %v7985_v27, %v2510_v35  ;;  %v3084_v24 = vadd.f32 %v2881_v53, %v1779_v41  ;;  %v7994_v51 = vld [vmem:[#allocation221_spill] sm:$0xff] }
 0x33f   : > { %v3085_v11 = vadd.f32 %v2882_v0, %v1780_v14  ;;  %v3086_v43 = vadd.f32 %v2883_v39, %v1781_v25  ;;  %v3087_v44 = vadd.f32 %v2884_v36, %v1782_v33  ;;  %v2094_v23 = vmul.f32 %v1922_v18, %v7987_v42  ;;  %v7995_v63 = vld [vmem:[#allocation141_spill] sm:$0xff]  ;;  %v7996_v39 = vld [vmem:[#allocation142_spill] sm:$0xff]  ;;  %v1932_v42 = vpop.permute.xlu1 %1931 }
 0x340   : > { %v3088_v38 = vadd.f32 %v2885_v9, %v1783_v5  ;;  %v3089_v37 = vadd.f32 %v2886_v26, %v1784_v16  ;;  %v3090_v50 = vadd.f32 %v2887_v8, %v1785_v17  ;;  %v3287_v29 = vmax.f32 %v3084_v24, 0.0 }
 0x341   : > { %v3288_v4 = vmax.f32 %v3085_v11, 0.0  ;;  %v3289_v62 = vmax.f32 %v3086_v43, 0.0  ;;  %v3290_v6 = vmax.f32 %v3087_v44, 0.0  ;;  %v2095_v56 = vmul.f32 %v1922_v18, %v7988_v15  ;;  %v7997_v43 = vld [vmem:[#allocation144_spill] sm:$0xff]  ;;  %v8001_v15 = vld [vmem:[#allocation209_spill] sm:$0xff] }
 0x342   : > { %v3291_v47 = vmax.f32 %v3088_v38, 0.0  ;;  %v3292_v32 = vmax.f32 %v3089_v37, 0.0  ;;  %v3293_v3 = vmax.f32 %v3090_v50, 0.0  ;;  %3490 = vst [vmem:[%s6361_s25 + $0x428] sm:$0xff] %v3287_v29  ;;  %v2096_v1 = vmul.f32 %v1922_v18, %v7989_v54  ;;  %v7998_v37 = vld [vmem:[#allocation146_spill] sm:$0xff]  ;;  %v7999_v29 = vld [vmem:[#allocation148_spill] sm:$0xff] }
 0x343   : > { %3491 = vst [vmem:[%s6361_s25 + $0x430] sm:$0xff] %v3288_v4  ;;  %3492 = vst [vmem:[%s6361_s25 + $0x438] sm:$0xff] %v3289_v62  ;;  %v2097_v52 = vmul.f32 %v1922_v18, %v7990_v55  ;;  %v2098_v10 = vmul.f32 %v1922_v18, %v7991_v34  ;;  %v2469_v30 = vadd.f32 %v7992_v46, %v2092_v22  ;;  %v1750_v22 = vld [vmem:[%s4581_s1 + $0x340] sm:$0xff] }
 0x344   : > { %3493 = vst [vmem:[%s6361_s25 + $0x440] sm:$0xff] %v3290_v6  ;;  %v2470_v58 = vadd.f32 %v7992_v46, %v2093_v19  ;;  %3494 = vst [vmem:[%s6361_s25 + $0x448] sm:$0xff] %v3291_v47  ;;  %v2471_v40 = vadd.f32 %v7992_v46, %v2094_v23  ;;  %v2472_v59 = vadd.f32 %v7992_v46, %v2095_v56  ;;  %v8000_v62 = vld [vmem:[#allocation147_spill] sm:$0xff] }
 0x345   : > { %3495 = vst [vmem:[%s6361_s25 + $0x450] sm:$0xff] %v3292_v32  ;;  %3496 = vst.msk [vmem:[%s6361_s25 + $0x458] sm:$0xff] %vm548_vm0, %v3293_v3  ;;  %v2473_v45 = vadd.f32 %v7992_v46, %v2096_v1  ;;  %v2141_v18 = vmul.f32 %v1957_v28, %v7993_v7  ;;  %v2474_v13 = vadd.f32 %v7992_v46, %v2097_v52  ;;  %v1793_v3 = vld [vmem:[%s4581_s1 + $0x498] sm:$0xff]  ;;  %v1794_v54 = vld [vmem:[%s4581_s1 + $0x4a0] sm:$0xff] }
 0x346   : > { %v2475_v41 = vadd.f32 %v7992_v46, %v2098_v10  ;;  %v2846_v57 = vadd.f32 %v7994_v51, %v2469_v30  ;;  %v2847_v60 = vadd.f32 %v7994_v51, %v2470_v58  ;;  %v2848_v14 = vadd.f32 %v7994_v51, %v2471_v40  ;;  %v1795_v1 = vld [vmem:[%s4581_s1 + $0x4a8] sm:$0xff]  ;;  %v1796_v46 = vld [vmem:[%s4581_s1 + $0x4b0] sm:$0xff]  ;;  %v1797_v30 = vld [vmem:[%s4581_s1 + $0x4b8] sm:$0xff] }
 0x347   : > { %v2849_v25 = vadd.f32 %v7994_v51, %v2472_v59  ;;  %v2850_v33 = vadd.f32 %v7994_v51, %v2473_v45  ;;  %v2142_v61 = vmul.f32 %v1957_v28, %v7995_v63  ;;  %v2851_v35 = vadd.f32 %v7994_v51, %v2474_v13  ;;  %v1798_v58 = vld [vmem:[%s4581_s1 + $0x4c0] sm:$0xff]  ;;  %v1799_v7 = vld [vmem:[%s4581_s1 + $0x4c8] sm:$0xff] }
 0x348   : > { %v2852_v27 = vadd.f32 %v7994_v51, %v2475_v41  ;;  %v3049_v53 = vadd.f32 %v2846_v57, %v1744_v12  ;;  %v3050_v5 = vadd.f32 %v2847_v60, %v1745_v31  ;;  %v3051_v16 = vadd.f32 %v2848_v14, %v1746_v20  ;;  %v8003_v31 = vld [vmem:[#allocation228_spill] sm:$0xff] }
 0x349   : > { %v3052_v17 = vadd.f32 %v2849_v25, %v1747_v21  ;;  %v3053_v0 = vadd.f32 %v2850_v33, %v1748_v48  ;;  %v2143_v36 = vmul.f32 %v1957_v28, %v7996_v39  ;;  %v3054_v2 = vadd.f32 %v2851_v35, %v1749_v49  ;;  %v8004_v48 = vld [vmem:[#allocation103_spill] sm:$0xff]  ;;  %v8005_v25 = vld [vmem:[#allocation104_spill] sm:$0xff]  ;;  %v1967_v39 = vpop.permute.xlu0 %1966 }
 0x34a   : > { %v3055_v19 = vadd.f32 %v2852_v27, %v1750_v22  ;;  %v3252_v9 = vmax.f32 %v3049_v53, 0.0  ;;  %v3253_v26 = vmax.f32 %v3050_v5, 0.0  ;;  %v3254_v8 = vmax.f32 %v3051_v16, 0.0 }
 0x34b   : > { %v3255_v24 = vmax.f32 %v3052_v17, 0.0  ;;  %v3256_v11 = vmax.f32 %v3053_v0, 0.0  ;;  %v2144_v44 = vmul.f32 %v1957_v28, %v7997_v43  ;;  %v3257_v23 = vmax.f32 %v3054_v2, 0.0  ;;  %v8006_v17 = vld [vmem:[#allocation105_spill] sm:$0xff]  ;;  %v8007_v2 = vld [vmem:[#allocation106_spill] sm:$0xff] }
 0x34c   : > { %v3258_v38 = vmax.f32 %v3055_v19, 0.0  ;;  %3455 = vst [vmem:[%s6361_s25 + $0x310] sm:$0xff] %v3252_v9  ;;  %3456 = vst [vmem:[%s6361_s25 + $0x318] sm:$0xff] %v3253_v26  ;;  %v2145_v50 = vmul.f32 %v1957_v28, %v7998_v37  ;;  %v2146_v4 = vmul.f32 %v1957_v28, %v7999_v29  ;;  %v2147_v6 = vmul.f32 %v1957_v28, %v8000_v62  ;;  %v8002_v28 = vld [vmem:[#allocation102_spill] sm:$0xff]  ;;  %v8008_v9 = vld [vmem:[#allocation108_spill] sm:$0xff] }
 0x34d   : > { %3457 = vst [vmem:[%s6361_s25 + $0x320] sm:$0xff] %v3254_v8  ;;  %3458 = vst [vmem:[%s6361_s25 + $0x328] sm:$0xff] %v3255_v24  ;;  %v2518_v56 = vadd.f32 %v8001_v15, %v2141_v18  ;;  %v2519_v47 = vadd.f32 %v8001_v15, %v2142_v61  ;;  %v2520_v32 = vadd.f32 %v8001_v15, %v2143_v36  ;;  %v8009_v8 = vld [vmem:[#allocation107_spill] sm:$0xff]  ;;  %v8010_v43 = vld [vmem:[#allocation170_spill] sm:$0xff] }
 0x34e   : > { %3459 = vst [vmem:[%s6361_s25 + $0x330] sm:$0xff] %v3256_v11  ;;  %3460 = vst [vmem:[%s6361_s25 + $0x338] sm:$0xff] %v3257_v23  ;;  %v2521_v55 = vadd.f32 %v8001_v15, %v2144_v44  ;;  %v2522_v52 = vadd.f32 %v8001_v15, %v2145_v50  ;;  %v2523_v34 = vadd.f32 %v8001_v15, %v2146_v4  ;;  %v1758_v11 = vld [vmem:[%s4581_s1 + $0x380] sm:$0xff]  ;;  %v1759_v50 = vld [vmem:[%s4581_s1 + $0x388] sm:$0xff] }
 0x34f   : > { %3461 = vst.msk [vmem:[%s6361_s25 + $0x340] sm:$0xff] %vm548_vm0, %v3258_v38  ;;  %v2106_v10 = vmul.f32 %v1932_v42, %v8002_v28  ;;  %v2524_v12 = vadd.f32 %v8001_v15, %v2147_v6  ;;  %v2895_v40 = vadd.f32 %v8003_v31, %v2518_v56  ;;  %v2896_v59 = vadd.f32 %v8003_v31, %v2519_v47  ;;  %v1760_v29 = vld [vmem:[%s4581_s1 + $0x390] sm:$0xff]  ;;  %v1762_v47 = vld [vmem:[%s4581_s1 + $0x3a0] sm:$0xff] }
 0x350   : > { %v2897_v45 = vadd.f32 %v8003_v31, %v2520_v32  ;;  %v2898_v18 = vadd.f32 %v8003_v31, %v2521_v55  ;;  %v2899_v20 = vadd.f32 %v8003_v31, %v2522_v52  ;;  %v2900_v21 = vadd.f32 %v8003_v31, %v2523_v34  ;;  %v8011_v15 = vld [vmem:[#allocation157_spill] sm:$0xff] }
 0x351   : > { %v2107_v13 = vmul.f32 %v1932_v42, %v8004_v48  ;;  %v2901_v41 = vadd.f32 %v8003_v31, %v2524_v12  ;;  %v3098_v51 = vadd.f32 %v2895_v40, %v1793_v3  ;;  %v3099_v57 = vadd.f32 %v2896_v59, %v1794_v54  ;;  %v1763_v32 = vld [vmem:[%s4581_s1 + $0x3a8] sm:$0xff]  ;;  %v1764_v3 = vld [vmem:[%s4581_s1 + $0x3b0] sm:$0xff]  ;;  %v8012_v54 = vld [vmem:[#allocation223_spill] sm:$0xff] }
 0x352   : > { %v3100_v60 = vadd.f32 %v2897_v45, %v1795_v1  ;;  %v3101_v49 = vadd.f32 %v2898_v18, %v1796_v46  ;;  %v3102_v22 = vadd.f32 %v2899_v20, %v1797_v30  ;;  %v3103_v14 = vadd.f32 %v2900_v21, %v1798_v58  ;;  %v8013_v30 = vld [vmem:[#allocation158_spill] sm:$0xff]  ;;  %v8014_v20 = vld [vmem:[#allocation159_spill] sm:$0xff] }
 0x353   : > { %v2108_v33 = vmul.f32 %v1932_v42, %v8005_v25  ;;  %v3104_v63 = vadd.f32 %v2901_v41, %v1799_v7  ;;  %v3301_v61 = vmax.f32 %v3098_v51, 0.0  ;;  %v3302_v35 = vmax.f32 %v3099_v57, 0.0  ;;  %v1942_v57 = vpop.permute.xlu1 %1941 }
 0x354   : > { %v3303_v27 = vmax.f32 %v3100_v60, 0.0  ;;  %v3304_v53 = vmax.f32 %v3101_v49, 0.0  ;;  %v3305_v5 = vmax.f32 %v3102_v22, 0.0  ;;  %v3306_v16 = vmax.f32 %v3103_v14, 0.0  ;;  %v8015_v14 = vld [vmem:[#allocation160_spill] sm:$0xff] }
 0x355   : > { %v2109_v0 = vmul.f32 %v1932_v42, %v8006_v17  ;;  %v3307_v36 = vmax.f32 %v3104_v63, 0.0  ;;  %3504 = vst [vmem:[%s6361_s25 + $0x498] sm:$0xff] %v3301_v61  ;;  %3505 = vst [vmem:[%s6361_s25 + $0x4a0] sm:$0xff] %v3302_v35  ;;  %v2110_v19 = vmul.f32 %v1932_v42, %v8007_v2  ;;  %v2111_v26 = vmul.f32 %v1932_v42, %v8008_v9  ;;  %v8017_v61 = vld [vmem:[#allocation164_spill] sm:$0xff] }
 0x356   : > { %3506 = vst [vmem:[%s6361_s25 + $0x4a8] sm:$0xff] %v3303_v27  ;;  %v2112_v24 = vmul.f32 %v1932_v42, %v8009_v8  ;;  %3507 = vst [vmem:[%s6361_s25 + $0x4b0] sm:$0xff] %v3304_v53  ;;  %v2483_v44 = vadd.f32 %v8010_v43, %v2106_v10  ;;  %v2484_v23 = vadd.f32 %v8010_v43, %v2107_v13  ;;  %v1761_v42 = vld [vmem:[%s4581_s1 + $0x398] sm:$0xff]  ;;  %v1807_v17 = vld [vmem:[%s4581_s1 + $0x508] sm:$0xff] }
 0x357   : > { %3508 = vst [vmem:[%s6361_s25 + $0x4b8] sm:$0xff] %v3305_v5  ;;  %3509 = vst [vmem:[%s6361_s25 + $0x4c0] sm:$0xff] %v3306_v16  ;;  %v2485_v38 = vadd.f32 %v8010_v43, %v2108_v33  ;;  %v2486_v37 = vadd.f32 %v8010_v43, %v2109_v0  ;;  %v2487_v4 = vadd.f32 %v8010_v43, %v2110_v19  ;;  %v8016_v33 = vld [vmem:[#allocation161_spill] sm:$0xff]  ;;  %v8018_v27 = vld [vmem:[#allocation162_spill] sm:$0xff] }
 0x358   : > { %3510 = vst.msk [vmem:[%s6361_s25 + $0x4c8] sm:$0xff] %vm548_vm0, %v3307_v36  ;;  %v2488_v62 = vadd.f32 %v8010_v43, %v2111_v26  ;;  %v2489_v6 = vadd.f32 %v8010_v43, %v2112_v24  ;;  %v2155_v56 = vmul.f32 %v1967_v39, %v8011_v15  ;;  %v2860_v1 = vadd.f32 %v8012_v54, %v2483_v44  ;;  %v8019_v5 = vld [vmem:[#allocation211_spill] sm:$0xff]  ;;  %v8020_v19 = vld [vmem:[#allocation116_spill] sm:$0xff]  ;;  %v1808_v26 = vld [vmem:[%s4581_s1 + $0x510] sm:$0xff] }
 0x359   : > { %v2861_v55 = vadd.f32 %v8012_v54, %v2484_v23  ;;  %v2862_v52 = vadd.f32 %v8012_v54, %v2485_v38  ;;  %v2863_v34 = vadd.f32 %v8012_v54, %v2486_v37  ;;  %v2864_v28 = vadd.f32 %v8012_v54, %v2487_v4  ;;  %v1810_v8 = vld [vmem:[%s4581_s1 + $0x520] sm:$0xff]  ;;  %v8021_v44 = vld [vmem:[#allocation230_spill] sm:$0xff]  ;;  %v1811_v38 = vld [vmem:[%s4581_s1 + $0x528] sm:$0xff] }
 0x35a   : > { %v2865_v10 = vadd.f32 %v8012_v54, %v2488_v62  ;;  %v2866_v46 = vadd.f32 %v8012_v54, %v2489_v6  ;;  %v2156_v58 = vmul.f32 %v1967_v39, %v8013_v30  ;;  %v3063_v12 = vadd.f32 %v2860_v1, %v1758_v11  ;;  %v1812_v37 = vld [vmem:[%s4581_s1 + $0x530] sm:$0xff] }
 0x35b   : > { %v3064_v31 = vadd.f32 %v2861_v55, %v1759_v50  ;;  %v3065_v40 = vadd.f32 %v2862_v52, %v1760_v29  ;;  %v3066_v59 = vadd.f32 %v2863_v34, %v1761_v42  ;;  %v3067_v45 = vadd.f32 %v2864_v28, %v1762_v47  ;;  %v1813_v50 = vld [vmem:[%s4581_s1 + $0x538] sm:$0xff]  ;;  %v8022_v62 = vld [vmem:[#allocation117_spill] sm:$0xff] }
 0x35c   : > { %v3068_v7 = vadd.f32 %v2865_v10, %v1763_v32  ;;  %v3069_v18 = vadd.f32 %v2866_v46, %v1764_v3  ;;  %v2157_v21 = vmul.f32 %v1967_v39, %v8014_v20  ;;  %v3266_v48 = vmax.f32 %v3063_v12, 0.0  ;;  %v8023_v55 = vld [vmem:[#allocation118_spill] sm:$0xff]  ;;  %v8025_v20 = vld [vmem:[#allocation120_spill] sm:$0xff] }
 0x35d   : > { %v3267_v13 = vmax.f32 %v3064_v31, 0.0  ;;  %v3268_v41 = vmax.f32 %v3065_v40, 0.0  ;;  %v3269_v51 = vmax.f32 %v3066_v59, 0.0  ;;  %v3270_v60 = vmax.f32 %v3067_v45, 0.0  ;;  %v8024_v31 = vld [vmem:[#allocation119_spill] sm:$0xff]  ;;  %v1977_v59 = vpop.permute.xlu0 %1976 }
 0x35e   : > { %v3271_v49 = vmax.f32 %v3068_v7, 0.0  ;;  %v3272_v22 = vmax.f32 %v3069_v18, 0.0  ;;  %v2158_v25 = vmul.f32 %v1967_v39, %v8015_v14  ;;  %3469 = vst [vmem:[%s6361_s25 + $0x380] sm:$0xff] %v3266_v48  ;;  %v2159_v63 = vmul.f32 %v1967_v39, %v8016_v33  ;;  %v8026_v48 = vld [vmem:[#allocation122_spill] sm:$0xff] }
 0x35f   : > { %3470 = vst [vmem:[%s6361_s25 + $0x388] sm:$0xff] %v3267_v13  ;;  %3471 = vst [vmem:[%s6361_s25 + $0x390] sm:$0xff] %v3268_v41  ;;  %v2160_v35 = vmul.f32 %v1967_v39, %v8017_v61  ;;  %v2161_v53 = vmul.f32 %v1967_v39, %v8018_v27  ;;  %v2532_v16 = vadd.f32 %v8019_v5, %v2155_v56  ;;  %v1809_v39 = vld [vmem:[%s4581_s1 + $0x518] sm:$0xff]  ;;  %v8027_v41 = vld [vmem:[#allocation121_spill] sm:$0xff] }
 0x360   : > { %3472 = vst [vmem:[%s6361_s25 + $0x398] sm:$0xff] %v3269_v51  ;;  %3473 = vst [vmem:[%s6361_s25 + $0x3a0] sm:$0xff] %v3270_v60  ;;  %v2533_v0 = vadd.f32 %v8019_v5, %v2156_v58  ;;  %v2534_v36 = vadd.f32 %v8019_v5, %v2157_v21  ;;  %v2535_v2 = vadd.f32 %v8019_v5, %v2158_v25  ;;  %v8028_v60 = vld [vmem:[#allocation180_spill] sm:$0xff]  ;;  %v1772_v14 = vld [vmem:[%s4581_s1 + $0x3f0] sm:$0xff] }
 0x361   : > { %3474 = vst [vmem:[%s6361_s25 + $0x3a8] sm:$0xff] %v3271_v49  ;;  %3475 = vst.msk [vmem:[%s6361_s25 + $0x3b0] sm:$0xff] %vm548_vm0, %v3272_v22  ;;  %v2120_v9 = vmul.f32 %v1942_v57, %v8020_v19  ;;  %v2536_v24 = vadd.f32 %v8019_v5, %v2159_v63  ;;  %v2537_v11 = vadd.f32 %v8019_v5, %v2160_v35  ;;  %v1773_v25 = vld [vmem:[%s4581_s1 + $0x3f8] sm:$0xff]  ;;  %v1774_v27 = vld [vmem:[%s4581_s1 + $0x400] sm:$0xff] }
 0x362   : > { %v2538_v43 = vadd.f32 %v8019_v5, %v2161_v53  ;;  %v2909_v23 = vadd.f32 %v8021_v44, %v2532_v16  ;;  %v2910_v29 = vadd.f32 %v8021_v44, %v2533_v0  ;;  %v2911_v42 = vadd.f32 %v8021_v44, %v2534_v36  ;;  %v8029_v35 = vld [vmem:[#allocation174_spill] sm:$0xff]  ;;  %v1775_v53 = vld [vmem:[%s4581_s1 + $0x408] sm:$0xff] }
 0x363   : > { %v2912_v4 = vadd.f32 %v8021_v44, %v2535_v2  ;;  %v2121_v6 = vmul.f32 %v1942_v57, %v8022_v62  ;;  %v2913_v15 = vadd.f32 %v8021_v44, %v2536_v24  ;;  %v2914_v56 = vadd.f32 %v8021_v44, %v2537_v11  ;;  %v1776_v5 = vld [vmem:[%s4581_s1 + $0x410] sm:$0xff]  ;;  %v1777_v19 = vld [vmem:[%s4581_s1 + $0x418] sm:$0xff] }
 0x364   : > { %v2915_v47 = vadd.f32 %v8021_v44, %v2538_v43  ;;  %v3112_v32 = vadd.f32 %v2909_v23, %v1807_v17  ;;  %v3113_v3 = vadd.f32 %v2910_v29, %v1808_v26  ;;  %v3114_v54 = vadd.f32 %v2911_v42, %v1809_v39  ;;  %v8030_v0 = vld [vmem:[#allocation225_spill] sm:$0xff]  ;;  %v8031_v24 = vld [vmem:[#allocation175_spill] sm:$0xff]  ;;  %v8032_v42 = vld [vmem:[#allocation176_spill] sm:$0xff] }
 0x365   : > { %v3115_v1 = vadd.f32 %v2912_v4, %v1810_v8  ;;  %v2122_v52 = vmul.f32 %v1942_v57, %v8023_v55  ;;  %v3116_v34 = vadd.f32 %v2913_v15, %v1811_v38  ;;  %v3117_v28 = vadd.f32 %v2914_v56, %v1812_v37  ;;  %v1952_v55 = vpop.permute.xlu1 %1951 }
 0x366   : > { %v3118_v10 = vadd.f32 %v2915_v47, %v1813_v50  ;;  %v3315_v46 = vmax.f32 %v3112_v32, 0.0  ;;  %v3316_v30 = vmax.f32 %v3113_v3, 0.0  ;;  %v3317_v58 = vmax.f32 %v3114_v54, 0.0  ;;  %v8033_v54 = vld [vmem:[#allocation177_spill] sm:$0xff] }
 0x367   : > { %v3318_v12 = vmax.f32 %v3115_v1, 0.0  ;;  %v2123_v40 = vmul.f32 %v1942_v57, %v8024_v31  ;;  %v3319_v45 = vmax.f32 %v3116_v34, 0.0  ;;  %v3320_v7 = vmax.f32 %v3117_v28, 0.0  ;;  %v8034_v28 = vld [vmem:[#allocation178_spill] sm:$0xff]  ;;  %v8037_v31 = vld [vmem:[#allocation213_spill] sm:$0xff] }
 0x368   : > { %v3321_v18 = vmax.f32 %v3118_v10, 0.0  ;;  %3518 = vst [vmem:[%s6361_s25 + $0x508] sm:$0xff] %v3315_v46  ;;  %v2124_v21 = vmul.f32 %v1942_v57, %v8025_v20  ;;  %3519 = vst [vmem:[%s6361_s25 + $0x510] sm:$0xff] %v3316_v30  ;;  %v2125_v13 = vmul.f32 %v1942_v57, %v8026_v48  ;;  %v2126_v51 = vmul.f32 %v1942_v57, %v8027_v41  ;;  %v8035_v46 = vld [vmem:[#allocation181_spill] sm:$0xff]  ;;  %v1822_v20 = vld [vmem:[%s4581_s1 + $0x580] sm:$0xff] }
 0x369   : > { %3520 = vst [vmem:[%s6361_s25 + $0x518] sm:$0xff] %v3317_v58  ;;  %3521 = vst [vmem:[%s6361_s25 + $0x520] sm:$0xff] %v3318_v12  ;;  %v2497_v49 = vadd.f32 %v8028_v60, %v2120_v9  ;;  %v2498_v22 = vadd.f32 %v8028_v60, %v2121_v6  ;;  %v2499_v33 = vadd.f32 %v8028_v60, %v2122_v52  ;;  %v1778_v9 = vld [vmem:[%s4581_s1 + $0x420] sm:$0xff] }
 0x36a   : > { %3522 = vst [vmem:[%s6361_s25 + $0x528] sm:$0xff] %v3319_v45  ;;  %3523 = vst [vmem:[%s6361_s25 + $0x530] sm:$0xff] %v3320_v7  ;;  %v2500_v63 = vadd.f32 %v8028_v60, %v2123_v40  ;;  %v2501_v61 = vadd.f32 %v8028_v60, %v2124_v21  ;;  %v2169_v57 = vmul.f32 %v1977_v59, %v8029_v35  ;;  %v8036_v58 = vld [vmem:[#allocation179_spill] sm:$0xff]  ;;  %v1823_v21 = vld [vmem:[%s4581_s1 + $0x588] sm:$0xff] }
 0x36b   : > { %3524 = vst.msk [vmem:[%s6361_s25 + $0x538] sm:$0xff] %vm548_vm0, %v3321_v18  ;;  %v2502_v16 = vadd.f32 %v8028_v60, %v2125_v13  ;;  %v2503_v17 = vadd.f32 %v8028_v60, %v2126_v51  ;;  %v2874_v36 = vadd.f32 %v8030_v0, %v2497_v49  ;;  %v2875_v2 = vadd.f32 %v8030_v0, %v2498_v22  ;;  %v1821_v18 = vld [vmem:[%s4581_s1 + $0x578] sm:$0xff]  ;;  %v1824_v60 = vld [vmem:[%s4581_s1 + $0x590] sm:$0xff]  ;;  %v1826_v22 = vld [vmem:[%s4581_s1 + $0x5a0] sm:$0xff] }
 0x36c   : > { %v2876_v26 = vadd.f32 %v8030_v0, %v2499_v33  ;;  %v2877_v39 = vadd.f32 %v8030_v0, %v2500_v63  ;;  %v2878_v8 = vadd.f32 %v8030_v0, %v2501_v61  ;;  %v2170_v11 = vmul.f32 %v1977_v59, %v8031_v24  ;;  %v1825_v49 = vld [vmem:[%s4581_s1 + $0x598] sm:$0xff]  ;;  %v1827_v35 = vld [vmem:[%s4581_s1 + $0x5a8] sm:$0xff] }
 0x36d   : > { %v2879_v43 = vadd.f32 %v8030_v0, %v2502_v16  ;;  %v2880_v44 = vadd.f32 %v8030_v0, %v2503_v17  ;;  %v3077_v23 = vadd.f32 %v2874_v36, %v1772_v14  ;;  %v3078_v38 = vadd.f32 %v2875_v2, %v1773_v25  ;;  %v8039_v25 = vld [vmem:[#allocation232_spill] sm:$0xff] }
 0x36e   : > { %v3079_v37 = vadd.f32 %v2876_v26, %v1774_v27  ;;  %v3080_v50 = vadd.f32 %v2877_v39, %v1775_v53  ;;  %v3081_v29 = vadd.f32 %v2878_v8, %v1776_v5  ;;  %v2171_v4 = vmul.f32 %v1977_v59, %v8032_v42  ;;  %v8040_v5 = vld [vmem:[#allocation133_spill] sm:$0xff]  ;;  %v8041_v39 = vld [vmem:[#allocation134_spill] sm:$0xff]  ;;  %v1987_v42 = vpop.permute.xlu0 %1986 }
 0x36f   : > { %v3082_v62 = vadd.f32 %v2879_v43, %v1777_v19  ;;  %v3083_v6 = vadd.f32 %v2880_v44, %v1778_v9  ;;  %v3280_v15 = vmax.f32 %v3077_v23, 0.0  ;;  %v3281_v56 = vmax.f32 %v3078_v38, 0.0 }
 0x370   : > { %v3282_v47 = vmax.f32 %v3079_v37, 0.0  ;;  %v3283_v32 = vmax.f32 %v3080_v50, 0.0  ;;  %v3284_v3 = vmax.f32 %v3081_v29, 0.0  ;;  %v2172_v1 = vmul.f32 %v1977_v59, %v8033_v54  ;;  %v8042_v50 = vld [vmem:[#allocation135_spill] sm:$0xff]  ;;  %v8046_v54 = vld [vmem:[#allocation189_spill] sm:$0xff] }
 0x371   : > { %v3285_v52 = vmax.f32 %v3082_v62, 0.0  ;;  %v3286_v34 = vmax.f32 %v3083_v6, 0.0  ;;  %3483 = vst [vmem:[%s6361_s25 + $0x3f0] sm:$0xff] %v3280_v15  ;;  %3484 = vst [vmem:[%s6361_s25 + $0x3f8] sm:$0xff] %v3281_v56  ;;  %v2173_v10 = vmul.f32 %v1977_v59, %v8034_v28  ;;  %v2174_v30 = vmul.f32 %v1977_v59, %v8035_v46  ;;  %v8043_v62 = vld [vmem:[#allocation137_spill] sm:$0xff]  ;;  %v8044_v15 = vld [vmem:[#allocation139_spill] sm:$0xff] }
 0x372   : > { %3485 = vst [vmem:[%s6361_s25 + $0x400] sm:$0xff] %v3282_v47  ;;  %3486 = vst [vmem:[%s6361_s25 + $0x408] sm:$0xff] %v3283_v32  ;;  %v2175_v12 = vmul.f32 %v1977_v59, %v8036_v58  ;;  %v2546_v40 = vadd.f32 %v8037_v31, %v2169_v57  ;;  %v2547_v45 = vadd.f32 %v8037_v31, %v2170_v11  ;;  %v8038_v59 = vld [vmem:[#allocation131_spill] sm:$0xff]  ;;  %v8045_v47 = vld [vmem:[#allocation138_spill] sm:$0xff] }
 0x373   : > { %3487 = vst [vmem:[%s6361_s25 + $0x410] sm:$0xff] %v3284_v3  ;;  %v2548_v7 = vadd.f32 %v8037_v31, %v2171_v4  ;;  %3488 = vst [vmem:[%s6361_s25 + $0x418] sm:$0xff] %v3285_v52  ;;  %v2549_v48 = vadd.f32 %v8037_v31, %v2172_v1  ;;  %v2550_v13 = vadd.f32 %v8037_v31, %v2173_v10  ;;  %v1786_v3 = vld [vmem:[%s4581_s1 + $0x460] sm:$0xff]  ;;  %v1787_v10 = vld [vmem:[%s4581_s1 + $0x468] sm:$0xff] }
 0x374   : > { %3489 = vst.msk [vmem:[%s6361_s25 + $0x420] sm:$0xff] %vm548_vm0, %v3286_v34  ;;  %v2551_v41 = vadd.f32 %v8037_v31, %v2174_v30  ;;  %v2134_v51 = vmul.f32 %v1952_v55, %v8038_v59  ;;  %v2552_v14 = vadd.f32 %v8037_v31, %v2175_v12  ;;  %v2923_v33 = vadd.f32 %v8039_v25, %v2546_v40  ;;  %v1788_v46 = vld [vmem:[%s4581_s1 + $0x470] sm:$0xff] }
 0x375   : > { %v2924_v63 = vadd.f32 %v8039_v25, %v2547_v45  ;;  %v2925_v61 = vadd.f32 %v8039_v25, %v2548_v7  ;;  %v2926_v57 = vadd.f32 %v8039_v25, %v2549_v48  ;;  %v2927_v27 = vadd.f32 %v8039_v25, %v2550_v13  ;;  %v8047_v31 = vld [vmem:[#allocation190_spill] sm:$0xff]  ;;  %v1790_v45 = vld [vmem:[%s4581_s1 + $0x480] sm:$0xff]  ;;  %v1791_v7 = vld [vmem:[%s4581_s1 + $0x488] sm:$0xff] }
 0x376   : > { %v2928_v53 = vadd.f32 %v8039_v25, %v2551_v41  ;;  %v2135_v16 = vmul.f32 %v1952_v55, %v8040_v5  ;;  %v2929_v17 = vadd.f32 %v8039_v25, %v2552_v14  ;;  %v3126_v0 = vadd.f32 %v2923_v33, %v1821_v18  ;;  %v1792_v18 = vld [vmem:[%s4581_s1 + $0x490] sm:$0xff]  ;;  %v1962_v5 = vpop.permute.xlu1 %1961 }
 0x377   : > { %v3127_v36 = vadd.f32 %v2924_v63, %v1822_v20  ;;  %v3128_v2 = vadd.f32 %v2925_v61, %v1823_v21  ;;  %v3129_v19 = vadd.f32 %v2926_v57, %v1824_v60  ;;  %v3130_v9 = vadd.f32 %v2927_v27, %v1825_v49  ;;  %v8048_v20 = vld [vmem:[#allocation227_spill] sm:$0xff]  ;;  %v8050_v27 = vld [vmem:[#allocation192_spill] sm:$0xff] }
 0x378   : > { %v3131_v26 = vadd.f32 %v2928_v53, %v1826_v22  ;;  %v2136_v8 = vmul.f32 %v1952_v55, %v8041_v39  ;;  %v3132_v24 = vadd.f32 %v2929_v17, %v1827_v35  ;;  %v3329_v11 = vmax.f32 %v3126_v0, 0.0  ;;  %v8049_v49 = vld [vmem:[#allocation191_spill] sm:$0xff] }
 0x379   : > { %v3330_v43 = vmax.f32 %v3127_v36, 0.0  ;;  %v3331_v44 = vmax.f32 %v3128_v2, 0.0  ;;  %v3332_v23 = vmax.f32 %v3129_v19, 0.0  ;;  %v3333_v38 = vmax.f32 %v3130_v9, 0.0 }
 0x37a   : > { %v3334_v37 = vmax.f32 %v3131_v26, 0.0  ;;  %v2137_v29 = vmul.f32 %v1952_v55, %v8042_v50  ;;  %v3335_v4 = vmax.f32 %v3132_v24, 0.0  ;;  %3532 = vst [vmem:[%s6361_s25 + $0x578] sm:$0xff] %v3329_v11  ;;  %v2138_v6 = vmul.f32 %v1952_v55, %v8043_v62  ;;  %v8051_v26 = vld [vmem:[#allocation193_spill] sm:$0xff]  ;;  %v8053_v11 = vld [vmem:[#allocation202_spill] sm:$0xff] }
 0x37b   : > { %3533 = vst [vmem:[%s6361_s25 + $0x580] sm:$0xff] %v3330_v43  ;;  %3534 = vst [vmem:[%s6361_s25 + $0x588] sm:$0xff] %v3331_v44  ;;  %v2139_v56 = vmul.f32 %v1952_v55, %v8044_v15  ;;  %v2140_v32 = vmul.f32 %v1952_v55, %v8045_v47  ;;  %v2511_v1 = vadd.f32 %v8046_v54, %v2134_v51  ;;  %v1789_v55 = vld [vmem:[%s4581_s1 + $0x478] sm:$0xff]  ;;  %v8054_v44 = vld [vmem:[#allocation197_spill] sm:$0xff] }
 0x37c   : > { %3535 = vst [vmem:[%s6361_s25 + $0x590] sm:$0xff] %v3332_v23  ;;  %3536 = vst [vmem:[%s6361_s25 + $0x598] sm:$0xff] %v3333_v38  ;;  %v2512_v52 = vadd.f32 %v8046_v54, %v2135_v16  ;;  %v2513_v34 = vadd.f32 %v8046_v54, %v2136_v8  ;;  %v2514_v28 = vadd.f32 %v8046_v54, %v2137_v29  ;;  %v8052_v8 = vld [vmem:[#allocation196_spill] sm:$0xff]  ;;  %v8055_v38 = vld [vmem:[#allocation149_spill] sm:$0xff] }
 0x37d   : > { %3537 = vst [vmem:[%s6361_s25 + $0x5a0] sm:$0xff] %v3334_v37  ;;  %3538 = vst.msk [vmem:[%s6361_s25 + $0x5a8] sm:$0xff] %vm548_vm0, %v3335_v4  ;;  %v2515_v30 = vadd.f32 %v8046_v54, %v2138_v6  ;;  %v2516_v58 = vadd.f32 %v8046_v54, %v2139_v56  ;;  %v2517_v12 = vadd.f32 %v8046_v54, %v2140_v32  ;;  %v8056_v50 = vld [vmem:[#allocation150_spill] sm:$0xff]  ;;  %v8057_v4 = vld [vmem:[#allocation151_spill] sm:$0xff] }
 0x37e   : > { %v2183_v40 = vmul.f32 %v1987_v42, %v8047_v31  ;;  %v2888_v21 = vadd.f32 %v8048_v20, %v2511_v1  ;;  %v2889_v48 = vadd.f32 %v8048_v20, %v2512_v52  ;;  %v2890_v13 = vadd.f32 %v8048_v20, %v2513_v34  ;;  %v8058_v6 = vld [vmem:[#allocation153_spill] sm:$0xff]  ;;  %v8059_v56 = vld [vmem:[#allocation155_spill] sm:$0xff]  ;;  %v8060_v32 = vld [vmem:[#allocation156_spill] sm:$0xff] }
 0x37f   : > { %v2891_v41 = vadd.f32 %v8048_v20, %v2514_v28  ;;  %v2892_v59 = vadd.f32 %v8048_v20, %v2515_v30  ;;  %v2893_v51 = vadd.f32 %v8048_v20, %v2516_v58  ;;  %v2894_v60 = vadd.f32 %v8048_v20, %v2517_v12  ;;  %v8062_v1 = vld [vmem:[#allocation199_spill] sm:$0xff]  ;;  %v8063_v34 = vld [vmem:[#allocation214_spill] sm:$0xff] }
 0x380   : > { %v2184_v22 = vmul.f32 %v1987_v42, %v8049_v49  ;;  %v3091_v14 = vadd.f32 %v2888_v21, %v1786_v3  ;;  %v3092_v25 = vadd.f32 %v2889_v48, %v1787_v10  ;;  %v3093_v33 = vadd.f32 %v2890_v13, %v1788_v46  ;;  %v8061_v3 = vld [vmem:[#allocation154_spill] sm:$0xff]  ;;  %v1802_v31 = vld [vmem:[%s4581_s1 + $0x4e0] sm:$0xff]  ;;  %v8064_v21 = vld [vmem:[#allocation229_spill] sm:$0xff] }
 0x381   : > { %v3094_v63 = vadd.f32 %v2891_v41, %v1789_v55  ;;  %v3095_v61 = vadd.f32 %v2892_v59, %v1790_v45  ;;  %v3096_v35 = vadd.f32 %v2893_v51, %v1791_v7  ;;  %v3097_v57 = vadd.f32 %v2894_v60, %v1792_v18  ;;  %v1800_v10 = vld [vmem:[%s4581_s1 + $0x4d0] sm:$0xff]  ;;  %v1801_v46 = vld [vmem:[%s4581_s1 + $0x4d8] sm:$0xff]  ;;  %v1803_v45 = vld [vmem:[%s4581_s1 + $0x4e8] sm:$0xff] }
 0x382   : > { %v2185_v53 = vmul.f32 %v1987_v42, %v8050_v27  ;;  %v3294_v16 = vmax.f32 %v3091_v14, 0.0  ;;  %v3295_v17 = vmax.f32 %v3092_v25, 0.0  ;;  %v3296_v0 = vmax.f32 %v3093_v33, 0.0  ;;  %v1804_v7 = vld [vmem:[%s4581_s1 + $0x4f0] sm:$0xff]  ;;  %v1805_v13 = vld [vmem:[%s4581_s1 + $0x4f8] sm:$0xff]  ;;  %v1806_v41 = vld [vmem:[%s4581_s1 + $0x500] sm:$0xff] }
 0x383   : > { %v3297_v36 = vmax.f32 %v3094_v63, 0.0  ;;  %v3298_v2 = vmax.f32 %v3095_v61, 0.0  ;;  %v3299_v19 = vmax.f32 %v3096_v35, 0.0  ;;  %v3300_v9 = vmax.f32 %v3097_v57, 0.0 }
 0x384   : > { %v2186_v39 = vmul.f32 %v1987_v42, %v8051_v26  ;;  %3497 = vst [vmem:[%s6361_s25 + $0x460] sm:$0xff] %v3294_v16  ;;  %3498 = vst [vmem:[%s6361_s25 + $0x468] sm:$0xff] %v3295_v17  ;;  %v2187_v24 = vmul.f32 %v1987_v42, %v8052_v8  ;;  %v2188_v43 = vmul.f32 %v1987_v42, %v8053_v11  ;;  %v1835_v11 = vld [vmem:[%s4581_s1 + $0x5e8] sm:$0xff] }
 0x385   : > { %3499 = vst [vmem:[%s6361_s25 + $0x470] sm:$0xff] %v3296_v0  ;;  %3500 = vst [vmem:[%s6361_s25 + $0x478] sm:$0xff] %v3297_v36  ;;  %v7197_v23 = vmul.f32 %v1987_v42, %v8054_v44  ;;  %v2148_v37 = vmul.f32 %v1962_v5, %v8055_v38  ;;  %v2149_v29 = vmul.f32 %v1962_v5, %v8056_v50  ;;  %v2741_v0 = vpop.permute.xlu0 %2740  ;;  %v1836_v44 = vld [vmem:[%s4581_s1 + $0x5f0] sm:$0xff]  ;;  %v1838_v50 = vld [vmem:[%s4581_s1 + $0x600] sm:$0xff] }
 0x386   : > { %3501 = vst [vmem:[%s6361_s25 + $0x480] sm:$0xff] %v3298_v2  ;;  %3502 = vst [vmem:[%s6361_s25 + $0x488] sm:$0xff] %v3299_v19  ;;  %v2150_v62 = vmul.f32 %v1962_v5, %v8057_v4  ;;  %v2151_v15 = vmul.f32 %v1962_v5, %v8058_v6  ;;  %v2152_v47 = vmul.f32 %v1962_v5, %v8059_v56  ;;  %v1840_v4 = vld [vmem:[%s4581_s1 + $0x610] sm:$0xff] }
 0x387   : > { %3503 = vst.msk [vmem:[%s6361_s25 + $0x490] sm:$0xff] %vm548_vm0, %v3300_v9  ;;  %v2153_v42 = vmul.f32 %v1962_v5, %v8060_v32  ;;  %v2154_v54 = vmul.f32 %v1962_v5, %v8061_v3  ;;  %v2525_v52 = vadd.f32 %v8062_v1, %v2148_v37  ;;  %v2560_v28 = vadd.f32 %v8063_v34, %v2183_v40  ;;  %v1972_v9 = vpop.permute.xlu1 %1971 }
 0x388   : > { %v2526_v55 = vadd.f32 %v8062_v1, %v2149_v29  ;;  %v2527_v30 = vadd.f32 %v8062_v1, %v2150_v62  ;;  %v2528_v58 = vadd.f32 %v8062_v1, %v2151_v15  ;;  %v2529_v12 = vadd.f32 %v8062_v1, %v2152_v47  ;;  %v1839_v29 = vld [vmem:[%s4581_s1 + $0x608] sm:$0xff]  ;;  %v1841_v47 = vld [vmem:[%s4581_s1 + $0x618] sm:$0xff] }
 0x389   : > { %v2530_v18 = vadd.f32 %v8062_v1, %v2153_v42  ;;  %v2531_v20 = vadd.f32 %v8062_v1, %v2154_v54  ;;  %v2902_v48 = vadd.f32 %v8064_v21, %v2525_v52  ;;  %v2561_v40 = vadd.f32 %v8063_v34, %v2184_v22  ;;  %v8065_v42 = vld [vmem:[#allocation165_spill] sm:$0xff] }
 0x38a   : > { %v2903_v59 = vadd.f32 %v8064_v21, %v2526_v55  ;;  %v2904_v51 = vadd.f32 %v8064_v21, %v2527_v30  ;;  %v2905_v60 = vadd.f32 %v8064_v21, %v2528_v58  ;;  %v2906_v49 = vadd.f32 %v8064_v21, %v2529_v12 }
 0x38b   : > { %v2907_v14 = vadd.f32 %v8064_v21, %v2530_v18  ;;  %v2908_v25 = vadd.f32 %v8064_v21, %v2531_v20  ;;  %v3105_v33 = vadd.f32 %v2902_v48, %v1800_v10  ;;  %v2562_v63 = vadd.f32 %v8063_v34, %v2185_v53  ;;  %v8067_v20 = vld [vmem:[#allocation167_spill] sm:$0xff]  ;;  %v1982_v48 = vpop.permute.xlu1 %1981 }
 0x38c   : > { %v3106_v61 = vadd.f32 %v2903_v59, %v1801_v46  ;;  %v3107_v22 = vadd.f32 %v2904_v51, %v1802_v31  ;;  %v3108_v35 = vadd.f32 %v2905_v60, %v1803_v45  ;;  %v3109_v57 = vadd.f32 %v2906_v49, %v1804_v7  ;;  %v8069_v59 = vld [vmem:[#allocation169_spill] sm:$0xff]  ;;  %v8070_v60 = vld [vmem:[#allocation172_spill] sm:$0xff] }
 0x38d   : > { %v3110_v27 = vadd.f32 %v2907_v14, %v1805_v13  ;;  %v3111_v5 = vadd.f32 %v2908_v25, %v1806_v41  ;;  %v3308_v16 = vmax.f32 %v3105_v33, 0.0  ;;  %v2563_v17 = vadd.f32 %v8063_v34, %v2186_v39  ;;  %v1837_v39 = vld [vmem:[%s4581_s1 + $0x5f8] sm:$0xff]  ;;  %v8068_v13 = vld [vmem:[#allocation168_spill] sm:$0xff] }
 0x38e   : > { %v3309_v36 = vmax.f32 %v3106_v61, 0.0  ;;  %v3310_v53 = vmax.f32 %v3107_v22, 0.0  ;;  %v3311_v2 = vmax.f32 %v3108_v35, 0.0  ;;  %v3312_v19 = vmax.f32 %v3109_v57, 0.0  ;;  %v8071_v14 = vld [vmem:[#allocation171_spill] sm:$0xff]  ;;  %v1815_v57 = vld [vmem:[%s4581_s1 + $0x548] sm:$0xff] }
 0x38f   : > { %v3313_v26 = vmax.f32 %v3110_v27, 0.0  ;;  %v3314_v8 = vmax.f32 %v3111_v5, 0.0  ;;  %3511 = vst [vmem:[%s6361_s25 + $0x4d0] sm:$0xff] %v3308_v16  ;;  %v2564_v38 = vadd.f32 %v8063_v34, %v2187_v24  ;;  %v2565_v37 = vadd.f32 %v8063_v34, %v2188_v43  ;;  %v8072_v33 = vld [vmem:[#allocation207_spill] sm:$0xff]  ;;  %v1816_v27 = vld [vmem:[%s4581_s1 + $0x550] sm:$0xff] }
 0x390   : > { %3512 = vst [vmem:[%s6361_s25 + $0x4d8] sm:$0xff] %v3309_v36  ;;  %3513 = vst [vmem:[%s6361_s25 + $0x4e0] sm:$0xff] %v3310_v53  ;;  %v2566_v62 = vadd.f32 %v8063_v34, %v7197_v23  ;;  %v2937_v6 = vadd.f32 %v2741_v0, %v2560_v28  ;;  %v2938_v15 = vadd.f32 %v2741_v0, %v2561_v40  ;;  %v8066_v28 = vld [vmem:[#allocation166_spill] sm:$0xff]  ;;  %v1814_v35 = vld [vmem:[%s4581_s1 + $0x540] sm:$0xff] }
 0x391   : > { %3514 = vst [vmem:[%s6361_s25 + $0x4e8] sm:$0xff] %v3311_v2  ;;  %3515 = vst [vmem:[%s6361_s25 + $0x4f0] sm:$0xff] %v3312_v19  ;;  %v2939_v56 = vadd.f32 %v2741_v0, %v2562_v63  ;;  %v2940_v24 = vadd.f32 %v2741_v0, %v2563_v17  ;;  %v2941_v32 = vadd.f32 %v2741_v0, %v2564_v38  ;;  %v1817_v53 = vld [vmem:[%s4581_s1 + $0x558] sm:$0xff]  ;;  %v1818_v2 = vld [vmem:[%s4581_s1 + $0x560] sm:$0xff] }
 0x392   : > { %3516 = vst [vmem:[%s6361_s25 + $0x4f8] sm:$0xff] %v3313_v26  ;;  %3517 = vst.msk [vmem:[%s6361_s25 + $0x500] sm:$0xff] %vm548_vm0, %v3314_v8  ;;  %v2942_v43 = vadd.f32 %v2741_v0, %v2565_v37  ;;  %v2162_v3 = vmul.f32 %v1972_v9, %v8065_v42  ;;  %v2943_v54 = vadd.f32 %v2741_v0, %v2566_v62  ;;  %v8073_v0 = vld [vmem:[#allocation182_spill] sm:$0xff]  ;;  %v1819_v19 = vld [vmem:[%s4581_s1 + $0x568] sm:$0xff] }
 0x393   : > { %v3140_v1 = vadd.f32 %v2937_v6, %v1835_v11  ;;  %v3141_v52 = vadd.f32 %v2938_v15, %v1836_v44  ;;  %v3142_v10 = vadd.f32 %v2939_v56, %v1837_v39  ;;  %v3143_v46 = vadd.f32 %v2940_v24, %v1838_v50  ;;  %v8074_v26 = vld [vmem:[#allocation231_spill] sm:$0xff]  ;;  %v1820_v39 = vld [vmem:[%s4581_s1 + $0x570] sm:$0xff] }
 0x394   : > { %v3144_v23 = vadd.f32 %v2941_v32, %v1839_v29  ;;  %v3145_v34 = vadd.f32 %v2942_v43, %v1840_v4  ;;  %v2163_v55 = vmul.f32 %v1972_v9, %v8066_v28  ;;  %v3146_v30 = vadd.f32 %v2943_v54, %v1841_v47  ;;  %v8075_v29 = vld [vmem:[#allocation183_spill] sm:$0xff]  ;;  %v8076_v43 = vld [vmem:[#allocation185_spill] sm:$0xff] }
 0x395   : > { %v3343_v58 = vmax.f32 %v3140_v1, 0.0  ;;  %v3344_v12 = vmax.f32 %v3141_v52, 0.0  ;;  %v3345_v31 = vmax.f32 %v3142_v10, 0.0  ;;  %v3346_v45 = vmax.f32 %v3143_v46, 0.0 }
 0x396   : > { %v3347_v7 = vmax.f32 %v3144_v23, 0.0  ;;  %v3348_v18 = vmax.f32 %v3145_v34, 0.0  ;;  %v2164_v21 = vmul.f32 %v1972_v9, %v8067_v20  ;;  %v3349_v40 = vmax.f32 %v3146_v30, 0.0  ;;  %v8077_v34 = vld [vmem:[#allocation186_spill] sm:$0xff] }
 0x397   : > { %3546 = vst [vmem:[%s6361_s25 + $0x5e8] sm:$0xff] %v3343_v58  ;;  %3547 = vst [vmem:[%s6361_s25 + $0x5f0] sm:$0xff] %v3344_v12  ;;  %v2165_v41 = vmul.f32 %v1972_v9, %v8068_v13  ;;  %v2166_v51 = vmul.f32 %v1972_v9, %v8069_v59  ;;  %v2167_v49 = vmul.f32 %v1972_v9, %v8070_v60  ;;  %v8078_v58 = vld [vmem:[#allocation187_spill] sm:$0xff]  ;;  %v1828_v20 = vld [vmem:[%s4581_s1 + $0x5b0] sm:$0xff] }
 0x398   : > { %3548 = vst [vmem:[%s6361_s25 + $0x5f8] sm:$0xff] %v3345_v31  ;;  %3549 = vst [vmem:[%s6361_s25 + $0x600] sm:$0xff] %v3346_v45  ;;  %v2168_v25 = vmul.f32 %v1972_v9, %v8071_v14  ;;  %v2539_v63 = vadd.f32 %v8072_v33, %v2162_v3  ;;  %v2540_v61 = vadd.f32 %v8072_v33, %v2163_v55  ;;  %v1992_v55 = vpop.permute.xlu1 %1991  ;;  %v8079_v31 = vld [vmem:[#allocation195_spill] sm:$0xff] }
 0x399   : > { %3550 = vst [vmem:[%s6361_s25 + $0x608] sm:$0xff] %v3347_v7  ;;  %3551 = vst [vmem:[%s6361_s25 + $0x610] sm:$0xff] %v3348_v18  ;;  %v2541_v22 = vadd.f32 %v8072_v33, %v2164_v21  ;;  %v2542_v5 = vadd.f32 %v8072_v33, %v2165_v41  ;;  %v2543_v16 = vadd.f32 %v8072_v33, %v2166_v51  ;;  %v8080_v7 = vld [vmem:[#allocation188_spill] sm:$0xff]  ;;  %v8081_v21 = vld [vmem:[#allocation210_spill] sm:$0xff] }
 0x39a   : > { %3552 = vst.msk [vmem:[%s6361_s25 + $0x618] sm:$0xff] %vm548_vm0, %v3349_v40  ;;  %v2544_v17 = vadd.f32 %v8072_v33, %v2167_v49  ;;  %v2176_v36 = vmul.f32 %v1982_v48, %v8073_v0  ;;  %v2545_v9 = vadd.f32 %v8072_v33, %v2168_v25  ;;  %v2916_v8 = vadd.f32 %v8074_v26, %v2539_v63  ;;  %v1829_v51 = vld [vmem:[%s4581_s1 + $0x5b8] sm:$0xff]  ;;  %v1830_v60 = vld [vmem:[%s4581_s1 + $0x5c0] sm:$0xff] }
 0x39b   : > { %v2917_v11 = vadd.f32 %v8074_v26, %v2540_v61  ;;  %v2918_v44 = vadd.f32 %v8074_v26, %v2541_v22  ;;  %v2919_v38 = vadd.f32 %v8074_v26, %v2542_v5  ;;  %v2920_v37 = vadd.f32 %v8074_v26, %v2543_v16  ;;  %v8082_v33 = vld [vmem:[#allocation198_spill] sm:$0xff] }
 0x39c   : > { %v2921_v50 = vadd.f32 %v8074_v26, %v2544_v17  ;;  %v2177_v4 = vmul.f32 %v1982_v48, %v8075_v29  ;;  %v2922_v62 = vadd.f32 %v8074_v26, %v2545_v9  ;;  %v3119_v6 = vadd.f32 %v2916_v8, %v1814_v35  ;;  %v1832_v61 = vld [vmem:[%s4581_s1 + $0x5d0] sm:$0xff]  ;;  %v1833_v22 = vld [vmem:[%s4581_s1 + $0x5d8] sm:$0xff]  ;;  %v1834_v35 = vld [vmem:[%s4581_s1 + $0x5e0] sm:$0xff] }
 0x39d   : > { %v3120_v15 = vadd.f32 %v2917_v11, %v1815_v57  ;;  %v3121_v56 = vadd.f32 %v2918_v44, %v1816_v27  ;;  %v3122_v47 = vadd.f32 %v2919_v38, %v1817_v53  ;;  %v3123_v24 = vadd.f32 %v2920_v37, %v1818_v2  ;;  %v8083_v57 = vld [vmem:[#allocation233_spill] sm:$0xff]  ;;  %v8084_v2 = vld [vmem:[#allocation200_spill] sm:$0xff] }
 0x39e   : > { %v3124_v32 = vadd.f32 %v2921_v50, %v1819_v19  ;;  %v2178_v42 = vmul.f32 %v1982_v48, %v8076_v43  ;;  %v3125_v3 = vadd.f32 %v2922_v62, %v1820_v39  ;;  %v3322_v54 = vmax.f32 %v3119_v6, 0.0  ;;  %v8085_v37 = vld [vmem:[#allocation201_spill] sm:$0xff]  ;;  %v2746_v43 = vpop.permute.xlu1 %2745 }
 0x39f   : > { %v3323_v1 = vmax.f32 %v3120_v15, 0.0  ;;  %v3324_v52 = vmax.f32 %v3121_v56, 0.0  ;;  %v3325_v10 = vmax.f32 %v3122_v47, 0.0  ;;  %v3326_v46 = vmax.f32 %v3123_v24, 0.0  ;;  %v8086_v24 = vld [vmem:[#allocation204_spill] sm:$0xff] }
 0x3a0   : > { %v3327_v23 = vmax.f32 %v3124_v32, 0.0  ;;  %v2179_v28 = vmul.f32 %v1982_v48, %v8077_v34  ;;  %v3328_v30 = vmax.f32 %v3125_v3, 0.0  ;;  %3525 = vst [vmem:[%s6361_s25 + $0x540] sm:$0xff] %v3322_v54  ;;  %v2180_v12 = vmul.f32 %v1982_v48, %v8078_v58  ;;  %v8088_v54 = vld [vmem:[#allocation208_spill] sm:$0xff] }
 0x3a1   : > { %3526 = vst [vmem:[%s6361_s25 + $0x548] sm:$0xff] %v3323_v1  ;;  %3527 = vst [vmem:[%s6361_s25 + $0x550] sm:$0xff] %v3324_v52  ;;  %v2181_v45 = vmul.f32 %v1982_v48, %v8079_v31  ;;  %v2182_v18 = vmul.f32 %v1982_v48, %v8080_v7  ;;  %v2553_v40 = vadd.f32 %v8081_v21, %v2176_v36  ;;  %v1831_v48 = vld [vmem:[%s4581_s1 + $0x5c8] sm:$0xff]  ;;  %v8089_v52 = vld [vmem:[#allocation206_spill] sm:$0xff] }
 0x3a2   : > { %3528 = vst [vmem:[%s6361_s25 + $0x558] sm:$0xff] %v3325_v10  ;;  %3529 = vst [vmem:[%s6361_s25 + $0x560] sm:$0xff] %v3326_v46  ;;  %v2554_v13 = vadd.f32 %v8081_v21, %v2177_v4  ;;  %v2555_v41 = vadd.f32 %v8081_v21, %v2178_v42  ;;  %v2556_v59 = vadd.f32 %v8081_v21, %v2179_v28  ;;  %v8087_v42 = vld [vmem:[#allocation205_spill] sm:$0xff]  ;;  %v8090_v46 = vld [vmem:[#allocation212_spill] sm:$0xff] }
 0x3a3   : > { %3530 = vst [vmem:[%s6361_s25 + $0x568] sm:$0xff] %v3327_v23  ;;  %3531 = vst.msk [vmem:[%s6361_s25 + $0x570] sm:$0xff] %vm548_vm0, %v3328_v30  ;;  %v2557_v49 = vadd.f32 %v8081_v21, %v2180_v12  ;;  %v2558_v14 = vadd.f32 %v8081_v21, %v2181_v45  ;;  %v2559_v25 = vadd.f32 %v8081_v21, %v2182_v18  ;;  %v1842_v34 = vld [vmem:[%s4581_s1 + $0x620] sm:$0xff]  ;;  %v1843_v12 = vld [vmem:[%s4581_s1 + $0x628] sm:$0xff] }
 0x3a4   : > { %v2190_v63 = vmul.f32 %v1992_v55, %v8082_v33  ;;  %v2930_v27 = vadd.f32 %v8083_v57, %v2553_v40  ;;  %v2931_v5 = vadd.f32 %v8083_v57, %v2554_v13  ;;  %v2932_v16 = vadd.f32 %v8083_v57, %v2555_v41  ;;  %v1844_v31 = vld [vmem:[%s4581_s1 + $0x630] sm:$0xff]  ;;  %v1846_v21 = vld [vmem:[%s4581_s1 + $0x640] sm:$0xff]  ;;  %v1847_v40 = vld [vmem:[%s4581_s1 + $0x648] sm:$0xff] }
 0x3a5   : > { %v2933_v17 = vadd.f32 %v8083_v57, %v2556_v59  ;;  %v2934_v0 = vadd.f32 %v8083_v57, %v2557_v49  ;;  %v2935_v36 = vadd.f32 %v8083_v57, %v2558_v14  ;;  %v2936_v53 = vadd.f32 %v8083_v57, %v2559_v25  ;;  %v1848_v13 = vld [vmem:[%s4581_s1 + $0x650] sm:$0xff] }
 0x3a6   : > { %v2191_v19 = vmul.f32 %v1992_v55, %v8084_v2  ;;  %v3133_v9 = vadd.f32 %v2930_v27, %v1828_v20  ;;  %v3134_v26 = vadd.f32 %v2931_v5, %v1829_v51  ;;  %v3135_v8 = vadd.f32 %v2932_v16, %v1830_v60 }
 0x3a7   : > { %v3136_v11 = vadd.f32 %v2933_v17, %v1831_v48  ;;  %v3137_v44 = vadd.f32 %v2934_v0, %v1832_v61  ;;  %v3138_v39 = vadd.f32 %v2935_v36, %v1833_v22  ;;  %v3139_v38 = vadd.f32 %v2936_v53, %v1834_v35 }
 0x3a8   : > { %v2192_v50 = vmul.f32 %v1992_v55, %v8085_v37  ;;  %v3336_v29 = vmax.f32 %v3133_v9, 0.0  ;;  %v3337_v4 = vmax.f32 %v3134_v26, 0.0  ;;  %v3338_v62 = vmax.f32 %v3135_v8, 0.0 }
 0x3a9   : > { %v3339_v6 = vmax.f32 %v3136_v11, 0.0  ;;  %v3340_v15 = vmax.f32 %v3137_v44, 0.0  ;;  %v3341_v56 = vmax.f32 %v3138_v39, 0.0  ;;  %v3342_v47 = vmax.f32 %v3139_v38, 0.0 }
 0x3aa   : > { %v2193_v32 = vmul.f32 %v1992_v55, %v8086_v24  ;;  %3539 = vst [vmem:[%s6361_s25 + $0x5b0] sm:$0xff] %v3336_v29  ;;  %3540 = vst [vmem:[%s6361_s25 + $0x5b8] sm:$0xff] %v3337_v4  ;;  %v2194_v3 = vmul.f32 %v1992_v55, %v8087_v42  ;;  %v2195_v1 = vmul.f32 %v1992_v55, %v8088_v54 }
 0x3ab   : > { %3541 = vst [vmem:[%s6361_s25 + $0x5c0] sm:$0xff] %v3338_v62  ;;  %3542 = vst [vmem:[%s6361_s25 + $0x5c8] sm:$0xff] %v3339_v6  ;;  %v2196_v10 = vmul.f32 %v1992_v55, %v8089_v52  ;;  %v2567_v23 = vadd.f32 %v8090_v46, %v2190_v63  ;;  %v2568_v28 = vadd.f32 %v8090_v46, %v2191_v19  ;;  %v1845_v55 = vld [vmem:[%s4581_s1 + $0x638] sm:$0xff] }
 0x3ac   : > { %3543 = vst [vmem:[%s6361_s25 + $0x5d0] sm:$0xff] %v3340_v15  ;;  %3544 = vst [vmem:[%s6361_s25 + $0x5d8] sm:$0xff] %v3341_v56  ;;  %v2569_v30 = vadd.f32 %v8090_v46, %v2192_v50  ;;  %v2570_v58 = vadd.f32 %v8090_v46, %v2193_v32  ;;  %v2571_v45 = vadd.f32 %v8090_v46, %v2194_v3 }
 0x3ad   : > { %3545 = vst.msk [vmem:[%s6361_s25 + $0x5e0] sm:$0xff] %vm548_vm0, %v3342_v47  ;;  %v2572_v7 = vadd.f32 %v8090_v46, %v2195_v1  ;;  %v2573_v18 = vadd.f32 %v8090_v46, %v2196_v10  ;;  %v2944_v20 = vadd.f32 %v2746_v43, %v2567_v23  ;;  %v2945_v41 = vadd.f32 %v2746_v43, %v2568_v28 }
 0x3ae   : > { %v2946_v59 = vadd.f32 %v2746_v43, %v2569_v30  ;;  %v2947_v51 = vadd.f32 %v2746_v43, %v2570_v58  ;;  %v2948_v60 = vadd.f32 %v2746_v43, %v2571_v45 }
 0x3af   : > { %v2949_v48 = vadd.f32 %v2746_v43, %v2572_v7  ;;  %v2950_v49 = vadd.f32 %v2746_v43, %v2573_v18  ;;  %v3147_v14 = vadd.f32 %v2944_v20, %v1842_v34  ;;  %v3148_v25 = vadd.f32 %v2945_v41, %v1843_v12 }
 0x3b0   : > { %v3149_v33 = vadd.f32 %v2946_v59, %v1844_v31  ;;  %v3150_v63 = vadd.f32 %v2947_v51, %v1845_v55  ;;  %v3151_v61 = vadd.f32 %v2948_v60, %v1846_v21 }
 0x3b1   : > { %v3152_v22 = vadd.f32 %v2949_v48, %v1847_v40  ;;  %v3153_v35 = vadd.f32 %v2950_v49, %v1848_v13  ;;  %v3350_v57 = vmax.f32 %v3147_v14, 0.0  ;;  %v3351_v27 = vmax.f32 %v3148_v25, 0.0 }
 0x3b2   : > { %v3352_v5 = vmax.f32 %v3149_v33, 0.0  ;;  %v3353_v16 = vmax.f32 %v3150_v63, 0.0  ;;  %v3354_v17 = vmax.f32 %v3151_v61, 0.0 }
 0x3b3   : > { %v3355_v0 = vmax.f32 %v3152_v22, 0.0  ;;  %v3356_v36 = vmax.f32 %v3153_v35, 0.0  ;;  %3553 = vst [vmem:[%s6361_s25 + $0x620] sm:$0xff] %v3350_v57  ;;  %3554 = vst [vmem:[%s6361_s25 + $0x628] sm:$0xff] %v3351_v27 }
 0x3b4   : > { %3555 = vst [vmem:[%s6361_s25 + $0x630] sm:$0xff] %v3352_v5  ;;  %3556 = vst [vmem:[%s6361_s25 + $0x638] sm:$0xff] %v3353_v16 }
 0x3b5   : > { %3557 = vst [vmem:[%s6361_s25 + $0x640] sm:$0xff] %v3354_v17  ;;  %3558 = vst [vmem:[%s6361_s25 + $0x648] sm:$0xff] %v3355_v0 }
 0x3b6   : > { %3559 = vst.msk [vmem:[%s6361_s25 + $0x650] sm:$0xff] %vm548_vm0, %v3356_v36 }
 0x3b7   : > { %4232 = shalt.err (!%p4229_p5)
}
 0x3b8   : > { %s4233_s29 = scalar_lea.hbm %s7360_s9, 25984  ;;  %s4237_s1 = scalar_lea.hbm %s7417_s4, 77952 }
 0x3b9   : > { %p4234_p1 = scmp.ne.s32.totalorder %s7360_s9, %s4233_s29  ;;  %p4238_p13 = scmp.lt.u32.totalorder %s7360_s9, %s7417_s4 }
 0x3ba   : > { %p4239_p2 = scmp.lt.u32.totalorder %s4237_s1, %s4233_s29  ;;  %p4241_p12 = scmp.lt.u32.totalorder %s4233_s29, %s7360_s9 }
 0x3bb   : > { %p4235_p7 = pnand %p4234_p1, %p8091_p0 }
 0x3bc   : > { %p4240_p6 = por %p4239_p2, %p4238_p13 }
 0x3bd   : > { %p4236_p10 = pneg %p4235_p7 }
 0x3be   : > { %p4242_p8 = por %p4241_p12, %p4240_p6 }
 0x3c0   : > { %p4243_p9 = pnand %p4242_p8, %p4236_p10 }
 0x3c2   : > { %4246 = shalt.err (!%p4243_p9)
}
 0x3c3   : > { %s4305_s6 = smov 896   ;;  %s4306_s20 = smov 56  }
 0x3c4   : > { %3744 = dma.vmem_to_hbm [thread:$0]  (%p8091_p0), %s7362_s8, 25984, %s7360_s9, %s3561_s24, %s4305_s6, %s4305_s6, %s4306_s20  }
 0x3c5 PF: > { %p3767_p11 = scmp.ge.s32.totalorder %s4293_s18, 2  ;;  %s3590_s25 = sand.u32 1, %s4281_s15  }
 0x3c6   : > { %p8092_p4 = scmp.ne.s32.totalorder %s7644_s27, 0  ;;  %s3591_s11 = scalar_lea.sflag [#allocation4], %s3590_s25 }
 0x3c8   : > { %p3760_p3 = pnand %p3767_p11, %p8092_p4 }
 0x3ca   : > { %4276 = dma.done.wait (!%p3760_p3), %s3591_s11, 25984  }
 0x3cb   : > { %4278 = vsyncadd (!%p3760_p3), %s3591_s11, 4294941312  ;;  %s8093_s19 = sld [smem:[#allocation15_spill]]  ;;  %p23_p5 = scmp.ge.s32.totalorder %s4357_s21, 5  }
 0x3cc   : > { %s8094_s15 = smov %s4285_s16  ;;  %s8095_s16 = smov %s4289_s17 }
 0x3cd   : > { %s8097_s18 = smov %s4357_s21  ;;  %25 = sbr.rel (!%p23_p5) target bundleno = 11 (0xb), region = 118 }
 0x3d1   : > { %s8096_s17 = smov %s8093_s19 }
 0x3d4   :  { %3596 = vsyncpa [#allocation3], 1 }
 0x3d5   :  { %3598 = vsyncpa [#allocation3 + $0x1], 1 }
 0x3d6   :  { %3599 = vsyncpa [#allocation6], 1 }
 0x3d7   :  { %3601 = vsyncpa [#allocation6 + $0x1], 1 }
 0x3d8   :  { %3602 = vsyncpa [#allocation9], 1 }
 0x3d9   :  { %3604 = vsyncpa [#allocation9 + $0x1], 1 }
 0x3da   :  { %3605 = vsyncpa [#allocation4], 1 }
 0x3db   :  { %3607 = vsyncpa [#allocation4 + $0x1], 1 }

</bundles_post_ra>
